<compile_context>
chip_gen: v5e
topology: v5e:2x2
jax: 0.10.0
libtpu: 0.0.40
codegen_flags: <defaults>
</compile_context>

<pallas_src>
import functools

import numpy as np
import jax
import jax.numpy as jnp
from jax.experimental import pallas as pl
from jax.experimental.pallas import tpu as pltpu

KSIZE = 7
PAD = 3


def _round_up(x, m):
    return ((x + m - 1) // m) * m


def cbam_kernel(x_ref, w1t_ref, w2t_ref, mask_ref, wc_ref, o_ref, ext_ref, *, W):
    # x_ref   : (Bt, C, HW)      lane-dense input slab (HW = H*W)
    # w1t_ref : (C, Cr)          f1.weight.T
    # w2t_ref : (Cr, C)          f2.weight.T
    # mask_ref: (KSIZE, HW)      per-j column-validity masks for the flat conv
    # wc_ref  : (98,) in SMEM    flattened (2, 7, 7) spatial-conv weight
    # o_ref   : (Bt, C, HW)
    # ext_ref : (2*Bt, NEXT)     flattened zero-bordered avg/max maps (VMEM)
    Bt, C, HW = x_ref.shape
    NEXT = ext_ref.shape[1]
    FRONT = PAD * W + PAD
    inv_hw = 1.0 / float(HW)
    inv_c = 1.0 / float(C)

    x = x_ref[...]                                              # (Bt, C, HW)

    # ---------------- Channel attention (stacked MXU MLP) ----------------
    avg_c = jnp.sum(x, axis=2, dtype=jnp.float32) * inv_hw      # (Bt, C) f32 acc
    max_c = jnp.max(x, axis=2).astype(jnp.float32)              # (Bt, C)
    pooled = jnp.concatenate([avg_c, max_c], axis=0)            # (2*Bt, C)
    h = jnp.maximum(
        jnp.dot(pooled, w1t_ref[...], preferred_element_type=jnp.float32), 0.0)
    mlp = jnp.dot(h, w2t_ref[...], preferred_element_type=jnp.float32)
    ca = jax.nn.sigmoid(mlp[:Bt] + mlp[Bt:])                    # (Bt, C) f32

    x1 = x * ca[:, :, None].astype(x.dtype)                     # (Bt, C, HW)

    # ---------------- Spatial attention ----------------
    avg_s = jnp.sum(x1, axis=1, dtype=jnp.float32) * inv_c      # (Bt, HW) f32 acc
    max_s = jnp.max(x1, axis=1).astype(jnp.float32)             # (Bt, HW)

    # Flattened zero-bordered maps: interior is rewritten every step; only the
    # small left/right border is re-zeroed (cheap, and correct under megacore
    # sharding of the batch axis, unlike a program_id==0 one-time init).
    ext_ref[:, 0:FRONT] = jnp.zeros((2 * Bt, FRONT), jnp.float32)
    ext_ref[:, FRONT + HW:NEXT] = jnp.zeros((2 * Bt, NEXT - FRONT - HW),
                                            jnp.float32)
    ext_ref[0:Bt, FRONT:FRONT + HW] = avg_s
    ext_ref[Bt:2 * Bt, FRONT:FRONT + HW] = max_s

    # Unrolled 7x7 cross-correlation on the flattened layout: each tap is one
    # contiguous HW-long lane slice at offset i*W + j (vld slot), scaled by an
    # SMEM scalar weight; column wrap is fixed by 7 per-j lane masks.
    conv = jnp.zeros((Bt, HW), jnp.float32)
    for j in range(KSIZE):
        acc_j = jnp.zeros((Bt, HW), jnp.float32)
        for i in range(KSIZE):
            off = i * W + j
            wa = wc_ref[i * KSIZE + j]                          # avg-channel tap
            wm = wc_ref[KSIZE * KSIZE + i * KSIZE + j]          # max-channel tap
            acc_j = (acc_j
                     + ext_ref[0:Bt, off:off + HW] * wa
                     + ext_ref[Bt:2 * Bt, off:off + HW] * wm)
        conv = conv + acc_j * mask_ref[j:j + 1, :]

    sa = jax.nn.sigmoid(conv)                                   # (Bt, HW) f32

    o_ref[...] = (x1 * sa[:, None, :].astype(x1.dtype)).astype(o_ref.dtype)


def _tpu_vmem_capacity_bytes():
    try:
        return int(pltpu.get_tpu_info().vmem_capacity_bytes)
    except Exception:
        return 64 * 1024 * 1024          # conservative: v7x per-TensorCore VMEM


def _pick_bt(batch, per_elem_bytes, target_bytes):
    """Batch rows per block: largest block <= target; prefer >=2 grid steps only
    when blocks stay >= ~1 MiB; re-balance so a ragged last block wastes little."""
    bt = int(max(1, min(batch, target_bytes // max(per_elem_bytes, 1))))
    if bt >= batch and batch > 1:
        half = (batch + 1) // 2
        if half * per_elem_bytes >= (1 << 20):
            bt = half
    steps = -(-batch // bt)
    return -(-batch // steps)


@jax.jit
def cbam_pallas(x, w1, w2, wconv):
    B, C, H, W = x.shape
    Cr = w1.shape[0]
    HW = H * W
    NEXT = _round_up(HW + 2 * PAD * W + 2 * PAD, 128)

    vmem_cap = _tpu_vmem_capacity_bytes()
    # Memory-bound kernel: big blocks amortize per-step overhead; keep a smaller
    # target when the reported VMEM capacity is small (v7x: 64 MiB per TC).
    target_bytes = (4 << 20) if vmem_cap >= (100 << 20) else (2 << 20)

    per_elem_bytes = C * HW * x.dtype.itemsize
    bt = _pick_bt(B, per_elem_bytes, target_bytes)
    grid = (pl.cdiv(B, bt),)

    x3 = x.reshape(B, C, HW)                                    # lane-dense layout
    w1t = jnp.transpose(w1).astype(jnp.float32)                 # (C, Cr)
    w2t = jnp.transpose(w2).astype(jnp.float32)                 # (Cr, C)
    wc_flat = wconv.reshape(2 * KSIZE * KSIZE).astype(jnp.float32)

    # Static per-j column-validity masks for the flattened conv.
    col = np.arange(HW) % W
    masks = np.stack(
        [((col + j - PAD >= 0) & (col + j - PAD < W)).astype(np.float32)
         for j in range(KSIZE)], axis=0)                        # (KSIZE, HW)
    masks = jnp.asarray(masks)

    # VMEM budget: 2x double-buffered input + 2x output blocks, ~3 f32-block
    # temps (x1 / products), ext scratch, resident small operands, 25% headroom.
    block_bytes = bt * per_elem_bytes
    f32_block = bt * C * HW * 4
    ext_bytes = 2 * bt * NEXT * 4
    small_bytes = 2 * (w1t.size + w2t.size + masks.size) * 4
    vmem_needed = 4 * block_bytes + 3 * f32_block + ext_bytes + small_bytes
    vmem_limit = int(min(max(vmem_cap - (24 << 20), 24 << 20),
                         max(8 << 20, int(vmem_needed * 1.25))))

    kernel = functools.partial(cbam_kernel, W=W)

    out3 = pl.pallas_call(
        kernel,
        out_shape=jax.ShapeDtypeStruct((B, C, HW), x.dtype),
        grid_spec=pltpu.PrefetchScalarGridSpec(
            num_scalar_prefetch=0,
            grid=grid,
            in_specs=[
                pl.BlockSpec((bt, C, HW), lambda b: (b, 0, 0)),
                pl.BlockSpec((C, Cr), lambda b: (0, 0)),
                pl.BlockSpec((Cr, C), lambda b: (0, 0)),
                pl.BlockSpec((KSIZE, HW), lambda b: (0, 0)),
                pl.BlockSpec(memory_space=pltpu.MemorySpace.SMEM),
            ],
            out_specs=pl.BlockSpec((bt, C, HW), lambda b: (b, 0, 0)),
            scratch_shapes=[
                pltpu.VMEM((2 * bt, NEXT), jnp.float32),
            ],
        ),
        compiler_params=pltpu.CompilerParams(
            dimension_semantics=("parallel",),
            vmem_limit_bytes=vmem_limit),
    )(x3, w1t, w2t, masks, wc_flat)

    return out3.reshape(B, C, H, W)


def cbam_reference(x, w1, w2, wconv):
    """Pure-JAX reference mirroring the PyTorch forward."""
    avg = jnp.mean(x, axis=(2, 3))                 # (B, C)
    mx = jnp.max(x, axis=(2, 3))                   # (B, C)

    def mlp(v):
        h = jnp.maximum(v @ w1.T, 0.0)             # (B, Cr)
        return h @ w2.T                            # (B, C)

    ca = jax.nn.sigmoid(mlp(avg) + mlp(mx))[:, :, None, None]
    x1 = x * ca
    avg_s = jnp.mean(x1, axis=1, keepdims=True)
    max_s = jnp.max(x1, axis=1, keepdims=True)
    sp = jnp.concatenate([avg_s, max_s], axis=1)   # (B, 2, H, W)
    conv = jax.lax.conv_general_dilated(
        sp, wconv, window_strides=(1, 1),
        padding=[(PAD, PAD), (PAD, PAD)],
        dimension_numbers=("NCHW", "OIHW", "NCHW"))
    sa = jax.nn.sigmoid(conv)
    return x1 * sa


if __name__ == "__main__":
    B, C, H, W = 2, 32, 16, 16
    ratio = 16
    Cr = C // ratio                                # hidden channels = 2

    key = jax.random.PRNGKey(0)
    kx, k1, k2, k3 = jax.random.split(key, 4)
    x = jax.random.normal(kx, (B, C, H, W), dtype=jnp.float32)
    # deterministic synthetic parameters (shapes from nn.Conv2d in __init__)
    w1 = jax.random.normal(k1, (Cr, C), dtype=jnp.float32) * 0.1   # f1 weight (1x1)
    w2 = jax.random.normal(k2, (C, Cr), dtype=jnp.float32) * 0.1   # f2 weight (1x1)
    wconv = jax.random.normal(k3, (1, 2, KSIZE, KSIZE), dtype=jnp.float32) * 0.1

    out = cbam_pallas(x, w1, w2, wconv)
    jax.block_until_ready(out)

    ref = cbam_reference(x, w1, w2, wconv)
    assert out.shape == (B, C, H, W)
    # tolerance covers MXU vs XLA f32 matmul precision differences in the tiny MLP
    assert jnp.allclose(out, ref, rtol=2e-3, atol=2e-3), (
        float(jnp.max(jnp.abs(out - ref))))

    print("KERNEL_OK")
</pallas_src>

<mosaic_0001>
module attributes {stable_mosaic.version = 11 : i64} {
  func.func @cbam_kernel(%arg0: i32, %arg1: memref<2x32x256xf32, #tpu.memory_space<vmem>>, %arg2: memref<32x2xf32, #tpu.memory_space<vmem>>, %arg3: memref<2x32xf32, #tpu.memory_space<vmem>>, %arg4: memref<7x256xf32, #tpu.memory_space<vmem>>, %arg5: memref<98xf32, #tpu.memory_space<smem>>, %arg6: memref<2x32x256xf32, #tpu.memory_space<vmem>>, %arg7: memref<4x384xf32, #tpu.memory_space<vmem>>) attributes {dimension_semantics = [#tpu.dimension_semantics<parallel>], iteration_bounds = array<i64: 1>, scalar_prefetch = 0 : i64, scratch_operands = 1 : i64, tpu.core_type = #tpu.core_type<tc>, window_params = [{transform_indices = @transform_0, window_bounds = array<i64: 2, 32, 256>}, {pipeline_mode = #tpu.pipeline_mode<synchronous>, transform_indices = @transform_1, window_bounds = array<i64: 32, 2>}, {pipeline_mode = #tpu.pipeline_mode<synchronous>, transform_indices = @transform_2, window_bounds = array<i64: 2, 32>}, {pipeline_mode = #tpu.pipeline_mode<synchronous>, transform_indices = @transform_3, window_bounds = array<i64: 7, 256>}, {transform_indices = @transform_4, window_bounds = array<i64: 98>}, {transform_indices = @transform_5, window_bounds = array<i64: 2, 32, 256>}]} {
    %c0 = arith.constant 0 : index
    %c0_0 = arith.constant 0 : index
    %c0_1 = arith.constant 0 : index
    %0 = vector.load %arg1[%c0, %c0_0, %c0_1] : memref<2x32x256xf32, #tpu.memory_space<vmem>>, vector<2x32x256xf32>
    %cst = arith.constant dense<0.000000e+00> : vector<2x32xf32>
    %1 = vector.multi_reduction <add>, %0, %cst [2] : vector<2x32x256xf32> to vector<2x32xf32>
    %cst_2 = arith.constant 3.906250e-03 : f32
    %2 = vector.broadcast %cst_2 : f32 to vector<2x32xf32>
    %3 = arith.mulf %1, %2 : vector<2x32xf32>
    %cst_3 = arith.constant dense<0xFF800000> : vector<2x32xf32>
    %4 = vector.multi_reduction <maximumf>, %0, %cst_3 [2] : vector<2x32x256xf32> to vector<2x32xf32>
    %5 = tpu.concatenate %3, %4 in 0 : vector<2x32xf32>, vector<2x32xf32> -> vector<4x32xf32>
    %c0_4 = arith.constant 0 : index
    %c0_5 = arith.constant 0 : index
    %6 = vector.load %arg2[%c0_4, %c0_5] : memref<32x2xf32, #tpu.memory_space<vmem>>, vector<32x2xf32>
    %cst_6 = arith.constant dense<0.000000e+00> : vector<4x2xf32>
    %7 = tpu.matmul %5, %6, %cst_6 {dimension_numbers = #tpu.dot_dimension_numbers<[1], [0], [0], [1], [0, 0, 1, 1], [], []>} : vector<4x32xf32>, vector<32x2xf32>, vector<4x2xf32> -> vector<4x2xf32>
    %cst_7 = arith.constant 0.000000e+00 : f32
    %8 = vector.broadcast %cst_7 : f32 to vector<4x2xf32>
    %9 = arith.maximumf %7, %8 : vector<4x2xf32>
    %c0_8 = arith.constant 0 : index
    %c0_9 = arith.constant 0 : index
    %10 = vector.load %arg3[%c0_8, %c0_9] : memref<2x32xf32, #tpu.memory_space<vmem>>, vector<2x32xf32>
    %cst_10 = arith.constant dense<0.000000e+00> : vector<4x32xf32>
    %11 = tpu.matmul %9, %10, %cst_10 {dimension_numbers = #tpu.dot_dimension_numbers<[1], [0], [0], [1], [0, 0, 1, 1], [], []>} : vector<4x2xf32>, vector<2x32xf32>, vector<4x32xf32> -> vector<4x32xf32>
    %12 = vector.extract_strided_slice %11 {offsets = [0, 0], sizes = [2, 32], strides = [1, 1]} : vector<4x32xf32> to vector<2x32xf32>
    %13 = vector.extract_strided_slice %11 {offsets = [2, 0], sizes = [2, 32], strides = [1, 1]} : vector<4x32xf32> to vector<2x32xf32>
    %14 = arith.addf %12, %13 : vector<2x32xf32>
    %15 = arith.negf %14 : vector<2x32xf32>
    %16 = math.exp %15 : vector<2x32xf32>
    %cst_11 = arith.constant 1.000000e+00 : f32
    %17 = vector.broadcast %cst_11 : f32 to vector<2x32xf32>
    %18 = arith.addf %17, %16 : vector<2x32xf32>
    %19 = arith.divf %17, %18 : vector<2x32xf32>
    %20 = vector.shape_cast %19 : vector<2x32xf32> to vector<2x32x1xf32>
    %21 = vector.broadcast %20 : vector<2x32x1xf32> to vector<2x32x256xf32>
    %22 = arith.mulf %0, %21 : vector<2x32x256xf32>
    %cst_12 = arith.constant dense<0.000000e+00> : vector<2x256xf32>
    %23 = vector.multi_reduction <add>, %22, %cst_12 [1] : vector<2x32x256xf32> to vector<2x256xf32>
    %cst_13 = arith.constant 3.125000e-02 : f32
    %24 = vector.broadcast %cst_13 : f32 to vector<2x256xf32>
    %25 = arith.mulf %23, %24 : vector<2x256xf32>
    %cst_14 = arith.constant dense<0xFF800000> : vector<2x256xf32>
    %26 = vector.multi_reduction <maximumf>, %22, %cst_14 [1] : vector<2x32x256xf32> to vector<2x256xf32>
    %cst_15 = arith.constant 0.000000e+00 : f32
    %27 = vector.broadcast %cst_15 : f32 to vector<4x51xf32>
    %c0_16 = arith.constant 0 : index
    %c0_17 = arith.constant 0 : index
    %28 = vector.load %arg7[%c0_16, %c0_17] : memref<4x384xf32, #tpu.memory_space<vmem>>, vector<4x51xf32>
    tpu.vector_store %arg7[%c0_16, %c0_17], %27 {strides = array<i32>} : memref<4x384xf32, #tpu.memory_space<vmem>>, vector<4x51xf32>,
    %cst_18 = arith.constant 0.000000e+00 : f32
    %29 = vector.broadcast %cst_18 : f32 to vector<4x77xf32>
    %c0_19 = arith.constant 0 : index
    %c307 = arith.constant 307 : index
    %30 = vector.load %arg7[%c0_19, %c307] : memref<4x384xf32, #tpu.memory_space<vmem>>, vector<4x77xf32>
    tpu.vector_store %arg7[%c0_19, %c307], %29 {strides = array<i32>} : memref<4x384xf32, #tpu.memory_space<vmem>>, vector<4x77xf32>,
    %c0_20 = arith.constant 0 : index
    %c51 = arith.constant 51 : index
    %31 = vector.load %arg7[%c0_20, %c51] : memref<4x384xf32, #tpu.memory_space<vmem>>, vector<2x256xf32>
    tpu.vector_store %arg7[%c0_20, %c51], %25 {strides = array<i32>} : memref<4x384xf32, #tpu.memory_space<vmem>>, vector<2x256xf32>,
    %c2 = arith.constant 2 : index
    %c51_21 = arith.constant 51 : index
    %32 = vector.load %arg7[%c2, %c51_21] : memref<4x384xf32, #tpu.memory_space<vmem>>, vector<2x256xf32>
    tpu.vector_store %arg7[%c2, %c51_21], %26 {strides = array<i32>} : memref<4x384xf32, #tpu.memory_space<vmem>>, vector<2x256xf32>,
    %cst_22 = arith.constant 0.000000e+00 : f32
    %33 = vector.broadcast %cst_22 : f32 to vector<2x256xf32>
    %cst_23 = arith.constant 0.000000e+00 : f32
    %34 = vector.broadcast %cst_23 : f32 to vector<2x256xf32>
    %c0_24 = arith.constant 0 : index
    %35 = memref.load %arg5[%c0_24] : memref<98xf32, #tpu.memory_space<smem>>
    %c49 = arith.constant 49 : index
    %36 = memref.load %arg5[%c49] : memref<98xf32, #tpu.memory_space<smem>>
    %c0_25 = arith.constant 0 : index
    %c0_26 = arith.constant 0 : index
    %37 = vector.load %arg7[%c0_25, %c0_26] : memref<4x384xf32, #tpu.memory_space<vmem>>, vector<2x256xf32>
    %38 = vector.broadcast %35 : f32 to vector<2x256xf32>
    %39 = arith.mulf %37, %38 : vector<2x256xf32>
    %40 = arith.addf %34, %39 : vector<2x256xf32>
    %c2_27 = arith.constant 2 : index
    %c0_28 = arith.constant 0 : index
    %41 = vector.load %arg7[%c2_27, %c0_28] : memref<4x384xf32, #tpu.memory_space<vmem>>, vector<2x256xf32>
    %42 = vector.broadcast %36 : f32 to vector<2x256xf32>
    %43 = arith.mulf %41, %42 : vector<2x256xf32>
    %44 = arith.addf %40, %43 : vector<2x256xf32>
    %c7 = arith.constant 7 : index
    %45 = memref.load %arg5[%c7] : memref<98xf32, #tpu.memory_space<smem>>
    %c56 = arith.constant 56 : index
    %46 = memref.load %arg5[%c56] : memref<98xf32, #tpu.memory_space<smem>>
    %c0_29 = arith.constant 0 : index
    %c16 = arith.constant 16 : index
    %47 = vector.load %arg7[%c0_29, %c16] : memref<4x384xf32, #tpu.memory_space<vmem>>, vector<2x256xf32>
    %48 = vector.broadcast %45 : f32 to vector<2x256xf32>
    %49 = arith.mulf %47, %48 : vector<2x256xf32>
    %50 = arith.addf %44, %49 : vector<2x256xf32>
    %c2_30 = arith.constant 2 : index
    %c16_31 = arith.constant 16 : index
    %51 = vector.load %arg7[%c2_30, %c16_31] : memref<4x384xf32, #tpu.memory_space<vmem>>, vector<2x256xf32>
    %52 = vector.broadcast %46 : f32 to vector<2x256xf32>
    %53 = arith.mulf %51, %52 : vector<2x256xf32>
    %54 = arith.addf %50, %53 : vector<2x256xf32>
    %c14 = arith.constant 14 : index
    %55 = memref.load %arg5[%c14] : memref<98xf32, #tpu.memory_space<smem>>
    %c63 = arith.constant 63 : index
    %56 = memref.load %arg5[%c63] : memref<98xf32, #tpu.memory_space<smem>>
    %c0_32 = arith.constant 0 : index
    %c32 = arith.constant 32 : index
    %57 = vector.load %arg7[%c0_32, %c32] : memref<4x384xf32, #tpu.memory_space<vmem>>, vector<2x256xf32>
    %58 = vector.broadcast %55 : f32 to vector<2x256xf32>
    %59 = arith.mulf %57, %58 : vector<2x256xf32>
    %60 = arith.addf %54, %59 : vector<2x256xf32>
    %c2_33 = arith.constant 2 : index
    %c32_34 = arith.constant 32 : index
    %61 = vector.load %arg7[%c2_33, %c32_34] : memref<4x384xf32, #tpu.memory_space<vmem>>, vector<2x256xf32>
    %62 = vector.broadcast %56 : f32 to vector<2x256xf32>
    %63 = arith.mulf %61, %62 : vector<2x256xf32>
    %64 = arith.addf %60, %63 : vector<2x256xf32>
    %c21 = arith.constant 21 : index
    %65 = memref.load %arg5[%c21] : memref<98xf32, #tpu.memory_space<smem>>
    %c70 = arith.constant 70 : index
    %66 = memref.load %arg5[%c70] : memref<98xf32, #tpu.memory_space<smem>>
    %c0_35 = arith.constant 0 : index
    %c48 = arith.constant 48 : index
    %67 = vector.load %arg7[%c0_35, %c48] : memref<4x384xf32, #tpu.memory_space<vmem>>, vector<2x256xf32>
    %68 = vector.broadcast %65 : f32 to vector<2x256xf32>
    %69 = arith.mulf %67, %68 : vector<2x256xf32>
    %70 = arith.addf %64, %69 : vector<2x256xf32>
    %c2_36 = arith.constant 2 : index
    %c48_37 = arith.constant 48 : index
    %71 = vector.load %arg7[%c2_36, %c48_37] : memref<4x384xf32, #tpu.memory_space<vmem>>, vector<2x256xf32>
    %72 = vector.broadcast %66 : f32 to vector<2x256xf32>
    %73 = arith.mulf %71, %72 : vector<2x256xf32>
    %74 = arith.addf %70, %73 : vector<2x256xf32>
    %c28 = arith.constant 28 : index
    %75 = memref.load %arg5[%c28] : memref<98xf32, #tpu.memory_space<smem>>
    %c77 = arith.constant 77 : index
    %76 = memref.load %arg5[%c77] : memref<98xf32, #tpu.memory_space<smem>>
    %c0_38 = arith.constant 0 : index
    %c64 = arith.constant 64 : index
    %77 = vector.load %arg7[%c0_38, %c64] : memref<4x384xf32, #tpu.memory_space<vmem>>, vector<2x256xf32>
    %78 = vector.broadcast %75 : f32 to vector<2x256xf32>
    %79 = arith.mulf %77, %78 : vector<2x256xf32>
    %80 = arith.addf %74, %79 : vector<2x256xf32>
    %c2_39 = arith.constant 2 : index
    %c64_40 = arith.constant 64 : index
    %81 = vector.load %arg7[%c2_39, %c64_40] : memref<4x384xf32, #tpu.memory_space<vmem>>, vector<2x256xf32>
    %82 = vector.broadcast %76 : f32 to vector<2x256xf32>
    %83 = arith.mulf %81, %82 : vector<2x256xf32>
    %84 = arith.addf %80, %83 : vector<2x256xf32>
    %c35 = arith.constant 35 : index
    %85 = memref.load %arg5[%c35] : memref<98xf32, #tpu.memory_space<smem>>
    %c84 = arith.constant 84 : index
    %86 = memref.load %arg5[%c84] : memref<98xf32, #tpu.memory_space<smem>>
    %c0_41 = arith.constant 0 : index
    %c80 = arith.constant 80 : index
    %87 = vector.load %arg7[%c0_41, %c80] : memref<4x384xf32, #tpu.memory_space<vmem>>, vector<2x256xf32>
    %88 = vector.broadcast %85 : f32 to vector<2x256xf32>
    %89 = arith.mulf %87, %88 : vector<2x256xf32>
    %90 = arith.addf %84, %89 : vector<2x256xf32>
    %c2_42 = arith.constant 2 : index
    %c80_43 = arith.constant 80 : index
    %91 = vector.load %arg7[%c2_42, %c80_43] : memref<4x384xf32, #tpu.memory_space<vmem>>, vector<2x256xf32>
    %92 = vector.broadcast %86 : f32 to vector<2x256xf32>
    %93 = arith.mulf %91, %92 : vector<2x256xf32>
    %94 = arith.addf %90, %93 : vector<2x256xf32>
    %c42 = arith.constant 42 : index
    %95 = memref.load %arg5[%c42] : memref<98xf32, #tpu.memory_space<smem>>
    %c91 = arith.constant 91 : index
    %96 = memref.load %arg5[%c91] : memref<98xf32, #tpu.memory_space<smem>>
    %c0_44 = arith.constant 0 : index
    %c96 = arith.constant 96 : index
    %97 = vector.load %arg7[%c0_44, %c96] : memref<4x384xf32, #tpu.memory_space<vmem>>, vector<2x256xf32>
    %98 = vector.broadcast %95 : f32 to vector<2x256xf32>
    %99 = arith.mulf %97, %98 : vector<2x256xf32>
    %100 = arith.addf %94, %99 : vector<2x256xf32>
    %c2_45 = arith.constant 2 : index
    %c96_46 = arith.constant 96 : index
    %101 = vector.load %arg7[%c2_45, %c96_46] : memref<4x384xf32, #tpu.memory_space<vmem>>, vector<2x256xf32>
    %102 = vector.broadcast %96 : f32 to vector<2x256xf32>
    %103 = arith.mulf %101, %102 : vector<2x256xf32>
    %104 = arith.addf %100, %103 : vector<2x256xf32>
    %c0_47 = arith.constant 0 : index
    %c0_48 = arith.constant 0 : index
    %105 = vector.load %arg4[%c0_47, %c0_48] : memref<7x256xf32, #tpu.memory_space<vmem>>, vector<1x256xf32>
    %106 = vector.broadcast %105 : vector<1x256xf32> to vector<2x256xf32>
    %107 = arith.mulf %104, %106 : vector<2x256xf32>
    %108 = arith.addf %33, %107 : vector<2x256xf32>
    %cst_49 = arith.constant 0.000000e+00 : f32
    %109 = vector.broadcast %cst_49 : f32 to vector<2x256xf32>
    %c1 = arith.constant 1 : index
    %110 = memref.load %arg5[%c1] : memref<98xf32, #tpu.memory_space<smem>>
    %c50 = arith.constant 50 : index
    %111 = memref.load %arg5[%c50] : memref<98xf32, #tpu.memory_space<smem>>
    %c0_50 = arith.constant 0 : index
    %c1_51 = arith.constant 1 : index
    %112 = vector.load %arg7[%c0_50, %c1_51] : memref<4x384xf32, #tpu.memory_space<vmem>>, vector<2x256xf32>
    %113 = vector.broadcast %110 : f32 to vector<2x256xf32>
    %114 = arith.mulf %112, %113 : vector<2x256xf32>
    %115 = arith.addf %109, %114 : vector<2x256xf32>
    %c2_52 = arith.constant 2 : index
    %c1_53 = arith.constant 1 : index
    %116 = vector.load %arg7[%c2_52, %c1_53] : memref<4x384xf32, #tpu.memory_space<vmem>>, vector<2x256xf32>
    %117 = vector.broadcast %111 : f32 to vector<2x256xf32>
    %118 = arith.mulf %116, %117 : vector<2x256xf32>
    %119 = arith.addf %115, %118 : vector<2x256xf32>
    %c8 = arith.constant 8 : index
    %120 = memref.load %arg5[%c8] : memref<98xf32, #tpu.memory_space<smem>>
    %c57 = arith.constant 57 : index
    %121 = memref.load %arg5[%c57] : memref<98xf32, #tpu.memory_space<smem>>
    %c0_54 = arith.constant 0 : index
    %c17 = arith.constant 17 : index
    %122 = vector.load %arg7[%c0_54, %c17] : memref<4x384xf32, #tpu.memory_space<vmem>>, vector<2x256xf32>
    %123 = vector.broadcast %120 : f32 to vector<2x256xf32>
    %124 = arith.mulf %122, %123 : vector<2x256xf32>
    %125 = arith.addf %119, %124 : vector<2x256xf32>
    %c2_55 = arith.constant 2 : index
    %c17_56 = arith.constant 17 : index
    %126 = vector.load %arg7[%c2_55, %c17_56] : memref<4x384xf32, #tpu.memory_space<vmem>>, vector<2x256xf32>
    %127 = vector.broadcast %121 : f32 to vector<2x256xf32>
    %128 = arith.mulf %126, %127 : vector<2x256xf32>
    %129 = arith.addf %125, %128 : vector<2x256xf32>
    %c15 = arith.constant 15 : index
    %130 = memref.load %arg5[%c15] : memref<98xf32, #tpu.memory_space<smem>>
    %c64_57 = arith.constant 64 : index
    %131 = memref.load %arg5[%c64_57] : memref<98xf32, #tpu.memory_space<smem>>
    %c0_58 = arith.constant 0 : index
    %c33 = arith.constant 33 : index
    %132 = vector.load %arg7[%c0_58, %c33] : memref<4x384xf32, #tpu.memory_space<vmem>>, vector<2x256xf32>
    %133 = vector.broadcast %130 : f32 to vector<2x256xf32>
    %134 = arith.mulf %132, %133 : vector<2x256xf32>
    %135 = arith.addf %129, %134 : vector<2x256xf32>
    %c2_59 = arith.constant 2 : index
    %c33_60 = arith.constant 33 : index
    %136 = vector.load %arg7[%c2_59, %c33_60] : memref<4x384xf32, #tpu.memory_space<vmem>>, vector<2x256xf32>
    %137 = vector.broadcast %131 : f32 to vector<2x256xf32>
    %138 = arith.mulf %136, %137 : vector<2x256xf32>
    %139 = arith.addf %135, %138 : vector<2x256xf32>
    %c22 = arith.constant 22 : index
    %140 = memref.load %arg5[%c22] : memref<98xf32, #tpu.memory_space<smem>>
    %c71 = arith.constant 71 : index
    %141 = memref.load %arg5[%c71] : memref<98xf32, #tpu.memory_space<smem>>
    %c0_61 = arith.constant 0 : index
    %c49_62 = arith.constant 49 : index
    %142 = vector.load %arg7[%c0_61, %c49_62] : memref<4x384xf32, #tpu.memory_space<vmem>>, vector<2x256xf32>
    %143 = vector.broadcast %140 : f32 to vector<2x256xf32>
    %144 = arith.mulf %142, %143 : vector<2x256xf32>
    %145 = arith.addf %139, %144 : vector<2x256xf32>
    %c2_63 = arith.constant 2 : index
    %c49_64 = arith.constant 49 : index
    %146 = vector.load %arg7[%c2_63, %c49_64] : memref<4x384xf32, #tpu.memory_space<vmem>>, vector<2x256xf32>
    %147 = vector.broadcast %141 : f32 to vector<2x256xf32>
    %148 = arith.mulf %146, %147 : vector<2x256xf32>
    %149 = arith.addf %145, %148 : vector<2x256xf32>
    %c29 = arith.constant 29 : index
    %150 = memref.load %arg5[%c29] : memref<98xf32, #tpu.memory_space<smem>>
    %c78 = arith.constant 78 : index
    %151 = memref.load %arg5[%c78] : memref<98xf32, #tpu.memory_space<smem>>
    %c0_65 = arith.constant 0 : index
    %c65 = arith.constant 65 : index
    %152 = vector.load %arg7[%c0_65, %c65] : memref<4x384xf32, #tpu.memory_space<vmem>>, vector<2x256xf32>
    %153 = vector.broadcast %150 : f32 to vector<2x256xf32>
    %154 = arith.mulf %152, %153 : vector<2x256xf32>
    %155 = arith.addf %149, %154 : vector<2x256xf32>
    %c2_66 = arith.constant 2 : index
    %c65_67 = arith.constant 65 : index
    %156 = vector.load %arg7[%c2_66, %c65_67] : memref<4x384xf32, #tpu.memory_space<vmem>>, vector<2x256xf32>
    %157 = vector.broadcast %151 : f32 to vector<2x256xf32>
    %158 = arith.mulf %156, %157 : vector<2x256xf32>
    %159 = arith.addf %155, %158 : vector<2x256xf32>
    %c36 = arith.constant 36 : index
    %160 = memref.load %arg5[%c36] : memref<98xf32, #tpu.memory_space<smem>>
    %c85 = arith.constant 85 : index
    %161 = memref.load %arg5[%c85] : memref<98xf32, #tpu.memory_space<smem>>
    %c0_68 = arith.constant 0 : index
    %c81 = arith.constant 81 : index
    %162 = vector.load %arg7[%c0_68, %c81] : memref<4x384xf32, #tpu.memory_space<vmem>>, vector<2x256xf32>
    %163 = vector.broadcast %160 : f32 to vector<2x256xf32>
    %164 = arith.mulf %162, %163 : vector<2x256xf32>
    %165 = arith.addf %159, %164 : vector<2x256xf32>
    %c2_69 = arith.constant 2 : index
    %c81_70 = arith.constant 81 : index
    %166 = vector.load %arg7[%c2_69, %c81_70] : memref<4x384xf32, #tpu.memory_space<vmem>>, vector<2x256xf32>
    %167 = vector.broadcast %161 : f32 to vector<2x256xf32>
    %168 = arith.mulf %166, %167 : vector<2x256xf32>
    %169 = arith.addf %165, %168 : vector<2x256xf32>
    %c43 = arith.constant 43 : index
    %170 = memref.load %arg5[%c43] : memref<98xf32, #tpu.memory_space<smem>>
    %c92 = arith.constant 92 : index
    %171 = memref.load %arg5[%c92] : memref<98xf32, #tpu.memory_space<smem>>
    %c0_71 = arith.constant 0 : index
    %c97 = arith.constant 97 : index
    %172 = vector.load %arg7[%c0_71, %c97] : memref<4x384xf32, #tpu.memory_space<vmem>>, vector<2x256xf32>
    %173 = vector.broadcast %170 : f32 to vector<2x256xf32>
    %174 = arith.mulf %172, %173 : vector<2x256xf32>
    %175 = arith.addf %169, %174 : vector<2x256xf32>
    %c2_72 = arith.constant 2 : index
    %c97_73 = arith.constant 97 : index
    %176 = vector.load %arg7[%c2_72, %c97_73] : memref<4x384xf32, #tpu.memory_space<vmem>>, vector<2x256xf32>
    %177 = vector.broadcast %171 : f32 to vector<2x256xf32>
    %178 = arith.mulf %176, %177 : vector<2x256xf32>
    %179 = arith.addf %175, %178 : vector<2x256xf32>
    %c1_74 = arith.constant 1 : index
    %c0_75 = arith.constant 0 : index
    %180 = vector.load %arg4[%c1_74, %c0_75] : memref<7x256xf32, #tpu.memory_space<vmem>>, vector<1x256xf32>
    %181 = vector.broadcast %180 : vector<1x256xf32> to vector<2x256xf32>
    %182 = arith.mulf %179, %181 : vector<2x256xf32>
    %183 = arith.addf %108, %182 : vector<2x256xf32>
    %cst_76 = arith.constant 0.000000e+00 : f32
    %184 = vector.broadcast %cst_76 : f32 to vector<2x256xf32>
    %c2_77 = arith.constant 2 : index
    %185 = memref.load %arg5[%c2_77] : memref<98xf32, #tpu.memory_space<smem>>
    %c51_78 = arith.constant 51 : index
    %186 = memref.load %arg5[%c51_78] : memref<98xf32, #tpu.memory_space<smem>>
    %c0_79 = arith.constant 0 : index
    %c2_80 = arith.constant 2 : index
    %187 = vector.load %arg7[%c0_79, %c2_80] : memref<4x384xf32, #tpu.memory_space<vmem>>, vector<2x256xf32>
    %188 = vector.broadcast %185 : f32 to vector<2x256xf32>
    %189 = arith.mulf %187, %188 : vector<2x256xf32>
    %190 = arith.addf %184, %189 : vector<2x256xf32>
    %c2_81 = arith.constant 2 : index
    %c2_82 = arith.constant 2 : index
    %191 = vector.load %arg7[%c2_81, %c2_82] : memref<4x384xf32, #tpu.memory_space<vmem>>, vector<2x256xf32>
    %192 = vector.broadcast %186 : f32 to vector<2x256xf32>
    %193 = arith.mulf %191, %192 : vector<2x256xf32>
    %194 = arith.addf %190, %193 : vector<2x256xf32>
    %c9 = arith.constant 9 : index
    %195 = memref.load %arg5[%c9] : memref<98xf32, #tpu.memory_space<smem>>
    %c58 = arith.constant 58 : index
    %196 = memref.load %arg5[%c58] : memref<98xf32, #tpu.memory_space<smem>>
    %c0_83 = arith.constant 0 : index
    %c18 = arith.constant 18 : index
    %197 = vector.load %arg7[%c0_83, %c18] : memref<4x384xf32, #tpu.memory_space<vmem>>, vector<2x256xf32>
    %198 = vector.broadcast %195 : f32 to vector<2x256xf32>
    %199 = arith.mulf %197, %198 : vector<2x256xf32>
    %200 = arith.addf %194, %199 : vector<2x256xf32>
    %c2_84 = arith.constant 2 : index
    %c18_85 = arith.constant 18 : index
    %201 = vector.load %arg7[%c2_84, %c18_85] : memref<4x384xf32, #tpu.memory_space<vmem>>, vector<2x256xf32>
    %202 = vector.broadcast %196 : f32 to vector<2x256xf32>
    %203 = arith.mulf %201, %202 : vector<2x256xf32>
    %204 = arith.addf %200, %203 : vector<2x256xf32>
    %c16_86 = arith.constant 16 : index
    %205 = memref.load %arg5[%c16_86] : memref<98xf32, #tpu.memory_space<smem>>
    %c65_87 = arith.constant 65 : index
    %206 = memref.load %arg5[%c65_87] : memref<98xf32, #tpu.memory_space<smem>>
    %c0_88 = arith.constant 0 : index
    %c34 = arith.constant 34 : index
    %207 = vector.load %arg7[%c0_88, %c34] : memref<4x384xf32, #tpu.memory_space<vmem>>, vector<2x256xf32>
    %208 = vector.broadcast %205 : f32 to vector<2x256xf32>
    %209 = arith.mulf %207, %208 : vector<2x256xf32>
    %210 = arith.addf %204, %209 : vector<2x256xf32>
    %c2_89 = arith.constant 2 : index
    %c34_90 = arith.constant 34 : index
    %211 = vector.load %arg7[%c2_89, %c34_90] : memref<4x384xf32, #tpu.memory_space<vmem>>, vector<2x256xf32>
    %212 = vector.broadcast %206 : f32 to vector<2x256xf32>
    %213 = arith.mulf %211, %212 : vector<2x256xf32>
    %214 = arith.addf %210, %213 : vector<2x256xf32>
    %c23 = arith.constant 23 : index
    %215 = memref.load %arg5[%c23] : memref<98xf32, #tpu.memory_space<smem>>
    %c72 = arith.constant 72 : index
    %216 = memref.load %arg5[%c72] : memref<98xf32, #tpu.memory_space<smem>>
    %c0_91 = arith.constant 0 : index
    %c50_92 = arith.constant 50 : index
    %217 = vector.load %arg7[%c0_91, %c50_92] : memref<4x384xf32, #tpu.memory_space<vmem>>, vector<2x256xf32>
    %218 = vector.broadcast %215 : f32 to vector<2x256xf32>
    %219 = arith.mulf %217, %218 : vector<2x256xf32>
    %220 = arith.addf %214, %219 : vector<2x256xf32>
    %c2_93 = arith.constant 2 : index
    %c50_94 = arith.constant 50 : index
    %221 = vector.load %arg7[%c2_93, %c50_94] : memref<4x384xf32, #tpu.memory_space<vmem>>, vector<2x256xf32>
    %222 = vector.broadcast %216 : f32 to vector<2x256xf32>
    %223 = arith.mulf %221, %222 : vector<2x256xf32>
    %224 = arith.addf %220, %223 : vector<2x256xf32>
    %c30 = arith.constant 30 : index
    %225 = memref.load %arg5[%c30] : memref<98xf32, #tpu.memory_space<smem>>
    %c79 = arith.constant 79 : index
    %226 = memref.load %arg5[%c79] : memref<98xf32, #tpu.memory_space<smem>>
    %c0_95 = arith.constant 0 : index
    %c66 = arith.constant 66 : index
    %227 = vector.load %arg7[%c0_95, %c66] : memref<4x384xf32, #tpu.memory_space<vmem>>, vector<2x256xf32>
    %228 = vector.broadcast %225 : f32 to vector<2x256xf32>
    %229 = arith.mulf %227, %228 : vector<2x256xf32>
    %230 = arith.addf %224, %229 : vector<2x256xf32>
    %c2_96 = arith.constant 2 : index
    %c66_97 = arith.constant 66 : index
    %231 = vector.load %arg7[%c2_96, %c66_97] : memref<4x384xf32, #tpu.memory_space<vmem>>, vector<2x256xf32>
    %232 = vector.broadcast %226 : f32 to vector<2x256xf32>
    %233 = arith.mulf %231, %232 : vector<2x256xf32>
    %234 = arith.addf %230, %233 : vector<2x256xf32>
    %c37 = arith.constant 37 : index
    %235 = memref.load %arg5[%c37] : memref<98xf32, #tpu.memory_space<smem>>
    %c86 = arith.constant 86 : index
    %236 = memref.load %arg5[%c86] : memref<98xf32, #tpu.memory_space<smem>>
    %c0_98 = arith.constant 0 : index
    %c82 = arith.constant 82 : index
    %237 = vector.load %arg7[%c0_98, %c82] : memref<4x384xf32, #tpu.memory_space<vmem>>, vector<2x256xf32>
    %238 = vector.broadcast %235 : f32 to vector<2x256xf32>
    %239 = arith.mulf %237, %238 : vector<2x256xf32>
    %240 = arith.addf %234, %239 : vector<2x256xf32>
    %c2_99 = arith.constant 2 : index
    %c82_100 = arith.constant 82 : index
    %241 = vector.load %arg7[%c2_99, %c82_100] : memref<4x384xf32, #tpu.memory_space<vmem>>, vector<2x256xf32>
    %242 = vector.broadcast %236 : f32 to vector<2x256xf32>
    %243 = arith.mulf %241, %242 : vector<2x256xf32>
    %244 = arith.addf %240, %243 : vector<2x256xf32>
    %c44 = arith.constant 44 : index
    %245 = memref.load %arg5[%c44] : memref<98xf32, #tpu.memory_space<smem>>
    %c93 = arith.constant 93 : index
    %246 = memref.load %arg5[%c93] : memref<98xf32, #tpu.memory_space<smem>>
    %c0_101 = arith.constant 0 : index
    %c98 = arith.constant 98 : index
    %247 = vector.load %arg7[%c0_101, %c98] : memref<4x384xf32, #tpu.memory_space<vmem>>, vector<2x256xf32>
    %248 = vector.broadcast %245 : f32 to vector<2x256xf32>
    %249 = arith.mulf %247, %248 : vector<2x256xf32>
    %250 = arith.addf %244, %249 : vector<2x256xf32>
    %c2_102 = arith.constant 2 : index
    %c98_103 = arith.constant 98 : index
    %251 = vector.load %arg7[%c2_102, %c98_103] : memref<4x384xf32, #tpu.memory_space<vmem>>, vector<2x256xf32>
    %252 = vector.broadcast %246 : f32 to vector<2x256xf32>
    %253 = arith.mulf %251, %252 : vector<2x256xf32>
    %254 = arith.addf %250, %253 : vector<2x256xf32>
    %c2_104 = arith.constant 2 : index
    %c0_105 = arith.constant 0 : index
    %255 = vector.load %arg4[%c2_104, %c0_105] : memref<7x256xf32, #tpu.memory_space<vmem>>, vector<1x256xf32>
    %256 = vector.broadcast %255 : vector<1x256xf32> to vector<2x256xf32>
    %257 = arith.mulf %254, %256 : vector<2x256xf32>
    %258 = arith.addf %183, %257 : vector<2x256xf32>
    %cst_106 = arith.constant 0.000000e+00 : f32
    %259 = vector.broadcast %cst_106 : f32 to vector<2x256xf32>
    %c3 = arith.constant 3 : index
    %260 = memref.load %arg5[%c3] : memref<98xf32, #tpu.memory_space<smem>>
    %c52 = arith.constant 52 : index
    %261 = memref.load %arg5[%c52] : memref<98xf32, #tpu.memory_space<smem>>
    %c0_107 = arith.constant 0 : index
    %c3_108 = arith.constant 3 : index
    %262 = vector.load %arg7[%c0_107, %c3_108] : memref<4x384xf32, #tpu.memory_space<vmem>>, vector<2x256xf32>
    %263 = vector.broadcast %260 : f32 to vector<2x256xf32>
    %264 = arith.mulf %262, %263 : vector<2x256xf32>
    %265 = arith.addf %259, %264 : vector<2x256xf32>
    %c2_109 = arith.constant 2 : index
    %c3_110 = arith.constant 3 : index
    %266 = vector.load %arg7[%c2_109, %c3_110] : memref<4x384xf32, #tpu.memory_space<vmem>>, vector<2x256xf32>
    %267 = vector.broadcast %261 : f32 to vector<2x256xf32>
    %268 = arith.mulf %266, %267 : vector<2x256xf32>
    %269 = arith.addf %265, %268 : vector<2x256xf32>
    %c10 = arith.constant 10 : index
    %270 = memref.load %arg5[%c10] : memref<98xf32, #tpu.memory_space<smem>>
    %c59 = arith.constant 59 : index
    %271 = memref.load %arg5[%c59] : memref<98xf32, #tpu.memory_space<smem>>
    %c0_111 = arith.constant 0 : index
    %c19 = arith.constant 19 : index
    %272 = vector.load %arg7[%c0_111, %c19] : memref<4x384xf32, #tpu.memory_space<vmem>>, vector<2x256xf32>
    %273 = vector.broadcast %270 : f32 to vector<2x256xf32>
    %274 = arith.mulf %272, %273 : vector<2x256xf32>
    %275 = arith.addf %269, %274 : vector<2x256xf32>
    %c2_112 = arith.constant 2 : index
    %c19_113 = arith.constant 19 : index
    %276 = vector.load %arg7[%c2_112, %c19_113] : memref<4x384xf32, #tpu.memory_space<vmem>>, vector<2x256xf32>
    %277 = vector.broadcast %271 : f32 to vector<2x256xf32>
    %278 = arith.mulf %276, %277 : vector<2x256xf32>
    %279 = arith.addf %275, %278 : vector<2x256xf32>
    %c17_114 = arith.constant 17 : index
    %280 = memref.load %arg5[%c17_114] : memref<98xf32, #tpu.memory_space<smem>>
    %c66_115 = arith.constant 66 : index
    %281 = memref.load %arg5[%c66_115] : memref<98xf32, #tpu.memory_space<smem>>
    %c0_116 = arith.constant 0 : index
    %c35_117 = arith.constant 35 : index
    %282 = vector.load %arg7[%c0_116, %c35_117] : memref<4x384xf32, #tpu.memory_space<vmem>>, vector<2x256xf32>
    %283 = vector.broadcast %280 : f32 to vector<2x256xf32>
    %284 = arith.mulf %282, %283 : vector<2x256xf32>
    %285 = arith.addf %279, %284 : vector<2x256xf32>
    %c2_118 = arith.constant 2 : index
    %c35_119 = arith.constant 35 : index
    %286 = vector.load %arg7[%c2_118, %c35_119] : memref<4x384xf32, #tpu.memory_space<vmem>>, vector<2x256xf32>
    %287 = vector.broadcast %281 : f32 to vector<2x256xf32>
    %288 = arith.mulf %286, %287 : vector<2x256xf32>
    %289 = arith.addf %285, %288 : vector<2x256xf32>
    %c24 = arith.constant 24 : index
    %290 = memref.load %arg5[%c24] : memref<98xf32, #tpu.memory_space<smem>>
    %c73 = arith.constant 73 : index
    %291 = memref.load %arg5[%c73] : memref<98xf32, #tpu.memory_space<smem>>
    %c0_120 = arith.constant 0 : index
    %c51_121 = arith.constant 51 : index
    %292 = vector.load %arg7[%c0_120, %c51_121] : memref<4x384xf32, #tpu.memory_space<vmem>>, vector<2x256xf32>
    %293 = vector.broadcast %290 : f32 to vector<2x256xf32>
    %294 = arith.mulf %292, %293 : vector<2x256xf32>
    %295 = arith.addf %289, %294 : vector<2x256xf32>
    %c2_122 = arith.constant 2 : index
    %c51_123 = arith.constant 51 : index
    %296 = vector.load %arg7[%c2_122, %c51_123] : memref<4x384xf32, #tpu.memory_space<vmem>>, vector<2x256xf32>
    %297 = vector.broadcast %291 : f32 to vector<2x256xf32>
    %298 = arith.mulf %296, %297 : vector<2x256xf32>
    %299 = arith.addf %295, %298 : vector<2x256xf32>
    %c31 = arith.constant 31 : index
    %300 = memref.load %arg5[%c31] : memref<98xf32, #tpu.memory_space<smem>>
    %c80_124 = arith.constant 80 : index
    %301 = memref.load %arg5[%c80_124] : memref<98xf32, #tpu.memory_space<smem>>
    %c0_125 = arith.constant 0 : index
    %c67 = arith.constant 67 : index
    %302 = vector.load %arg7[%c0_125, %c67] : memref<4x384xf32, #tpu.memory_space<vmem>>, vector<2x256xf32>
    %303 = vector.broadcast %300 : f32 to vector<2x256xf32>
    %304 = arith.mulf %302, %303 : vector<2x256xf32>
    %305 = arith.addf %299, %304 : vector<2x256xf32>
    %c2_126 = arith.constant 2 : index
    %c67_127 = arith.constant 67 : index
    %306 = vector.load %arg7[%c2_126, %c67_127] : memref<4x384xf32, #tpu.memory_space<vmem>>, vector<2x256xf32>
    %307 = vector.broadcast %301 : f32 to vector<2x256xf32>
    %308 = arith.mulf %306, %307 : vector<2x256xf32>
    %309 = arith.addf %305, %308 : vector<2x256xf32>
    %c38 = arith.constant 38 : index
    %310 = memref.load %arg5[%c38] : memref<98xf32, #tpu.memory_space<smem>>
    %c87 = arith.constant 87 : index
    %311 = memref.load %arg5[%c87] : memref<98xf32, #tpu.memory_space<smem>>
    %c0_128 = arith.constant 0 : index
    %c83 = arith.constant 83 : index
    %312 = vector.load %arg7[%c0_128, %c83] : memref<4x384xf32, #tpu.memory_space<vmem>>, vector<2x256xf32>
    %313 = vector.broadcast %310 : f32 to vector<2x256xf32>
    %314 = arith.mulf %312, %313 : vector<2x256xf32>
    %315 = arith.addf %309, %314 : vector<2x256xf32>
    %c2_129 = arith.constant 2 : index
    %c83_130 = arith.constant 83 : index
    %316 = vector.load %arg7[%c2_129, %c83_130] : memref<4x384xf32, #tpu.memory_space<vmem>>, vector<2x256xf32>
    %317 = vector.broadcast %311 : f32 to vector<2x256xf32>
    %318 = arith.mulf %316, %317 : vector<2x256xf32>
    %319 = arith.addf %315, %318 : vector<2x256xf32>
    %c45 = arith.constant 45 : index
    %320 = memref.load %arg5[%c45] : memref<98xf32, #tpu.memory_space<smem>>
    %c94 = arith.constant 94 : index
    %321 = memref.load %arg5[%c94] : memref<98xf32, #tpu.memory_space<smem>>
    %c0_131 = arith.constant 0 : index
    %c99 = arith.constant 99 : index
    %322 = vector.load %arg7[%c0_131, %c99] : memref<4x384xf32, #tpu.memory_space<vmem>>, vector<2x256xf32>
    %323 = vector.broadcast %320 : f32 to vector<2x256xf32>
    %324 = arith.mulf %322, %323 : vector<2x256xf32>
    %325 = arith.addf %319, %324 : vector<2x256xf32>
    %c2_132 = arith.constant 2 : index
    %c99_133 = arith.constant 99 : index
    %326 = vector.load %arg7[%c2_132, %c99_133] : memref<4x384xf32, #tpu.memory_space<vmem>>, vector<2x256xf32>
    %327 = vector.broadcast %321 : f32 to vector<2x256xf32>
    %328 = arith.mulf %326, %327 : vector<2x256xf32>
    %329 = arith.addf %325, %328 : vector<2x256xf32>
    %c3_134 = arith.constant 3 : index
    %c0_135 = arith.constant 0 : index
    %330 = vector.load %arg4[%c3_134, %c0_135] : memref<7x256xf32, #tpu.memory_space<vmem>>, vector<1x256xf32>
    %331 = vector.broadcast %330 : vector<1x256xf32> to vector<2x256xf32>
    %332 = arith.mulf %329, %331 : vector<2x256xf32>
    %333 = arith.addf %258, %332 : vector<2x256xf32>
    %cst_136 = arith.constant 0.000000e+00 : f32
    %334 = vector.broadcast %cst_136 : f32 to vector<2x256xf32>
    %c4 = arith.constant 4 : index
    %335 = memref.load %arg5[%c4] : memref<98xf32, #tpu.memory_space<smem>>
    %c53 = arith.constant 53 : index
    %336 = memref.load %arg5[%c53] : memref<98xf32, #tpu.memory_space<smem>>
    %c0_137 = arith.constant 0 : index
    %c4_138 = arith.constant 4 : index
    %337 = vector.load %arg7[%c0_137, %c4_138] : memref<4x384xf32, #tpu.memory_space<vmem>>, vector<2x256xf32>
    %338 = vector.broadcast %335 : f32 to vector<2x256xf32>
    %339 = arith.mulf %337, %338 : vector<2x256xf32>
    %340 = arith.addf %334, %339 : vector<2x256xf32>
    %c2_139 = arith.constant 2 : index
    %c4_140 = arith.constant 4 : index
    %341 = vector.load %arg7[%c2_139, %c4_140] : memref<4x384xf32, #tpu.memory_space<vmem>>, vector<2x256xf32>
    %342 = vector.broadcast %336 : f32 to vector<2x256xf32>
    %343 = arith.mulf %341, %342 : vector<2x256xf32>
    %344 = arith.addf %340, %343 : vector<2x256xf32>
    %c11 = arith.constant 11 : index
    %345 = memref.load %arg5[%c11] : memref<98xf32, #tpu.memory_space<smem>>
    %c60 = arith.constant 60 : index
    %346 = memref.load %arg5[%c60] : memref<98xf32, #tpu.memory_space<smem>>
    %c0_141 = arith.constant 0 : index
    %c20 = arith.constant 20 : index
    %347 = vector.load %arg7[%c0_141, %c20] : memref<4x384xf32, #tpu.memory_space<vmem>>, vector<2x256xf32>
    %348 = vector.broadcast %345 : f32 to vector<2x256xf32>
    %349 = arith.mulf %347, %348 : vector<2x256xf32>
    %350 = arith.addf %344, %349 : vector<2x256xf32>
    %c2_142 = arith.constant 2 : index
    %c20_143 = arith.constant 20 : index
    %351 = vector.load %arg7[%c2_142, %c20_143] : memref<4x384xf32, #tpu.memory_space<vmem>>, vector<2x256xf32>
    %352 = vector.broadcast %346 : f32 to vector<2x256xf32>
    %353 = arith.mulf %351, %352 : vector<2x256xf32>
    %354 = arith.addf %350, %353 : vector<2x256xf32>
    %c18_144 = arith.constant 18 : index
    %355 = memref.load %arg5[%c18_144] : memref<98xf32, #tpu.memory_space<smem>>
    %c67_145 = arith.constant 67 : index
    %356 = memref.load %arg5[%c67_145] : memref<98xf32, #tpu.memory_space<smem>>
    %c0_146 = arith.constant 0 : index
    %c36_147 = arith.constant 36 : index
    %357 = vector.load %arg7[%c0_146, %c36_147] : memref<4x384xf32, #tpu.memory_space<vmem>>, vector<2x256xf32>
    %358 = vector.broadcast %355 : f32 to vector<2x256xf32>
    %359 = arith.mulf %357, %358 : vector<2x256xf32>
    %360 = arith.addf %354, %359 : vector<2x256xf32>
    %c2_148 = arith.constant 2 : index
    %c36_149 = arith.constant 36 : index
    %361 = vector.load %arg7[%c2_148, %c36_149] : memref<4x384xf32, #tpu.memory_space<vmem>>, vector<2x256xf32>
    %362 = vector.broadcast %356 : f32 to vector<2x256xf32>
    %363 = arith.mulf %361, %362 : vector<2x256xf32>
    %364 = arith.addf %360, %363 : vector<2x256xf32>
    %c25 = arith.constant 25 : index
    %365 = memref.load %arg5[%c25] : memref<98xf32, #tpu.memory_space<smem>>
    %c74 = arith.constant 74 : index
    %366 = memref.load %arg5[%c74] : memref<98xf32, #tpu.memory_space<smem>>
    %c0_150 = arith.constant 0 : index
    %c52_151 = arith.constant 52 : index
    %367 = vector.load %arg7[%c0_150, %c52_151] : memref<4x384xf32, #tpu.memory_space<vmem>>, vector<2x256xf32>
    %368 = vector.broadcast %365 : f32 to vector<2x256xf32>
    %369 = arith.mulf %367, %368 : vector<2x256xf32>
    %370 = arith.addf %364, %369 : vector<2x256xf32>
    %c2_152 = arith.constant 2 : index
    %c52_153 = arith.constant 52 : index
    %371 = vector.load %arg7[%c2_152, %c52_153] : memref<4x384xf32, #tpu.memory_space<vmem>>, vector<2x256xf32>
    %372 = vector.broadcast %366 : f32 to vector<2x256xf32>
    %373 = arith.mulf %371, %372 : vector<2x256xf32>
    %374 = arith.addf %370, %373 : vector<2x256xf32>
    %c32_154 = arith.constant 32 : index
    %375 = memref.load %arg5[%c32_154] : memref<98xf32, #tpu.memory_space<smem>>
    %c81_155 = arith.constant 81 : index
    %376 = memref.load %arg5[%c81_155] : memref<98xf32, #tpu.memory_space<smem>>
    %c0_156 = arith.constant 0 : index
    %c68 = arith.constant 68 : index
    %377 = vector.load %arg7[%c0_156, %c68] : memref<4x384xf32, #tpu.memory_space<vmem>>, vector<2x256xf32>
    %378 = vector.broadcast %375 : f32 to vector<2x256xf32>
    %379 = arith.mulf %377, %378 : vector<2x256xf32>
    %380 = arith.addf %374, %379 : vector<2x256xf32>
    %c2_157 = arith.constant 2 : index
    %c68_158 = arith.constant 68 : index
    %381 = vector.load %arg7[%c2_157, %c68_158] : memref<4x384xf32, #tpu.memory_space<vmem>>, vector<2x256xf32>
    %382 = vector.broadcast %376 : f32 to vector<2x256xf32>
    %383 = arith.mulf %381, %382 : vector<2x256xf32>
    %384 = arith.addf %380, %383 : vector<2x256xf32>
    %c39 = arith.constant 39 : index
    %385 = memref.load %arg5[%c39] : memref<98xf32, #tpu.memory_space<smem>>
    %c88 = arith.constant 88 : index
    %386 = memref.load %arg5[%c88] : memref<98xf32, #tpu.memory_space<smem>>
    %c0_159 = arith.constant 0 : index
    %c84_160 = arith.constant 84 : index
    %387 = vector.load %arg7[%c0_159, %c84_160] : memref<4x384xf32, #tpu.memory_space<vmem>>, vector<2x256xf32>
    %388 = vector.broadcast %385 : f32 to vector<2x256xf32>
    %389 = arith.mulf %387, %388 : vector<2x256xf32>
    %390 = arith.addf %384, %389 : vector<2x256xf32>
    %c2_161 = arith.constant 2 : index
    %c84_162 = arith.constant 84 : index
    %391 = vector.load %arg7[%c2_161, %c84_162] : memref<4x384xf32, #tpu.memory_space<vmem>>, vector<2x256xf32>
    %392 = vector.broadcast %386 : f32 to vector<2x256xf32>
    %393 = arith.mulf %391, %392 : vector<2x256xf32>
    %394 = arith.addf %390, %393 : vector<2x256xf32>
    %c46 = arith.constant 46 : index
    %395 = memref.load %arg5[%c46] : memref<98xf32, #tpu.memory_space<smem>>
    %c95 = arith.constant 95 : index
    %396 = memref.load %arg5[%c95] : memref<98xf32, #tpu.memory_space<smem>>
    %c0_163 = arith.constant 0 : index
    %c100 = arith.constant 100 : index
    %397 = vector.load %arg7[%c0_163, %c100] : memref<4x384xf32, #tpu.memory_space<vmem>>, vector<2x256xf32>
    %398 = vector.broadcast %395 : f32 to vector<2x256xf32>
    %399 = arith.mulf %397, %398 : vector<2x256xf32>
    %400 = arith.addf %394, %399 : vector<2x256xf32>
    %c2_164 = arith.constant 2 : index
    %c100_165 = arith.constant 100 : index
    %401 = vector.load %arg7[%c2_164, %c100_165] : memref<4x384xf32, #tpu.memory_space<vmem>>, vector<2x256xf32>
    %402 = vector.broadcast %396 : f32 to vector<2x256xf32>
    %403 = arith.mulf %401, %402 : vector<2x256xf32>
    %404 = arith.addf %400, %403 : vector<2x256xf32>
    %c4_166 = arith.constant 4 : index
    %c0_167 = arith.constant 0 : index
    %405 = vector.load %arg4[%c4_166, %c0_167] : memref<7x256xf32, #tpu.memory_space<vmem>>, vector<1x256xf32>
    %406 = vector.broadcast %405 : vector<1x256xf32> to vector<2x256xf32>
    %407 = arith.mulf %404, %406 : vector<2x256xf32>
    %408 = arith.addf %333, %407 : vector<2x256xf32>
    %cst_168 = arith.constant 0.000000e+00 : f32
    %409 = vector.broadcast %cst_168 : f32 to vector<2x256xf32>
    %c5 = arith.constant 5 : index
    %410 = memref.load %arg5[%c5] : memref<98xf32, #tpu.memory_space<smem>>
    %c54 = arith.constant 54 : index
    %411 = memref.load %arg5[%c54] : memref<98xf32, #tpu.memory_space<smem>>
    %c0_169 = arith.constant 0 : index
    %c5_170 = arith.constant 5 : index
    %412 = vector.load %arg7[%c0_169, %c5_170] : memref<4x384xf32, #tpu.memory_space<vmem>>, vector<2x256xf32>
    %413 = vector.broadcast %410 : f32 to vector<2x256xf32>
    %414 = arith.mulf %412, %413 : vector<2x256xf32>
    %415 = arith.addf %409, %414 : vector<2x256xf32>
    %c2_171 = arith.constant 2 : index
    %c5_172 = arith.constant 5 : index
    %416 = vector.load %arg7[%c2_171, %c5_172] : memref<4x384xf32, #tpu.memory_space<vmem>>, vector<2x256xf32>
    %417 = vector.broadcast %411 : f32 to vector<2x256xf32>
    %418 = arith.mulf %416, %417 : vector<2x256xf32>
    %419 = arith.addf %415, %418 : vector<2x256xf32>
    %c12 = arith.constant 12 : index
    %420 = memref.load %arg5[%c12] : memref<98xf32, #tpu.memory_space<smem>>
    %c61 = arith.constant 61 : index
    %421 = memref.load %arg5[%c61] : memref<98xf32, #tpu.memory_space<smem>>
    %c0_173 = arith.constant 0 : index
    %c21_174 = arith.constant 21 : index
    %422 = vector.load %arg7[%c0_173, %c21_174] : memref<4x384xf32, #tpu.memory_space<vmem>>, vector<2x256xf32>
    %423 = vector.broadcast %420 : f32 to vector<2x256xf32>
    %424 = arith.mulf %422, %423 : vector<2x256xf32>
    %425 = arith.addf %419, %424 : vector<2x256xf32>
    %c2_175 = arith.constant 2 : index
    %c21_176 = arith.constant 21 : index
    %426 = vector.load %arg7[%c2_175, %c21_176] : memref<4x384xf32, #tpu.memory_space<vmem>>, vector<2x256xf32>
    %427 = vector.broadcast %421 : f32 to vector<2x256xf32>
    %428 = arith.mulf %426, %427 : vector<2x256xf32>
    %429 = arith.addf %425, %428 : vector<2x256xf32>
    %c19_177 = arith.constant 19 : index
    %430 = memref.load %arg5[%c19_177] : memref<98xf32, #tpu.memory_space<smem>>
    %c68_178 = arith.constant 68 : index
    %431 = memref.load %arg5[%c68_178] : memref<98xf32, #tpu.memory_space<smem>>
    %c0_179 = arith.constant 0 : index
    %c37_180 = arith.constant 37 : index
    %432 = vector.load %arg7[%c0_179, %c37_180] : memref<4x384xf32, #tpu.memory_space<vmem>>, vector<2x256xf32>
    %433 = vector.broadcast %430 : f32 to vector<2x256xf32>
    %434 = arith.mulf %432, %433 : vector<2x256xf32>
    %435 = arith.addf %429, %434 : vector<2x256xf32>
    %c2_181 = arith.constant 2 : index
    %c37_182 = arith.constant 37 : index
    %436 = vector.load %arg7[%c2_181, %c37_182] : memref<4x384xf32, #tpu.memory_space<vmem>>, vector<2x256xf32>
    %437 = vector.broadcast %431 : f32 to vector<2x256xf32>
    %438 = arith.mulf %436, %437 : vector<2x256xf32>
    %439 = arith.addf %435, %438 : vector<2x256xf32>
    %c26 = arith.constant 26 : index
    %440 = memref.load %arg5[%c26] : memref<98xf32, #tpu.memory_space<smem>>
    %c75 = arith.constant 75 : index
    %441 = memref.load %arg5[%c75] : memref<98xf32, #tpu.memory_space<smem>>
    %c0_183 = arith.constant 0 : index
    %c53_184 = arith.constant 53 : index
    %442 = vector.load %arg7[%c0_183, %c53_184] : memref<4x384xf32, #tpu.memory_space<vmem>>, vector<2x256xf32>
    %443 = vector.broadcast %440 : f32 to vector<2x256xf32>
    %444 = arith.mulf %442, %443 : vector<2x256xf32>
    %445 = arith.addf %439, %444 : vector<2x256xf32>
    %c2_185 = arith.constant 2 : index
    %c53_186 = arith.constant 53 : index
    %446 = vector.load %arg7[%c2_185, %c53_186] : memref<4x384xf32, #tpu.memory_space<vmem>>, vector<2x256xf32>
    %447 = vector.broadcast %441 : f32 to vector<2x256xf32>
    %448 = arith.mulf %446, %447 : vector<2x256xf32>
    %449 = arith.addf %445, %448 : vector<2x256xf32>
    %c33_187 = arith.constant 33 : index
    %450 = memref.load %arg5[%c33_187] : memref<98xf32, #tpu.memory_space<smem>>
    %c82_188 = arith.constant 82 : index
    %451 = memref.load %arg5[%c82_188] : memref<98xf32, #tpu.memory_space<smem>>
    %c0_189 = arith.constant 0 : index
    %c69 = arith.constant 69 : index
    %452 = vector.load %arg7[%c0_189, %c69] : memref<4x384xf32, #tpu.memory_space<vmem>>, vector<2x256xf32>
    %453 = vector.broadcast %450 : f32 to vector<2x256xf32>
    %454 = arith.mulf %452, %453 : vector<2x256xf32>
    %455 = arith.addf %449, %454 : vector<2x256xf32>
    %c2_190 = arith.constant 2 : index
    %c69_191 = arith.constant 69 : index
    %456 = vector.load %arg7[%c2_190, %c69_191] : memref<4x384xf32, #tpu.memory_space<vmem>>, vector<2x256xf32>
    %457 = vector.broadcast %451 : f32 to vector<2x256xf32>
    %458 = arith.mulf %456, %457 : vector<2x256xf32>
    %459 = arith.addf %455, %458 : vector<2x256xf32>
    %c40 = arith.constant 40 : index
    %460 = memref.load %arg5[%c40] : memref<98xf32, #tpu.memory_space<smem>>
    %c89 = arith.constant 89 : index
    %461 = memref.load %arg5[%c89] : memref<98xf32, #tpu.memory_space<smem>>
    %c0_192 = arith.constant 0 : index
    %c85_193 = arith.constant 85 : index
    %462 = vector.load %arg7[%c0_192, %c85_193] : memref<4x384xf32, #tpu.memory_space<vmem>>, vector<2x256xf32>
    %463 = vector.broadcast %460 : f32 to vector<2x256xf32>
    %464 = arith.mulf %462, %463 : vector<2x256xf32>
    %465 = arith.addf %459, %464 : vector<2x256xf32>
    %c2_194 = arith.constant 2 : index
    %c85_195 = arith.constant 85 : index
    %466 = vector.load %arg7[%c2_194, %c85_195] : memref<4x384xf32, #tpu.memory_space<vmem>>, vector<2x256xf32>
    %467 = vector.broadcast %461 : f32 to vector<2x256xf32>
    %468 = arith.mulf %466, %467 : vector<2x256xf32>
    %469 = arith.addf %465, %468 : vector<2x256xf32>
    %c47 = arith.constant 47 : index
    %470 = memref.load %arg5[%c47] : memref<98xf32, #tpu.memory_space<smem>>
    %c96_196 = arith.constant 96 : index
    %471 = memref.load %arg5[%c96_196] : memref<98xf32, #tpu.memory_space<smem>>
    %c0_197 = arith.constant 0 : index
    %c101 = arith.constant 101 : index
    %472 = vector.load %arg7[%c0_197, %c101] : memref<4x384xf32, #tpu.memory_space<vmem>>, vector<2x256xf32>
    %473 = vector.broadcast %470 : f32 to vector<2x256xf32>
    %474 = arith.mulf %472, %473 : vector<2x256xf32>
    %475 = arith.addf %469, %474 : vector<2x256xf32>
    %c2_198 = arith.constant 2 : index
    %c101_199 = arith.constant 101 : index
    %476 = vector.load %arg7[%c2_198, %c101_199] : memref<4x384xf32, #tpu.memory_space<vmem>>, vector<2x256xf32>
    %477 = vector.broadcast %471 : f32 to vector<2x256xf32>
    %478 = arith.mulf %476, %477 : vector<2x256xf32>
    %479 = arith.addf %475, %478 : vector<2x256xf32>
    %c5_200 = arith.constant 5 : index
    %c0_201 = arith.constant 0 : index
    %480 = vector.load %arg4[%c5_200, %c0_201] : memref<7x256xf32, #tpu.memory_space<vmem>>, vector<1x256xf32>
    %481 = vector.broadcast %480 : vector<1x256xf32> to vector<2x256xf32>
    %482 = arith.mulf %479, %481 : vector<2x256xf32>
    %483 = arith.addf %408, %482 : vector<2x256xf32>
    %cst_202 = arith.constant 0.000000e+00 : f32
    %484 = vector.broadcast %cst_202 : f32 to vector<2x256xf32>
    %c6 = arith.constant 6 : index
    %485 = memref.load %arg5[%c6] : memref<98xf32, #tpu.memory_space<smem>>
    %c55 = arith.constant 55 : index
    %486 = memref.load %arg5[%c55] : memref<98xf32, #tpu.memory_space<smem>>
    %c0_203 = arith.constant 0 : index
    %c6_204 = arith.constant 6 : index
    %487 = vector.load %arg7[%c0_203, %c6_204] : memref<4x384xf32, #tpu.memory_space<vmem>>, vector<2x256xf32>
    %488 = vector.broadcast %485 : f32 to vector<2x256xf32>
    %489 = arith.mulf %487, %488 : vector<2x256xf32>
    %490 = arith.addf %484, %489 : vector<2x256xf32>
    %c2_205 = arith.constant 2 : index
    %c6_206 = arith.constant 6 : index
    %491 = vector.load %arg7[%c2_205, %c6_206] : memref<4x384xf32, #tpu.memory_space<vmem>>, vector<2x256xf32>
    %492 = vector.broadcast %486 : f32 to vector<2x256xf32>
    %493 = arith.mulf %491, %492 : vector<2x256xf32>
    %494 = arith.addf %490, %493 : vector<2x256xf32>
    %c13 = arith.constant 13 : index
    %495 = memref.load %arg5[%c13] : memref<98xf32, #tpu.memory_space<smem>>
    %c62 = arith.constant 62 : index
    %496 = memref.load %arg5[%c62] : memref<98xf32, #tpu.memory_space<smem>>
    %c0_207 = arith.constant 0 : index
    %c22_208 = arith.constant 22 : index
    %497 = vector.load %arg7[%c0_207, %c22_208] : memref<4x384xf32, #tpu.memory_space<vmem>>, vector<2x256xf32>
    %498 = vector.broadcast %495 : f32 to vector<2x256xf32>
    %499 = arith.mulf %497, %498 : vector<2x256xf32>
    %500 = arith.addf %494, %499 : vector<2x256xf32>
    %c2_209 = arith.constant 2 : index
    %c22_210 = arith.constant 22 : index
    %501 = vector.load %arg7[%c2_209, %c22_210] : memref<4x384xf32, #tpu.memory_space<vmem>>, vector<2x256xf32>
    %502 = vector.broadcast %496 : f32 to vector<2x256xf32>
    %503 = arith.mulf %501, %502 : vector<2x256xf32>
    %504 = arith.addf %500, %503 : vector<2x256xf32>
    %c20_211 = arith.constant 20 : index
    %505 = memref.load %arg5[%c20_211] : memref<98xf32, #tpu.memory_space<smem>>
    %c69_212 = arith.constant 69 : index
    %506 = memref.load %arg5[%c69_212] : memref<98xf32, #tpu.memory_space<smem>>
    %c0_213 = arith.constant 0 : index
    %c38_214 = arith.constant 38 : index
    %507 = vector.load %arg7[%c0_213, %c38_214] : memref<4x384xf32, #tpu.memory_space<vmem>>, vector<2x256xf32>
    %508 = vector.broadcast %505 : f32 to vector<2x256xf32>
    %509 = arith.mulf %507, %508 : vector<2x256xf32>
    %510 = arith.addf %504, %509 : vector<2x256xf32>
    %c2_215 = arith.constant 2 : index
    %c38_216 = arith.constant 38 : index
    %511 = vector.load %arg7[%c2_215, %c38_216] : memref<4x384xf32, #tpu.memory_space<vmem>>, vector<2x256xf32>
    %512 = vector.broadcast %506 : f32 to vector<2x256xf32>
    %513 = arith.mulf %511, %512 : vector<2x256xf32>
    %514 = arith.addf %510, %513 : vector<2x256xf32>
    %c27 = arith.constant 27 : index
    %515 = memref.load %arg5[%c27] : memref<98xf32, #tpu.memory_space<smem>>
    %c76 = arith.constant 76 : index
    %516 = memref.load %arg5[%c76] : memref<98xf32, #tpu.memory_space<smem>>
    %c0_217 = arith.constant 0 : index
    %c54_218 = arith.constant 54 : index
    %517 = vector.load %arg7[%c0_217, %c54_218] : memref<4x384xf32, #tpu.memory_space<vmem>>, vector<2x256xf32>
    %518 = vector.broadcast %515 : f32 to vector<2x256xf32>
    %519 = arith.mulf %517, %518 : vector<2x256xf32>
    %520 = arith.addf %514, %519 : vector<2x256xf32>
    %c2_219 = arith.constant 2 : index
    %c54_220 = arith.constant 54 : index
    %521 = vector.load %arg7[%c2_219, %c54_220] : memref<4x384xf32, #tpu.memory_space<vmem>>, vector<2x256xf32>
    %522 = vector.broadcast %516 : f32 to vector<2x256xf32>
    %523 = arith.mulf %521, %522 : vector<2x256xf32>
    %524 = arith.addf %520, %523 : vector<2x256xf32>
    %c34_221 = arith.constant 34 : index
    %525 = memref.load %arg5[%c34_221] : memref<98xf32, #tpu.memory_space<smem>>
    %c83_222 = arith.constant 83 : index
    %526 = memref.load %arg5[%c83_222] : memref<98xf32, #tpu.memory_space<smem>>
    %c0_223 = arith.constant 0 : index
    %c70_224 = arith.constant 70 : index
    %527 = vector.load %arg7[%c0_223, %c70_224] : memref<4x384xf32, #tpu.memory_space<vmem>>, vector<2x256xf32>
    %528 = vector.broadcast %525 : f32 to vector<2x256xf32>
    %529 = arith.mulf %527, %528 : vector<2x256xf32>
    %530 = arith.addf %524, %529 : vector<2x256xf32>
    %c2_225 = arith.constant 2 : index
    %c70_226 = arith.constant 70 : index
    %531 = vector.load %arg7[%c2_225, %c70_226] : memref<4x384xf32, #tpu.memory_space<vmem>>, vector<2x256xf32>
    %532 = vector.broadcast %526 : f32 to vector<2x256xf32>
    %533 = arith.mulf %531, %532 : vector<2x256xf32>
    %534 = arith.addf %530, %533 : vector<2x256xf32>
    %c41 = arith.constant 41 : index
    %535 = memref.load %arg5[%c41] : memref<98xf32, #tpu.memory_space<smem>>
    %c90 = arith.constant 90 : index
    %536 = memref.load %arg5[%c90] : memref<98xf32, #tpu.memory_space<smem>>
    %c0_227 = arith.constant 0 : index
    %c86_228 = arith.constant 86 : index
    %537 = vector.load %arg7[%c0_227, %c86_228] : memref<4x384xf32, #tpu.memory_space<vmem>>, vector<2x256xf32>
    %538 = vector.broadcast %535 : f32 to vector<2x256xf32>
    %539 = arith.mulf %537, %538 : vector<2x256xf32>
    %540 = arith.addf %534, %539 : vector<2x256xf32>
    %c2_229 = arith.constant 2 : index
    %c86_230 = arith.constant 86 : index
    %541 = vector.load %arg7[%c2_229, %c86_230] : memref<4x384xf32, #tpu.memory_space<vmem>>, vector<2x256xf32>
    %542 = vector.broadcast %536 : f32 to vector<2x256xf32>
    %543 = arith.mulf %541, %542 : vector<2x256xf32>
    %544 = arith.addf %540, %543 : vector<2x256xf32>
    %c48_231 = arith.constant 48 : index
    %545 = memref.load %arg5[%c48_231] : memref<98xf32, #tpu.memory_space<smem>>
    %c97_232 = arith.constant 97 : index
    %546 = memref.load %arg5[%c97_232] : memref<98xf32, #tpu.memory_space<smem>>
    %c0_233 = arith.constant 0 : index
    %c102 = arith.constant 102 : index
    %547 = vector.load %arg7[%c0_233, %c102] : memref<4x384xf32, #tpu.memory_space<vmem>>, vector<2x256xf32>
    %548 = vector.broadcast %545 : f32 to vector<2x256xf32>
    %549 = arith.mulf %547, %548 : vector<2x256xf32>
    %550 = arith.addf %544, %549 : vector<2x256xf32>
    %c2_234 = arith.constant 2 : index
    %c102_235 = arith.constant 102 : index
    %551 = vector.load %arg7[%c2_234, %c102_235] : memref<4x384xf32, #tpu.memory_space<vmem>>, vector<2x256xf32>
    %552 = vector.broadcast %546 : f32 to vector<2x256xf32>
    %553 = arith.mulf %551, %552 : vector<2x256xf32>
    %554 = arith.addf %550, %553 : vector<2x256xf32>
    %c6_236 = arith.constant 6 : index
    %c0_237 = arith.constant 0 : index
    %555 = vector.load %arg4[%c6_236, %c0_237] : memref<7x256xf32, #tpu.memory_space<vmem>>, vector<1x256xf32>
    %556 = vector.broadcast %555 : vector<1x256xf32> to vector<2x256xf32>
    %557 = arith.mulf %554, %556 : vector<2x256xf32>
    %558 = arith.addf %483, %557 : vector<2x256xf32>
    %559 = arith.negf %558 : vector<2x256xf32>
    %560 = math.exp %559 : vector<2x256xf32>
    %cst_238 = arith.constant 1.000000e+00 : f32
    %561 = vector.broadcast %cst_238 : f32 to vector<2x256xf32>
    %562 = arith.addf %561, %560 : vector<2x256xf32>
    %563 = arith.divf %561, %562 : vector<2x256xf32>
    %564 = vector.shape_cast %563 : vector<2x256xf32> to vector<2x1x256xf32>
    %565 = vector.broadcast %564 : vector<2x1x256xf32> to vector<2x32x256xf32>
    %566 = arith.mulf %22, %565 : vector<2x32x256xf32>
    %c0_239 = arith.constant 0 : index
    %c0_240 = arith.constant 0 : index
    %c0_241 = arith.constant 0 : index
    %567 = vector.load %arg6[%c0_239, %c0_240, %c0_241] : memref<2x32x256xf32, #tpu.memory_space<vmem>>, vector<2x32x256xf32>
    tpu.vector_store %arg6[%c0_239, %c0_240, %c0_241], %566 {strides = array<i32>} : memref<2x32x256xf32, #tpu.memory_space<vmem>>, vector<2x32x256xf32>,
    return
  }
  func.func @transform_0(%arg0: i32) -> (i32, i32, i32) {
    %c0_i32 = arith.constant 0 : i32
    %c0_i32_0 = arith.constant 0 : i32
    %c0_i32_1 = arith.constant 0 : i32
    return %arg0, %c0_i32, %c0_i32_0 : i32, i32, i32
  }
  func.func @transform_1(%arg0: i32) -> (i32, i32) {
    %c0_i32 = arith.constant 0 : i32
    %c0_i32_0 = arith.constant 0 : i32
    %c0_i32_1 = arith.constant 0 : i32
    return %c0_i32, %c0_i32_0 : i32, i32
  }
  func.func @transform_2(%arg0: i32) -> (i32, i32) {
    %c0_i32 = arith.constant 0 : i32
    %c0_i32_0 = arith.constant 0 : i32
    %c0_i32_1 = arith.constant 0 : i32
    return %c0_i32, %c0_i32_0 : i32, i32
  }
  func.func @transform_3(%arg0: i32) -> (i32, i32) {
    %c0_i32 = arith.constant 0 : i32
    %c0_i32_0 = arith.constant 0 : i32
    %c0_i32_1 = arith.constant 0 : i32
    return %c0_i32, %c0_i32_0 : i32, i32
  }
  func.func @transform_4(%arg0: i32) -> i32 {
    %c0_i32 = arith.constant 0 : i32
    %c0_i32_0 = arith.constant 0 : i32
    return %c0_i32 : i32
  }
  func.func @transform_5(%arg0: i32) -> (i32, i32, i32) {
    %c0_i32 = arith.constant 0 : i32
    %c0_i32_0 = arith.constant 0 : i32
    %c0_i32_1 = arith.constant 0 : i32
    return %arg0, %c0_i32, %c0_i32_0 : i32, i32, i32
  }
}

</mosaic_0001>

<bundles_post_ra>
// kernel: cbam_pallas.1
= control target key start
LH: loop header
LB: loop body
LE: loop exit
PB: predicated region body
PF: predicated region fallthrough
CT: control target
= control target key end

     0   :  { %s4803_s0 = inlined_call_operand.vmem [shape: f32[2,32,256], index: 0, kind: input, shape index: {}]   ;;  %s4804_s1 = inlined_call_operand.vmem [shape: f32[32,2], index: 1, kind: input, shape index: {}]   ;;  %s4805_s2 = inlined_call_operand.vmem [shape: f32[2,32], index: 2, kind: input, shape index: {}]   ;;  %s4806_s3 = inlined_call_operand.vmem [shape: f32[7,256], index: 3, kind: input, shape index: {}]   ;;  %s4807_s4 = inlined_call_operand.vmem [shape: f32[98], index: 4, kind: input, shape index: {}]   ;;  %s4808_s5 = inlined_call_operand.vmem [shape: f32[2,32,256], index: 5, kind: output, shape index: {}]  }
   0x1   :  { %5043 = sst [smem:[#allocation136_spill]] %s4806_s3 }
   0x2   :  { %5044 = sst [smem:[#allocation137_spill]] %s4808_s5 }
   0x3   :  { %10 = vsyncpa [#allocation4], 0  ;;  %s24_s20 = sshll.u32 %s4807_s4, 4  ;;  %s2753_s21 = smov [#allocation3]   ;;  %s25_s20 = int_to_ptr.vmem [resolvable:$true] %s24_s20 }
   0x4   :  { %27 = dma.vmem_to_smem %s25_s20, 16, %s2753_s21, [#allocation4]  }
   0x5   :  { %2751 = dma.done.wait [#allocation4], 16  }
   0x6   :  { %2752 = vsyncadd [#allocation4], 4294967280 }
   0x7   :  { %32 = sfence }
   0x8   :  { %v2810_v0 = vld [vmem:[%s4803_s0 + $0x40] sm:$0xff]  ;;  %v2815_v1 = vld [vmem:[%s4803_s0 + $0x48] sm:$0xff]  ;;  %v2846_v9 = vld [vmem:[%s4803_s0 + $0x50] sm:$0xff]  ;;  %v113_v45 = vlaneseq  ;;  %vm118_vm0 = vcmask 130112   ;;  %vm122_vm1 = vcmask 195712   ;;  %vm126_vm2 = vcmask 261312  }
   0x9   :  { %v2820_v2 = vld [vmem:[%s4803_s0 + $0x20] sm:$0xff]  ;;  %v61_v3 = vadd.f32 %v2815_v1, %v2810_v0  ;;  %v2827_v4 = vld [vmem:[%s4803_s0 + $0x28] sm:$0xff]  ;;  %v2851_v10 = vld [vmem:[%s4803_s0 + $0x58] sm:$0xff]  ;;  %v93_v30 = vmax.f32 %v2810_v0, %v2815_v1  ;;  %vm135_vm3 = vcmask 1041409   ;;  %vm160_vm4 = vcmask 1043459   ;;  %s2754_s12 = smov 1  }
   0xa   :  { %v2832_v5 = vld [vmem:[%s4803_s0] sm:$0xff]  ;;  %v2837_v6 = vld [vmem:[%s4803_s0 + $0x8] sm:$0xff]  ;;  %v55_v7 = vadd.f32 %v2827_v4, %v2820_v2  ;;  %v2856_v11 = vld [vmem:[%s4803_s0 + $0x30] sm:$0xff]  ;;  %v64_v15 = vadd.f32 %v2851_v10, %v2846_v9  ;;  %v87_v26 = vmax.f32 %v2820_v2, %v2827_v4  ;;  %v96_v29 = vmax.f32 %v2846_v9, %v2851_v10  ;;  %s2755_s14 = smov 2   ;;  %s2756_s17 = smov 3  }
   0xb   :  { %v49_v8 = vadd.f32 %v2837_v6, %v2832_v5  ;;  %62 = vadd.xlane.f32.xlu2 %v61_v3  ;;  %v2861_v12 = vld [vmem:[%s4803_s0 + $0x38] sm:$0xff]  ;;  %v2866_v13 = vld [vmem:[%s4803_s0 + $0x10] sm:$0xff]  ;;  %v2892_v20 = vld [vmem:[%s4803_s0 + $0x60] sm:$0xff]  ;;  %v81_v22 = vmax.f32 %v2832_v5, %v2837_v6  ;;  %v114_v49 = vand.u32 127, %v113_v45  ;;  %vm163_vm5 = vcmask 1041408   ;;  %s2757_s20 = smov 4  }
   0xc   :  { %56 = vadd.xlane.f32.xlu1 %v55_v7  ;;  %v2871_v14 = vld [vmem:[%s4803_s0 + $0x18] sm:$0xff]  ;;  %v58_v16 = vadd.f32 %v2861_v12, %v2856_v11  ;;  %v2882_v18 = vld [vmem:[%s4803_s0 + $0x70] sm:$0xff]  ;;  %v2897_v21 = vld [vmem:[%s4803_s0 + $0x68] sm:$0xff]  ;;  %v90_v25 = vmax.f32 %v2856_v11, %v2861_v12  ;;  %vm169_vm6 = vcmask 261120   ;;  %vm195_vm7 = vcmask 15360   ;;  %s2759_s21 = smov 51  }
   0xd   :  { %50 = vadd.xlane.f32.xlu0 %v49_v8  ;;  %v52_v17 = vadd.f32 %v2871_v14, %v2866_v13  ;;  %v2887_v19 = vld [vmem:[%s4803_s0 + $0x78] sm:$0xff]  ;;  %v67_v24 = vadd.f32 %v2897_v21, %v2892_v20  ;;  %v84_v27 = vmax.f32 %v2866_v13, %v2871_v14  ;;  %v99_v28 = vmax.f32 %v2892_v20, %v2897_v21  ;;  %v167_v39 = vld [vmem:[%s4804_s1 + $0x10] sm:$0xff]  ;;  %v166_v40 = vld [vmem:[%s4804_s1 + $0x8] sm:$0xff]  ;;  %s3058_s22 = sld [smem:[#allocation3 + $0x38]]  ;;  %s4809_s4 = smov 112  }
   0xe   :  { %v70_v23 = vadd.f32 %v2887_v19, %v2882_v18  ;;  %v102_v31 = vmax.f32 %v2882_v18, %v2887_v19  ;;  %v168_v35 = vld [vmem:[%s4804_s1 + $0x18] sm:$0xff]  ;;  %v165_v41 = vld [vmem:[%s4804_s1] sm:$0xff]  ;;  %v116_v51 = vadd.s32 4294967288, %v114_v49  ;;  %v120_v57 = vadd.s32 4294967280, %v114_v49  ;;  %s3060_s23 = sld [smem:[#allocation3 + $0xe]]  ;;  %s4813_s28 = smov 96  }
   0xf   :  { %185 = vmatpush.msra.mxu0 %v168_v35  ;;  %v124_v8 = vadd.s32 4294967272, %v114_v49  ;;  %vm397_vm8 = vcmask 1043456   ;;  %vm387_vm13 = vcmask 412672   ;;  %vm389_vm14 = vcmask 1043864   ;;  %s3062_s24 = sld [smem:[#allocation3 + $0x7]]  ;;  %s4811_s7 = smov 80  }
  0x10   :  { %vm428_vm15 = vcmask 1047559   ;;  %s3066_s25 = sld [smem:[#allocation3 + $0x46]]  ;;  %s4817_s10 = smov 64  }
  0x11   :  { %186 = vmatpush.msra.mxu0 %v167_v39  ;;  %s3068_s26 = sld [smem:[#allocation3 + $0x3f]]  ;;  %s4819_s11 = smov 48  }
  0x12   :  { %s3075_s27 = sld [smem:[#allocation3 + $0x15]] }
  0x13   :  { %65 = vadd.xlane.f32.xlu2 %v64_v15  ;;  %187 = vmatpush.msra.mxu0 %v166_v40  ;;  %s3089_s0 = sld [smem:[#allocation3 + $0x4d]] }
  0x14   :  { %59 = vadd.xlane.f32.xlu1 %v58_v16  ;;  %s3102_s29 = sld [smem:[#allocation3 + $0x23]] }
  0x15   :  { %53 = vadd.xlane.f32.xlu0 %v52_v17  ;;  %188 = vmatpush.msra.mxu0 %v165_v41  ;;  %s3104_s30 = sld [smem:[#allocation3 + $0x1c]] }
  0x16   :  { %s3110_s6 = sld [smem:[#allocation3 + $0x5b]] }
  0x17   :  { %s3114_s8 = sld [smem:[#allocation3 + $0x54]] }
  0x18   :  { %s3121_s1 = sld [smem:[#allocation3 + $0x2a]] }
  0x19   :  { %s3131_s9 = sld [smem:[#allocation3 + $0x39]] }
  0x1a   :  { %s3146_s13 = sld [smem:[#allocation3 + $0x8]] }
  0x1b   :  { %82 = vmax.xlane.f32.xlu2 %v81_v22  ;;  %s3156_s15 = sld [smem:[#allocation3 + $0x40]] }
  0x1c   :  { %71 = vadd.xlane.f32.xlu1 %v70_v23  ;;  %s3163_s16 = sld [smem:[#allocation3 + $0x16]] }
  0x1d   :  { %68 = vadd.xlane.f32.xlu0 %v67_v24  ;;  %s3186_s18 = sld [smem:[#allocation3 + $0x24]] }
  0x1e   :  { %s3188_s19 = sld [smem:[#allocation3 + $0x1d]] }
  0x1f   :  { %s3240_s5 = sld [smem:[#allocation3 + $0x41]] }
  0x21   :  { %5066 = sst [smem:[#allocation27_spill]] %s3156_s15 }
  0x23   :  { %91 = vmax.xlane.f32.xlu2 %v90_v25  ;;  %5067 = sst [smem:[#allocation28_spill]] %s3186_s18 }
  0x24   :  { %88 = vmax.xlane.f32.xlu1 %v87_v26  ;;  %5068 = sst [smem:[#allocation29_spill]] %s3188_s19 }
  0x25   :  { %85 = vmax.xlane.f32.xlu0 %v84_v27  ;;  %5077 = sst [smem:[#allocation37_spill]] %s3240_s5 }
  0x2b   :  { %100 = vmax.xlane.f32.xlu2 %v99_v28 }
  0x2c   :  { %97 = vmax.xlane.f32.xlu1 %v96_v29 }
  0x2d   :  { %94 = vmax.xlane.f32.xlu0 %v93_v30 }
  0x35   :  { %103 = vmax.xlane.f32.xlu0 %v102_v31 }
  0x7e   :  { %v63_v32 = vpop.xlane.xlu2 %62 }
  0x7f   :  { %v57_v33 = vpop.xlane.xlu1 %56  ;;  %v77_v50 = vmul.f32 0.00390625, %v63_v32 }
  0x80   :  { %v51_v34 = vpop.xlane.xlu0 %50  ;;  %v75_v7 = vmul.f32 0.00390625, %v57_v33 }
  0x81   :  { %v73_v55 = vmul.f32 0.00390625, %v51_v34  ;;  %v128_v56 = vperm.slane %v77_v50, %v114_v49 }
  0x82   :  { %v121_v30 = vperm.slane %v75_v7, %v120_v57 }
  0x83   :  { %v115_v16 = vperm.slane %v73_v55, %v114_v49 }
  0x86   :  { %v66_v36 = vpop.xlane.xlu2 %65 }
  0x87   :  { %v60_v37 = vpop.xlane.xlu1 %59  ;;  %v78_v52 = vmul.f32 0.00390625, %v66_v36 }
  0x88   :  { %v54_v38 = vpop.xlane.xlu0 %53  ;;  %v76_v17 = vmul.f32 0.00390625, %v60_v37 }
  0x89   :  { %v74_v53 = vmul.f32 0.00390625, %v54_v38  ;;  %v129_v58 = vperm.slane %v78_v52, %v116_v51  ;;  %v2551_v52 = vld [vmem:[%s4806_s3 + $0x1] ss:$8 sm:$0x3] }
  0x8a   :  { %v125_v33 = vperm.slane %v76_v17, %v124_v8  ;;  %v247_v17 = vshrl.u32 %v113_v45, 7 }
  0x8b   :  { %v117_v61 = vperm.slane %v74_v53, %v116_v51  ;;  %v130_v26 = vsel %vm118_vm0, %v129_v58, %v128_v56  ;;  %v954_v53 = vperm.slane %v2551_v52, 1 }
  0x8c   :  { %2719 = vset.pattern.permute.xlu1 %v247_v17 }
  0x8d   :  { %v119_v27 = vsel %vm118_vm0, %v117_v61, %v115_v16  ;;  %v955_v55 = vrot.slane %v954_v53, 4 }
  0x8e   :  { %v83_v42 = vpop.xlane.xlu2 %82  ;;  %v123_v37 = vsel %vm122_vm1, %v121_v30, %v119_v27 }
  0x8f   :  { %v72_v43 = vpop.xlane.xlu1 %71  ;;  %v146_v63 = vperm.slane %v83_v42, %v114_v49  ;;  %v127_v42 = vsel %vm126_vm2, %v125_v33, %v123_v37 }
  0x90   :  { %v69_v44 = vpop.xlane.xlu0 %68  ;;  %v80_v62 = vmul.f32 0.00390625, %v72_v43 }
  0x91   :  { %v79_v54 = vmul.f32 0.00390625, %v69_v44 }
  0x92   :  { %v133_v28 = vperm.slane %v80_v62, %v124_v8  ;;  %v2609_v62 = vld [vmem:[%s4806_s3 + $0x3] ss:$8 sm:$0x3] }
  0x93   :  { %v131_v15 = vperm.slane %v79_v54, %v120_v57  ;;  %v953_v54 = vperm.slane %v2551_v52, 0 }
  0x95   :  { %v132_v31 = vsel %vm122_vm1, %v131_v15, %v130_v26  ;;  %v956_v56 = vsel %vm397_vm8, %v953_v54, %v955_v55  ;;  %v2638_v15 = vld [vmem:[%s4806_s3 + $0x4] ss:$8 sm:$0x3] }
  0x96   :  { %v92_v48 = vpop.xlane.xlu2 %91  ;;  %v134_v40 = vsel %vm126_vm2, %v133_v28, %v132_v31  ;;  %957 = vrot.lane.b32.xlu2 %v956_v56, %s2754_s12  ;;  %v1820_v16 = vperm.slane %v2638_v15, 1  ;;  %s3144_s12 = sld [smem:[#allocation3 + $0xf]] }
  0x97   :  { %v89_v46 = vpop.xlane.xlu1 %88  ;;  %v151_v34 = vperm.slane %v92_v48, %v124_v8 }
  0x98   :  { %v86_v47 = vpop.xlane.xlu0 %85  ;;  %v149_v25 = vperm.slane %v89_v46, %v120_v57  ;;  %v136_v46 = vsel %vm135_vm3, %v134_v40, %v127_v42 }
  0x99   :  { %v147_v3 = vperm.slane %v86_v47, %v116_v51 }
  0x9b   :  { %v148_v29 = vsel %vm118_vm0, %v147_v3, %v146_v63  ;;  %v1531_v63 = vperm.slane %v2609_v62, 1  ;;  %v1530_v3 = vperm.slane %v2609_v62, 0 }
  0x9c   :  { %v150_v38 = vsel %vm122_vm1, %v149_v25, %v148_v29  ;;  %v254_v25 = vadd.s32 8, %v247_v17 }
  0x9d   :  { %v152_v43 = vsel %vm126_vm2, %v151_v34, %v150_v38  ;;  %v1532_v7 = vrot.slane %v1531_v63, 4 }
  0x9e   :  { %v101_v24 = vpop.xlane.xlu2 %100  ;;  %2720 = vset.pattern.permute.xlu2 %v254_v25 }
  0x9f   :  { %v98_v59 = vpop.xlane.xlu1 %97  ;;  %v156_v32 = vperm.slane %v101_v24, %v120_v57  ;;  %v2580_v57 = vld [vmem:[%s4806_s3 + $0x2] ss:$8 sm:$0x3]  ;;  %v260_v24 = vadd.s32 16, %v247_v17  ;;  %s5078_s3 = smov 48  }
  0xa0   :  { %v95_v60 = vpop.xlane.xlu0 %94  ;;  %v154_v22 = vperm.slane %v98_v59, %v116_v51  ;;  %v1243_v58 = vperm.slane %v2580_v57, 1  ;;  %v1242_v59 = vperm.slane %v2580_v57, 0 }
  0xa1   :  { %v153_v23 = vperm.slane %v95_v60, %v114_v49  ;;  %v194_v49 = vld [vmem:[%s4805_s2] sm:$0x3]  ;;  %2721 = vset.pattern.permute.xlu0 %v260_v24  ;;  %s3152_s2 = sld [smem:[#allocation3 + $0x47]] }
  0xa2   :  { %2494 = vmatpush.msk.msra.mxu1 %vm163_vm5, %v194_v49  ;;  %v1244_v60 = vrot.slane %v1243_v58, 4 }
  0xa3   :  { %v155_v35 = vsel %vm118_vm0, %v154_v22, %v153_v23  ;;  %v1819_v22 = vperm.slane %v2638_v15, 0  ;;  %v1821_v23 = vrot.slane %v1820_v16, 4  ;;  %vm402_vm0 = vcmask 1045509  }
  0xa4   :  { %v157_v41 = vsel %vm122_vm1, %v156_v32, %v155_v35  ;;  %v1245_v61 = vsel %vm397_vm8, %v1242_v59, %v1244_v60  ;;  %vm436_vm1 = vcmask 1043866  }
  0xa5   :  { %1246 = vrot.lane.b32.xlu2 %v1245_v61, %s2755_s14  ;;  %v1822_v26 = vsel %vm397_vm8, %v1819_v22, %v1821_v23  ;;  %s4815_s14 = smov 32  }
  0xa7   :  { %5065 = sst [smem:[#allocation26_spill]] %s3152_s2 }
  0xa8   :  { %v104_v36 = vpop.xlane.xlu0 %103 }
  0xa9   :  { %v158_v39 = vperm.slane %v104_v36, %v124_v8  ;;  %v1533_v8 = vsel %vm397_vm8, %v1530_v3, %v1532_v7 }
  0xab   :  { %v159_v44 = vsel %vm126_vm2, %v158_v39, %v157_v41  ;;  %vm437_vm2 = vcmask 1047558  }
  0xac   :  { %v161_v47 = vsel %vm160_vm4, %v159_v44, %v152_v43  ;;  %v266_v43 = vadd.s32 24, %v247_v17 }
  0xad   :  { %v164_v48 = vsel %vm163_vm5, %v136_v46, %v161_v47  ;;  %1534 = vrot.lane.b32.xlu2 %v1533_v8, %s2756_s17  ;;  %vm407_vm5 = vcmask 416768   ;;  %s3173_s17 = sld [smem:[#allocation3 + $0x4e]] }
  0xae   :  { %2493 = vmatmul.msk.f32.vlgmr.msra.gmra.mxu0 %vm169_vm6, %v164_v48 }
  0xb5   :  { %1823 = vrot.lane.b32.xlu2 %v1822_v26, %s2757_s20  ;;  %s3194_s20 = sld [smem:[#allocation3 + $0x5c]] }
  0xbb   :  { %5069 = sst [smem:[#allocation30_spill]] %s3194_s20 }
  0xf0   :  { %v2964_v46 = vpop.permute.xlu2 %957 }
  0xf1   :  { %5045 = vst [vmem:[#allocation6_spill] sm:$0xff] %v2964_v46 }
  0xff   :  { %v2966_v47 = vpop.permute.xlu2 %1246 }
 0x100   :  { %5046 = vst [vmem:[#allocation7_spill] sm:$0xff] %v2966_v47 }
 0x107   :  { %v2968_v48 = vpop.permute.xlu2 %1534 }
 0x108   :  { %5047 = vst [vmem:[#allocation8_spill] sm:$0xff] %v2968_v48 }
 0x10f   :  { %v2970_v49 = vpop.permute.xlu2 %1823 }
 0x110   :  { %5048 = vst [vmem:[#allocation9_spill] sm:$0xff] %v2970_v49 }
 0x12b   :  { %v190_v50 = vpop.f32.mrf.mxu0 }
 0x12c   :  { %v193_v51 = vmax.f32 %v190_v50, 0.0 }
 0x12e   :  { %2495 = vmatmul.msk.f32.vlgmr.msra.gmra.mxu1 %vm195_vm7, %v193_v51 }
 0x1ab   :  { %v219_v27 = vpop.f32.mrf.mxu1 }
 0x1ac   :  { %v223_v28 = vrot.slane %v219_v27, 2 }
 0x1ae   :  { %v225_v29 = vadd.f32 %v223_v28, %v219_v27 }
 0x1b0   :  { %v2496_v30 = vmul.f32 -1.442695, %v225_v29  ;;  %v2758_v29 = vmov 0.0  }
 0x1b1   :  { %388 = vst.msk [vmem:[#allocation2] sm:$0xf] %vm387_vm13, %v2758_v29 }
 0x1b2   :  { %2727 = vpow2.f32 %v2496_v30  ;;  %390 = vst.msk [vmem:[#allocation2 + $0x8] sm:$0xf] %vm389_vm14, %v2758_v29  ;;  %vm472_vm14 = vcmask 916480  }
 0x1b8   :  { %v2728_v31 = vpop.eup %2727 }
 0x1b9   :  { %v229_v32 = vadd.f32 1.0, %v2728_v31 }
 0x1bb   :  { %2729 = vrcp.f32 %v229_v32  ;;  %v241_v35 = vand.u32 2147483648, %v229_v32  ;;  %v239_v37 = vand.u32 2147483647, %v229_v32  ;;  %vm235_vm10 = vweird.f32 %v229_v32 }
 0x1bd   :  { %v242_v39 = vor.u32 1.1754944e-38, %v241_v35  ;;  %vm240_vm12 = vcmp.eq.f32.partialorder %v239_v37, 8.507059e+37 }
 0x1c1   :  { %v2730_v45 = vpop.eup %2729 }
 0x1c2   :  { %v231_v33 = vmul.f32 %v2730_v45, %v229_v32  ;;  %vm236_vm9 = vweird.f32 %v2730_v45 }
 0x1c3   :  { %vm237_vm11 = vmor %vm235_vm10, %vm236_vm9  ;;  %vm440_vm9 = vcmask 412674   ;;  %vm411_vm10 = vcmask 1041816  }
 0x1c4   :  { %v232_v34 = vsub.f32 1.0, %v231_v33 }
 0x1c6   :  { %v233_v36 = vmul.f32 %v2730_v45, %v232_v34 }
 0x1c8   :  { %v234_v38 = vadd.f32 %v2730_v45, %v233_v36 }
 0x1ca   :  { %v238_v40 = vsel %vm237_vm11, %v2730_v45, %v234_v38  ;;  %vm412_vm11 = vcmask 1045508  }
 0x1cb   :  { %v243_v41 = vsel %vm240_vm12, %v242_v39, %v238_v40  ;;  %vm415_vm12 = vcmask 410624   ;;  %vm413_vm13 = vmor %vm412_vm11, %vm411_vm10  ;;  %vm2115_vm10 = vcmask 39936   ;;  %vm2404_vm11 = vcmask 48128  }
 0x1cc   :  { %v245_v42 = vperm.slane %v243_v41, 0  ;;  %v270_v44 = vperm.slane %v243_v41, 1 }
 0x1ce   :  { %262 = vperm.xlu0 %2721, %v245_v42   ;;  %256 = vperm.xlu2 %2720, %v245_v42  }
 0x1cf   :  { %250 = vperm.xlu1 %2719, %v245_v42  }
 0x1d6   :  { %2722 = vset.pattern.permute.xlu2 %v266_v43  ;;  %2726 = vset.pattern.permute.xlu0 %v266_v43 }
 0x1d7   :  { %275 = vperm.xlu1 %2719, %v270_v44  }
 0x1de   :  { %268 = vperm.xlu2 %2722, %v245_v42  }
 0x1df   :  { %2724 = vset.pattern.permute.xlu1 %v260_v24 }
 0x1e6   :  { %2723 = vset.pattern.permute.xlu2 %v254_v25 }
 0x1e7   :  { %287 = vperm.xlu1 %2724, %v270_v44  }
 0x1ee   :  { %281 = vperm.xlu2 %2723, %v270_v44  }
 0x1f6   :  { %2725 = vset.pattern.permute.xlu2 %v266_v43 }
 0x1fe   :  { %293 = vperm.xlu2 %2725, %v270_v44  }
 0x228   :  { %v257_v50 = vpop.permute.xlu2 %256 }
 0x229   :  { %v2973_v52 = vmul.f32 %v257_v50, %v2871_v14  ;;  %v2989_v59 = vmul.f32 %v257_v50, %v2866_v13 }
 0x22b   :  { %5049 = vst [vmem:[#allocation10_spill] sm:$0xff] %v2973_v52 }
 0x22c   :  { %5053 = vst [vmem:[#allocation14_spill] sm:$0xff] %v2989_v59 }
 0x238   :  { %v269_v14 = vpop.permute.xlu2 %268 }
 0x239   :  { %v3007_v7 = vmul.f32 %v269_v14, %v2856_v11 }
 0x23b   :  { %5056 = vst [vmem:[#allocation17_spill] sm:$0xff] %v3007_v7 }
 0x240   :  { %v263_v53 = vpop.permute.xlu0 %262 }
 0x241   :  { %v251_v51 = vpop.permute.xlu1 %250  ;;  %v2984_v57 = vmul.f32 %v263_v53, %v2827_v4  ;;  %v2999_v4 = vmul.f32 %v263_v53, %v2820_v2 }
 0x242   :  { %v2976_v54 = vmul.f32 %v251_v51, %v2837_v6  ;;  %v2979_v55 = vmul.f32 %v251_v51, %v2832_v5  ;;  %v2995_v5 = vmul.f32 %v269_v14, %v2861_v12 }
 0x243   :  { %5052 = vst [vmem:[#allocation13_spill] sm:$0xff] %v2984_v57 }
 0x244   :  { %5050 = vst [vmem:[#allocation11_spill] sm:$0xff] %v2976_v54  ;;  %v360_v56 = vmax.f32 %v2976_v54, %v2973_v52  ;;  %v320_v58 = vadd.f32 %v2973_v52, %v2976_v54  ;;  %v351_v6 = vmax.f32 %v2979_v55, %v2989_v59  ;;  %v311_v62 = vadd.f32 %v2989_v59, %v2979_v55 }
 0x245   :  { %5051 = vst [vmem:[#allocation12_spill] sm:$0xff] %v2979_v55  ;;  %v5145_v54 = vstv %s3060_s23 }
 0x246   :  { %v361_v60 = vmax.f32 %v360_v56, %v2984_v57  ;;  %5054 = vst [vmem:[#allocation15_spill] sm:$0xff] %v2995_v5  ;;  %v321_v61 = vadd.f32 %v320_v58, %v2984_v57  ;;  %v352_v63 = vmax.f32 %v351_v6, %v2999_v4  ;;  %v312_v12 = vadd.f32 %v311_v62, %v2999_v4 }
 0x247   :  { %5055 = vst [vmem:[#allocation16_spill] sm:$0xff] %v2999_v4 }
 0x248   :  { %v362_v13 = vmax.f32 %v361_v60, %v2995_v5  ;;  %v322_v3 = vadd.f32 %v321_v61, %v2995_v5  ;;  %v353_v15 = vmax.f32 %v352_v63, %v3007_v7  ;;  %v282_v16 = vpop.permute.xlu2 %281  ;;  %v313_v22 = vadd.f32 %v312_v12, %v3007_v7 }
 0x249   :  { %v276_v17 = vpop.permute.xlu1 %275  ;;  %v3013_v24 = vmul.f32 %v282_v16, %v2846_v9  ;;  %v3016_v26 = vmul.f32 %v282_v16, %v2851_v10 }
 0x24a   :  { %v363_v8 = vrot.slane %v362_v13, 4  ;;  %v323_v2 = vrot.slane %v322_v3, 4  ;;  %v354_v25 = vrot.slane %v353_v15, 4  ;;  %v3019_v11 = vmul.f32 %v276_v17, %v2810_v0 }
 0x24b   :  { %5057 = vst [vmem:[#allocation18_spill] sm:$0xff] %v3013_v24  ;;  %v3022_v27 = vmul.f32 %v276_v17, %v2815_v1  ;;  %v314_v30 = vrot.slane %v313_v22, 4 }
 0x24c   :  { %v364_v23 = vmax.f32 %v362_v13, %v363_v8  ;;  %5058 = vst [vmem:[#allocation19_spill] sm:$0xff] %v3016_v26  ;;  %v324_v28 = vadd.f32 %v323_v2, %v322_v3  ;;  %v355_v32 = vmax.f32 %v353_v15, %v354_v25  ;;  %v329_v10 = vadd.f32 %v3013_v24, %v3019_v11 }
 0x24d   :  { %5059 = vst [vmem:[#allocation20_spill] sm:$0xff] %v3019_v11  ;;  %v338_v0 = vadd.f32 %v3016_v26, %v3022_v27  ;;  %v369_v1 = vmax.f32 %v3019_v11, %v3013_v24  ;;  %v378_v34 = vmax.f32 %v3022_v27, %v3016_v26  ;;  %v315_v37 = vadd.f32 %v314_v30, %v313_v22 }
 0x24e   :  { %5060 = vst [vmem:[#allocation21_spill] sm:$0xff] %v3022_v27  ;;  %v365_v31 = vrot.slane %v364_v23, 2  ;;  %v325_v33 = vrot.slane %v324_v28, 2  ;;  %v356_v44 = vrot.slane %v355_v32, 2 }
 0x24f   :  { %v316_v56 = vrot.slane %v315_v37, 2 }
 0x250   :  { %v366_v40 = vmax.f32 %v364_v23, %v365_v31  ;;  %v326_v50 = vadd.f32 %v325_v33, %v324_v28  ;;  %v357_v61 = vmax.f32 %v355_v32, %v356_v44 }
 0x251   :  { %v317_v15 = vadd.f32 %v316_v56, %v315_v37 }
 0x252   :  { %v367_v53 = vrot.slane %v366_v40, 1  ;;  %v327_v62 = vrot.slane %v326_v50, 1  ;;  %v358_v23 = vrot.slane %v357_v61, 1 }
 0x254   :  { %v368_v8 = vmax.f32 %v366_v40, %v367_v53  ;;  %v328_v25 = vadd.f32 %v327_v62, %v326_v50 }
 0x258   :  { %v294_v9 = vpop.permute.xlu2 %293 }
 0x259   :  { %v288_v45 = vpop.permute.xlu1 %287  ;;  %v3039_v38 = vmul.f32 %v294_v9, %v2882_v18  ;;  %v3042_v39 = vmul.f32 %v294_v9, %v2887_v19  ;;  %v421_v9 = vrot.slane %v368_v8, 4 }
 0x25a   :  { %v3033_v35 = vmul.f32 %v288_v45, %v2892_v20  ;;  %v3036_v36 = vmul.f32 %v288_v45, %v2897_v21 }
 0x25b   :  { %5063 = vst [vmem:[#allocation24_spill] sm:$0xff] %v3039_v38 }
 0x25c   :  { %5061 = vst [vmem:[#allocation22_spill] sm:$0xff] %v3033_v35  ;;  %v330_v41 = vadd.f32 %v329_v10, %v3033_v35  ;;  %v339_v42 = vadd.f32 %v338_v0, %v3036_v36  ;;  %v370_v43 = vmax.f32 %v369_v1, %v3033_v35  ;;  %v379_v20 = vmax.f32 %v378_v34, %v3036_v36 }
 0x25d   :  { %5062 = vst [vmem:[#allocation23_spill] sm:$0xff] %v3036_v36  ;;  %v318_v10 = vrot.slane %v317_v15, 1  ;;  %v359_v1 = vmax.f32 %v357_v61, %v358_v23  ;;  %v4942_v23 = vstv %s3060_s23  ;;  %s3815_s23 = sld [smem:[#allocation3 + $0x4]] }
 0x25e   :  { %5064 = vst [vmem:[#allocation25_spill] sm:$0xff] %v3042_v39  ;;  %v331_v21 = vadd.f32 %v330_v41, %v3039_v38  ;;  %v340_v51 = vadd.f32 %v339_v42, %v3042_v39  ;;  %v371_v18 = vmax.f32 %v370_v43, %v3039_v38  ;;  %v380_v19 = vmax.f32 %v379_v20, %v3042_v39 }
 0x25f   :  { %v348_v41 = vmul.f32 0.03125, %v328_v25  ;;  %v319_v42 = vadd.f32 %v318_v10, %v317_v15  ;;  %v423_v44 = vsel %vm397_vm8, %v359_v1, %v421_v9  ;;  %v4944_v25 = vstv %s3062_s24 }
 0x260   :  { %v332_v58 = vrot.slane %v331_v21, 4  ;;  %v341_v14 = vrot.slane %v340_v51, 4  ;;  %v372_v60 = vrot.slane %v371_v18, 4  ;;  %v381_v6 = vrot.slane %v380_v19, 4 }
 0x261   :  { %v425_v53 = vrot.slane %v423_v44, 6  ;;  %v4932_v10 = vstv %s3066_s25 }
 0x262   :  { %v333_v13 = vadd.f32 %v332_v58, %v331_v21  ;;  %v342_v63 = vadd.f32 %v341_v14, %v340_v51  ;;  %v373_v3 = vmax.f32 %v371_v18, %v372_v60  ;;  %v382_v12 = vmax.f32 %v380_v19, %v381_v6 }
 0x263   :  { %v395_v18 = vrot.slane %v348_v41, 4  ;;  %v347_v58 = vmul.f32 0.03125, %v319_v42  ;;  %v4927_v42 = vstv %s3102_s29 }
 0x264   :  { %v334_v16 = vrot.slane %v333_v13, 2  ;;  %v343_v2 = vrot.slane %v342_v63, 2  ;;  %v374_v17 = vrot.slane %v373_v3, 2  ;;  %v383_v22 = vrot.slane %v382_v12, 2 }
 0x265   :  { %v398_v62 = vsel %vm397_vm8, %v347_v58, %v395_v18 }
 0x266   :  { %v375_v28 = vmax.f32 %v373_v3, %v374_v17  ;;  %v384_v29 = vmax.f32 %v382_v12, %v383_v22  ;;  %v335_v30 = vadd.f32 %v334_v16, %v333_v13  ;;  %v344_v31 = vadd.f32 %v343_v2, %v342_v63 }
 0x267   :  { %v4951_v17 = vstv %s3058_s22 }
 0x268   :  { %v376_v32 = vrot.slane %v375_v28, 1  ;;  %v385_v0 = vrot.slane %v384_v29, 1  ;;  %v336_v45 = vrot.slane %v335_v30, 1  ;;  %v345_v33 = vrot.slane %v344_v31, 1 }
 0x26a   :  { %v386_v34 = vmax.f32 %v384_v29, %v385_v0  ;;  %v337_v40 = vadd.f32 %v336_v45, %v335_v30  ;;  %v346_v37 = vadd.f32 %v345_v33, %v344_v31  ;;  %v377_v43 = vmax.f32 %v375_v28, %v376_v32 }
 0x26b   :  { %v4935_v32 = vstv %s3068_s26  ;;  %v4946_v45 = vstv %s3075_s27 }
 0x26c   :  { %v422_v20 = vrot.slane %v386_v34, 4  ;;  %v350_v50 = vmul.f32 0.03125, %v346_v37  ;;  %v349_v51 = vmul.f32 0.03125, %v337_v40  ;;  %v4937_v37 = vstv %s3089_s0 }
 0x26e   :  { %v424_v21 = vsel %vm397_vm8, %v377_v43, %v422_v20  ;;  %v396_v19 = vrot.slane %v350_v50, 4  ;;  %v4929_v43 = vstv %s3104_s30 }
 0x26f   :  { %v426_v56 = vrot.slane %v424_v21, 5  ;;  %v4917_v21 = vstv %s3110_s6 }
 0x270   :  { %v399_v14 = vsel %vm397_vm8, %v349_v51, %v396_v19  ;;  %v4919_v51 = vstv %s3114_s8  ;;  %v4931_v19 = vstv %s3121_s1 }
 0x271   :  { %v427_v60 = vsel %vm160_vm4, %v426_v56, %v425_v53  ;;  %v400_v6 = vrot.slane %v399_v14, 7  ;;  %vm438_vm4 = vmor %vm437_vm2, %vm436_vm1  ;;  %vm585_vm1 = vcmask 523264   ;;  %vm622_vm2 = vcmask 392192  }
 0x272   :  { %v429_v61 = vsel %vm428_vm15, %v426_v56, %v427_v60  ;;  %v4924_v60 = vstv %s3131_s9  ;;  %vm511_vm15 = vcmask 785408  }
 0x273   :  { %430 = vrot.lane.b32.xlu0 %v429_v61, %s2759_s21  ;;  %v401_v13 = vsel %vm135_vm3, %v400_v6, %v398_v62  ;;  %v4908_v61 = vstv %s3144_s12  ;;  %v4909_v62 = vstv %s3146_s13 }
 0x274   :  { %v403_v63 = vsel %vm402_vm0, %v400_v6, %v401_v13  ;;  %vm548_vm0 = vcmask 654336  }
 0x275   :  { %404 = vrot.lane.b32.xlu1 %v403_v63, %s2759_s21  ;;  %s3198_s21 = sld [smem:[#allocation3 + $0x55]] }
 0x27b   :  { %5070 = sst [smem:[#allocation31_spill]] %s3198_s21 }
 0x2e5   :  { %v431_v3 = vpop.permute.xlu0 %430 }
 0x2e6   :  { %v432_v12 = vrot.slane %v431_v3, 4 }
 0x2e7   :  { %v405_v8 = vpop.permute.xlu1 %404 }
 0x2e8   :  { %v433_v15 = vsel %vm407_vm5, %v432_v12, %v431_v3  ;;  %441 = vst.msk [vmem:[#allocation2 + $0x8] sm:$0xc] %vm440_vm9, %v432_v12  ;;  %v406_v16 = vrot.slane %v405_v8, 4  ;;  %v4896_v12 = vstv %s3152_s2  ;;  %s5090_s2 = smov 64   ;;  %vm1537_vm9 = vcmask 23552  }
 0x2e9   :  { %439 = vst.msk [vmem:[#allocation2] sm:$0xcc] %vm438_vm4, %v433_v15  ;;  %vm1263_vm4 = vcmask 1031168  }
 0x2ea   :  { %v408_v2 = vsel %vm407_vm5, %v406_v16, %v405_v8  ;;  %416 = vst.msk [vmem:[#allocation2 + $0x8] sm:$0x3] %vm415_vm12, %v406_v16  ;;  %v4898_v8 = vstv %s3156_s15  ;;  %v4912_v16 = vstv %s3163_s16  ;;  %s3576_s15 = sld [smem:[#allocation3 + $0x14]]  ;;  %vm960_vm5 = vcmask 7168  }
 0x2eb   :  { %414 = vst.msk [vmem:[#allocation2] sm:$0x33] %vm413_vm13, %v408_v2  ;;  %vm1552_vm12 = vcmask 1022976   ;;  %vm1841_vm13 = vcmask 1014784  }
 0x2ef   :  { %v3071_v22 = vld [vmem:[#allocation2 + $0x8] sm:$0xc] }
 0x2f0   :  { %v480_v28 = vmul.f32 %v4951_v17, %v3071_v22  ;;  %v554_v0 = vmul.f32 %v4932_v10, %v3071_v22  ;;  %v517_v33 = vmul.f32 %v4935_v32, %v3071_v22  ;;  %v591_v41 = vmul.f32 %v4937_v37, %v3071_v22  ;;  %5124 = sst [smem:[#allocation79_spill]] %s3576_s15  ;;  %v3744_v7 = vld [vmem:[#allocation2] sm:$0xcc] }
 0x2f1   :  { %v3080_v29 = vld [vmem:[#allocation2 + $0x8] sm:$0x3]  ;;  %v664_v18 = vmul.f32 %v4917_v21, %v3071_v22  ;;  %v628_v53 = vmul.f32 %v4919_v51, %v3071_v22  ;;  %v731_v6 = vmul.f32 %v4924_v60, %v3071_v22  ;;  %v811_v15 = vmul.f32 %v4896_v12, %v3071_v22 }
 0x2f2   :  { %v2502_v30 = vrot.slane %v480_v28, 10  ;;  %v501_v31 = vmul.f32 %v4942_v23, %v3080_v29  ;;  %v462_v9 = vmul.f32 %v4944_v25, %v3080_v29  ;;  %v538_v1 = vmul.f32 %v4946_v45, %v3080_v29 }
 0x2f3   :  { %v2510_v34 = vrot.slane %v554_v0, 10  ;;  %v2506_v40 = vrot.slane %v517_v33, 10  ;;  %v2514_v20 = vrot.slane %v591_v41, 10  ;;  %v612_v44 = vmul.f32 %v4927_v42, %v3080_v29 }
 0x2f4   :  { %489 = vrot.lane.b32.xlu2 %v2502_v30, %s4809_s4  ;;  %506 = vrot.lane.b32.xlu0 %v501_v31, %s4813_s28  ;;  %v575_v50 = vmul.f32 %v4929_v43, %v3080_v29  ;;  %v649_v56 = vmul.f32 %v4931_v19, %v3080_v29  ;;  %v2522_v58 = vrot.slane %v664_v18, 10  ;;  %v2518_v14 = vrot.slane %v628_v53, 10 }
 0x2f5   :  { %467 = vrot.lane.b32.xlu1 %v462_v9, %s4809_s4  ;;  %v2530_v13 = vrot.slane %v731_v6, 10  ;;  %v754_v63 = vmul.f32 %v4908_v61, %v3080_v29  ;;  %v714_v3 = vmul.f32 %v4909_v62, %v3080_v29  ;;  %v771_v2 = vmul.f32 %v4898_v8, %v3071_v22 }
 0x2f6   :  { %v794_v28 = vmul.f32 %v4912_v16, %v3080_v29  ;;  %v2538_v30 = vrot.slane %v811_v15, 10  ;;  %v4904_v9 = vstv %s3173_s17  ;;  %v4890_v33 = vstv %s3186_s18  ;;  %s5081_s18 = smov 112  }
 0x2f7   :  { %v2534_v31 = vrot.slane %v771_v2, 10  ;;  %v851_v0 = vmul.f32 %v4904_v9, %v3071_v22 }
 0x2fc   :  { %543 = vrot.lane.b32.xlu2 %v538_v1, %s4811_s7  ;;  %563 = vrot.lane.b32.xlu0 %v2510_v34, %s4811_s7  ;;  %v4892_v1 = vstv %s3188_s19  ;;  %v2542_v34 = vrot.slane %v851_v0, 10  ;;  %s5086_s19 = smov 80  }
 0x2fd   :  { %526 = vrot.lane.b32.xlu1 %v2506_v40, %s4813_s28  ;;  %v874_v40 = vmul.f32 %v4890_v33, %v3080_v29  ;;  %v834_v41 = vmul.f32 %v4892_v1, %v3080_v29 }
 0x304   :  { %600 = vrot.lane.b32.xlu2 %v2514_v20, %s4817_s10  ;;  %617 = vrot.lane.b32.xlu0 %v612_v44, %s4819_s11  ;;  %v4878_v20 = vstv %s3194_s20  ;;  %v4880_v44 = vstv %s3198_s21  ;;  %s3247_s20 = sld [smem:[#allocation3 + $0x17]] }
 0x305   :  { %580 = vrot.lane.b32.xlu1 %v575_v50, %s4817_s10  ;;  %v931_v50 = vmul.f32 %v4878_v20, %v3071_v22  ;;  %v891_v53 = vmul.f32 %v4880_v44, %v3071_v22  ;;  %s3257_s21 = sld [smem:[#allocation3 + $0x4f]] }
 0x30a   :  { %5079 = sst [smem:[#allocation38_spill]] %s3247_s20 }
 0x30b   :  { %5080 = sst [smem:[#allocation39_spill]] %s3257_s21 }
 0x30c   :  { %654 = vrot.lane.b32.xlu2 %v649_v56, %s4815_s14  ;;  %673 = vrot.lane.b32.xlu0 %v2522_v58, %s4815_s14  ;;  %s3230_s14 = sld [smem:[#allocation3 + $0x9]]  ;;  %v2550_v58 = vrot.slane %v931_v50, 10 }
 0x30d   :  { %637 = vrot.lane.b32.xlu1 %v2518_v14, %s4819_s11  ;;  %v2546_v14 = vrot.slane %v891_v53, 10 }
 0x312   :  { %5074 = sst [smem:[#allocation35_spill]] %s3230_s14 }
 0x314   :  { %740 = vrot.lane.b32.xlu2 %v2530_v13, %s4809_s4  ;;  %759 = vrot.lane.b32.xlu0 %v754_v63, %s4813_s28 }
 0x315   :  { %719 = vrot.lane.b32.xlu1 %v714_v3, %s4809_s4  ;;  %s3205_s4 = sld [smem:[#allocation3 + $0x2b]]  ;;  %v4875_v3 = vstv %s3230_s14 }
 0x316   :  { %s3272_s14 = sld [smem:[#allocation3 + $0x1e]] }
 0x31b   :  { %5071 = sst [smem:[#allocation32_spill]] %s3205_s4  ;;  %v4893_v18 = vstv %s3205_s4 }
 0x31c   :  { %799 = vrot.lane.b32.xlu2 %v794_v28, %s4811_s7  ;;  %820 = vrot.lane.b32.xlu0 %v2538_v30, %s4811_s7  ;;  %s3215_s7 = sld [smem:[#allocation3 + $0x3a]]  ;;  %v914_v56 = vmul.f32 %v4893_v18, %v3080_v29  ;;  %v1003_v28 = vmul.f32 %v4875_v3, %v3080_v29 }
 0x31d   :  { %780 = vrot.lane.b32.xlu1 %v2534_v31, %s4813_s28  ;;  %s3228_s28 = sld [smem:[#allocation3 + $0x10]]  ;;  %v4864_v31 = vstv %s3240_s5 }
 0x31e   :  { %5084 = sst [smem:[#allocation41_spill]] %s3272_s14 }
 0x31f   :  { %s3282_s5 = sld [smem:[#allocation3 + $0x56]] }
 0x320   :  { %s3299_s4 = sld [smem:[#allocation3 + $0x3b]] }
 0x322   :  { %5072 = sst [smem:[#allocation33_spill]] %s3215_s7  ;;  %v4882_v6 = vstv %s3215_s7  ;;  %s5082_s7 = smov 96  }
 0x323   :  { %5073 = sst [smem:[#allocation34_spill]] %s3228_s28  ;;  %v1020_v13 = vmul.f32 %v4882_v6, %v3071_v22  ;;  %v4872_v63 = vstv %s3228_s28 }
 0x324   :  { %860 = vrot.lane.b32.xlu2 %v2542_v34, %s4817_s10  ;;  %879 = vrot.lane.b32.xlu0 %v874_v40, %s4819_s11  ;;  %s5076_s11 = smov 32   ;;  %v1043_v2 = vmul.f32 %v4872_v63, %v3080_v29  ;;  %v4874_v34 = vstv %s3247_s20  ;;  %v1060_v40 = vmul.f32 %v4864_v31, %v3071_v22  ;;  %s3270_s28 = sld [smem:[#allocation3 + $0x25]] }
 0x325   :  { %839 = vrot.lane.b32.xlu1 %v834_v41, %s4817_s10  ;;  %s3236_s10 = sld [smem:[#allocation3 + $0x48]]  ;;  %v2559_v15 = vrot.slane %v1020_v13, 10  ;;  %v1083_v41 = vmul.f32 %v4874_v34, %v3080_v29  ;;  %v4851_v13 = vstv %s3272_s14 }
 0x326   :  { %v2563_v53 = vrot.slane %v1060_v40, 10  ;;  %5087 = sst [smem:[#allocation43_spill]] %s3282_s5  ;;  %v4842_v40 = vstv %s3282_s5 }
 0x327   :  { %s3289_s20 = sld [smem:[#allocation3 + $0x2c]] }
 0x328   :  { %5089 = sst [smem:[#allocation45_spill]] %s3299_s4 }
 0x329   :  { %s3314_s14 = sld [smem:[#allocation3 + $0xa]] }
 0x32a   :  { %5083 = sst [smem:[#allocation40_spill]] %s3270_s28 }
 0x32b   :  { %5075 = sst [smem:[#allocation36_spill]] %s3236_s10  ;;  %v4860_v30 = vstv %s3236_s10 }
 0x32c   :  { %919 = vrot.lane.b32.xlu2 %v914_v56, %s5076_s11  ;;  %940 = vrot.lane.b32.xlu0 %v2550_v58, %s5076_s11  ;;  %v1100_v0 = vmul.f32 %v4860_v30, %v3071_v22  ;;  %v4862_v56 = vstv %s3257_s21  ;;  %s3278_s10 = sld [smem:[#allocation3 + $0x5d]] }
 0x32d   :  { %900 = vrot.lane.b32.xlu1 %v2546_v14, %s5078_s3  ;;  %v1140_v58 = vmul.f32 %v4862_v56, %v3071_v22  ;;  %v4843_v14 = vstv %s3270_s28  ;;  %5088 = sst [smem:[#allocation44_spill]] %s3289_s20 }
 0x32e   :  { %v2567_v50 = vrot.slane %v1100_v0, 10  ;;  %s3312_s28 = sld [smem:[#allocation3 + $0x11]] }
 0x32f   :  { %5092 = sst [smem:[#allocation47_spill]] %s3314_s14 }
 0x330   :  { %s3324_s5 = sld [smem:[#allocation3 + $0x42]] }
 0x331   :  { %s3343_s21 = sld [smem:[#allocation3 + $0x50]] }
 0x332   :  { %5085 = sst [smem:[#allocation42_spill]] %s3278_s10  ;;  %v4840_v0 = vstv %s3278_s10 }
 0x333   :  { %s3320_s10 = sld [smem:[#allocation3 + $0x49]] }
 0x334   :  { %1029 = vrot.lane.b32.xlu2 %v2559_v15, %s5081_s18  ;;  %1048 = vrot.lane.b32.xlu0 %v1043_v2, %s5082_s7  ;;  %v2571_v15 = vrot.slane %v1140_v58, 10  ;;  %v1163_v2 = vmul.f32 %v4843_v14, %v3080_v29  ;;  %5091 = sst [smem:[#allocation46_spill]] %s3312_s28 }
 0x335   :  { %1008 = vrot.lane.b32.xlu1 %v1003_v28, %s5081_s18  ;;  %v1123_v28 = vmul.f32 %v4851_v13, %v3080_v29 }
 0x336   :  { %5094 = sst [smem:[#allocation49_spill]] %s3324_s5 }
 0x337   :  { %5096 = sst [smem:[#allocation51_spill]] %s3343_s21  ;;  %v4859_v13 = vstv %s3343_s21 }
 0x338   :  { %s3526_s21 = sld [smem:[#allocation3 + $0x44]] }
 0x339   :  { %5093 = sst [smem:[#allocation48_spill]] %s3320_s10  ;;  %v4856_v14 = vstv %s3320_s10 }
 0x33a   :  { %s3366_s10 = sld [smem:[#allocation3 + $0x5e]] }
 0x33c   :  { %1088 = vrot.lane.b32.xlu2 %v1083_v41, %s5086_s19  ;;  %1109 = vrot.lane.b32.xlu0 %v2567_v50, %s5086_s19  ;;  %v1220_v41 = vmul.f32 %v4840_v0, %v3071_v22  ;;  %v4846_v50 = vstv %s3289_s20  ;;  %s3333_s20 = sld [smem:[#allocation3 + $0x18]] }
 0x33d   :  { %1069 = vrot.lane.b32.xlu1 %v2563_v53, %s5082_s7  ;;  %v1180_v53 = vmul.f32 %v4842_v40, %v3071_v22  ;;  %v1203_v58 = vmul.f32 %v4846_v50, %v3080_v29  ;;  %v4848_v40 = vstv %s3314_s14  ;;  %s3360_s14 = sld [smem:[#allocation3 + $0x1f]] }
 0x33e   :  { %5118 = sst [smem:[#allocation73_spill]] %s3526_s21 }
 0x340   :  { %5099 = sst [smem:[#allocation54_spill]] %s3366_s10 }
 0x342   :  { %5095 = sst [smem:[#allocation50_spill]] %s3333_s20 }
 0x343   :  { %5098 = sst [smem:[#allocation53_spill]] %s3360_s14 }
 0x344   :  { %1149 = vrot.lane.b32.xlu2 %v2571_v15, %s5090_s2  ;;  %1168 = vrot.lane.b32.xlu0 %v1163_v2, %s5078_s3  ;;  %v2579_v15 = vrot.slane %v1220_v41, 10  ;;  %v2575_v2 = vrot.slane %v1180_v53, 10  ;;  %v4847_v53 = vstv %s3312_s28  ;;  %s3358_s28 = sld [smem:[#allocation3 + $0x26]] }
 0x345   :  { %1128 = vrot.lane.b32.xlu1 %v1123_v28, %s5090_s2  ;;  %v4845_v28 = vstv %s3299_s4  ;;  %s3389_s4 = sld [smem:[#allocation3 + $0x3c]] }
 0x346   :  { %v1308_v41 = vmul.f32 %v4845_v28, %v3071_v22  ;;  %v4854_v28 = vstv %s3324_s5  ;;  %s3370_s5 = sld [smem:[#allocation3 + $0x57]] }
 0x34a   :  { %5097 = sst [smem:[#allocation52_spill]] %s3358_s28 }
 0x34b   :  { %5102 = sst [smem:[#allocation57_spill]] %s3389_s4 }
 0x34c   :  { %1208 = vrot.lane.b32.xlu2 %v1203_v58, %s5076_s11  ;;  %1229 = vrot.lane.b32.xlu0 %v2579_v15, %s5076_s11  ;;  %v2588_v58 = vrot.slane %v1308_v41, 10  ;;  %v1331_v15 = vmul.f32 %v4847_v53, %v3080_v29  ;;  %v1388_v41 = vmul.f32 %v4856_v14, %v3071_v22  ;;  %v4857_v53 = vstv %s3333_s20  ;;  %5100 = sst [smem:[#allocation55_spill]] %s3370_s5 }
 0x34d   :  { %1189 = vrot.lane.b32.xlu1 %v2575_v2, %s5078_s3  ;;  %v1291_v2 = vmul.f32 %v4848_v40, %v3080_v29  ;;  %v1348_v40 = vmul.f32 %v4854_v28, %v3071_v22  ;;  %s3379_s20 = sld [smem:[#allocation3 + $0x2d]]  ;;  %v4863_v14 = vstv %s3360_s14 }
 0x34e   :  { %v3327_v0 = vpop.permute.xlu2 %489  ;;  %s3410_s14 = sld [smem:[#allocation3 + $0xb]] }
 0x353   :  { %5101 = sst [smem:[#allocation56_spill]] %s3379_s20 }
 0x354   :  { %1317 = vrot.lane.b32.xlu2 %v2588_v58, %s5081_s18  ;;  %1336 = vrot.lane.b32.xlu0 %v1331_v15, %s5082_s7  ;;  %v1371_v58 = vmul.f32 %v4857_v53, %v3080_v29  ;;  %v2596_v15 = vrot.slane %v1388_v41, 10  ;;  %v1428_v41 = vmul.f32 %v4859_v13, %v3071_v22  ;;  %v4867_v53 = vstv %s3366_s10  ;;  %5104 = sst [smem:[#allocation59_spill]] %s3410_s14 }
 0x355   :  { %1296 = vrot.lane.b32.xlu1 %v1291_v2, %s5081_s18  ;;  %v2592_v2 = vrot.slane %v1348_v40, 10  ;;  %v4861_v40 = vstv %s3358_s28  ;;  %v4870_v13 = vstv %s3370_s5  ;;  %s3408_s28 = sld [smem:[#allocation3 + $0x12]] }
 0x356   :  { %v3349_v50 = vpop.permute.xlu2 %543  ;;  %v1468_v31 = vmul.f32 %v4870_v13, %v3071_v22  ;;  %s3416_s10 = sld [smem:[#allocation3 + $0x4a]] }
 0x357   :  { %s3420_s5 = sld [smem:[#allocation3 + $0x43]] }
 0x35b   :  { %5103 = sst [smem:[#allocation58_spill]] %s3408_s28  ;;  %v4879_v63 = vstv %s3408_s28 }
 0x35c   :  { %1376 = vrot.lane.b32.xlu2 %v1371_v58, %s5086_s19  ;;  %1397 = vrot.lane.b32.xlu0 %v2596_v15, %s5086_s19  ;;  %v2600_v58 = vrot.slane %v1428_v41, 10  ;;  %v1451_v15 = vmul.f32 %v4861_v40, %v3080_v29  ;;  %v1508_v40 = vmul.f32 %v4867_v53, %v3071_v22  ;;  %v4877_v53 = vstv %s3389_s4  ;;  %5105 = sst [smem:[#allocation60_spill]] %s3416_s10 }
 0x35d   :  { %1357 = vrot.lane.b32.xlu1 %v2592_v2, %s5082_s7  ;;  %v1411_v2 = vmul.f32 %v4863_v14, %v3080_v29  ;;  %v4871_v14 = vstv %s3379_s20  ;;  %5106 = sst [smem:[#allocation61_spill]] %s3420_s5  ;;  %v4885_v3 = vstv %s3416_s10 }
 0x35e   :  { %v3373_v28 = vpop.permute.xlu2 %600  ;;  %s3433_s20 = sld [smem:[#allocation3 + $0x19]] }
 0x35f   :  { %s3443_s4 = sld [smem:[#allocation3 + $0x51]] }
 0x360   :  { %s3462_s28 = sld [smem:[#allocation3 + $0x27]] }
 0x361   :  { %s3470_s10 = sld [smem:[#allocation3 + $0x5f]] }
 0x364   :  { %1437 = vrot.lane.b32.xlu2 %v2600_v58, %s5090_s2  ;;  %1456 = vrot.lane.b32.xlu0 %v1451_v15, %s5078_s3  ;;  %v1491_v58 = vmul.f32 %v4871_v14, %v3080_v29  ;;  %v2608_v15 = vrot.slane %v1508_v40, 10  ;;  %5107 = sst [smem:[#allocation62_spill]] %s3433_s20 }
 0x365   :  { %1416 = vrot.lane.b32.xlu1 %v1411_v2, %s5090_s2  ;;  %v2604_v2 = vrot.slane %v1468_v31, 10  ;;  %v1597_v31 = vmul.f32 %v4877_v53, %v3071_v22  ;;  %5108 = sst [smem:[#allocation63_spill]] %s3443_s4  ;;  %v4888_v53 = vstv %s3420_s5 }
 0x366   :  { %v3395_v30 = vpop.permute.xlu2 %654  ;;  %v3397_v41 = vpop.permute.xlu0 %506  ;;  %v1637_v6 = vmul.f32 %v4888_v53, %v3071_v22  ;;  %5109 = sst [smem:[#allocation64_spill]] %s3462_s28  ;;  %v4897_v33 = vstv %s3462_s28 }
 0x367   :  { %v3402_v56 = vpop.permute.xlu1 %467  ;;  %5111 = sst [smem:[#allocation66_spill]] %s3470_s10  ;;  %v4903_v18 = vstv %s3470_s10 }
 0x368   :  { %s3474_s5 = sld [smem:[#allocation3 + $0x58]] }
 0x369   :  { %s3516_s28 = sld [smem:[#allocation3 + $0xd]] }
 0x36a   :  { %s3523_s10 = sld [smem:[#allocation3 + $0x3e]] }
 0x36c   :  { %1496 = vrot.lane.b32.xlu2 %v1491_v58, %s5076_s11  ;;  %1517 = vrot.lane.b32.xlu0 %v2608_v15, %s5076_s11  ;;  %v4881_v58 = vstv %s3410_s14  ;;  %v2617_v15 = vrot.slane %v1597_v31, 10  ;;  %s3464_s14 = sld [smem:[#allocation3 + $0x20]] }
 0x36d   :  { %1477 = vrot.lane.b32.xlu1 %v2604_v2, %s5078_s3  ;;  %v1620_v2 = vmul.f32 %v4879_v63, %v3080_v29  ;;  %v1580_v34 = vmul.f32 %v4881_v58, %v3080_v29  ;;  %v1677_v63 = vmul.f32 %v4885_v3, %v3071_v22  ;;  %v4889_v58 = vstv %s3433_s20  ;;  %s3487_s20 = sld [smem:[#allocation3 + $0x2e]] }
 0x36e   :  { %v3423_v13 = vpop.permute.xlu2 %740  ;;  %v3425_v14 = vpop.permute.xlu0 %563  ;;  %v4895_v3 = vstv %s3443_s4  ;;  %5112 = sst [smem:[#allocation67_spill]] %s3474_s5 }
 0x36f   :  { %v3430_v40 = vpop.permute.xlu1 %526  ;;  %s3497_s4 = sld [smem:[#allocation3 + $0x3d]]  ;;  %v4915_v61 = vstv %s3516_s28 }
 0x370   :  { %5115 = sst [smem:[#allocation70_spill]] %s3516_s28  ;;  %v4922_v16 = vstv %s3523_s10 }
 0x371   :  { %5117 = sst [smem:[#allocation72_spill]] %s3523_s10 }
 0x372   :  { %5110 = sst [smem:[#allocation65_spill]] %s3464_s14 }
 0x373   :  { %5113 = sst [smem:[#allocation68_spill]] %s3487_s20 }
 0x374   :  { %1606 = vrot.lane.b32.xlu2 %v2617_v15, %s5081_s18  ;;  %1625 = vrot.lane.b32.xlu0 %v1620_v2, %s5082_s7  ;;  %v2625_v15 = vrot.slane %v1677_v63, 10  ;;  %v2621_v2 = vrot.slane %v1637_v6, 10  ;;  %v1717_v6 = vmul.f32 %v4895_v3, %v3071_v22  ;;  %v4906_v3 = vstv %s3474_s5  ;;  %s3542_s5 = sld [smem:[#allocation3 + $0x13]] }
 0x375   :  { %1585 = vrot.lane.b32.xlu1 %v1580_v34, %s5081_s18  ;;  %v1660_v34 = vmul.f32 %v4889_v58, %v3080_v29  ;;  %5114 = sst [smem:[#allocation69_spill]] %s3497_s4  ;;  %v4913_v9 = vstv %s3497_s4 }
 0x376   :  { %v3449_v20 = vpop.permute.xlu2 %799  ;;  %v3451_v31 = vpop.permute.xlu0 %617  ;;  %s3554_s4 = sld [smem:[#allocation3 + $0x33]] }
 0x377   :  { %v3456_v44 = vpop.permute.xlu1 %580  ;;  %s3569_s28 = sld [smem:[#allocation3 + $0x1a]] }
 0x378   :  { %s3604_s10 = sld [smem:[#allocation3 + $0x21]] }
 0x37a   :  { %5119 = sst [smem:[#allocation74_spill]] %s3542_s5 }
 0x37c   :  { %1665 = vrot.lane.b32.xlu2 %v1660_v34, %s5086_s19  ;;  %1686 = vrot.lane.b32.xlu0 %v2625_v15, %s5086_s19  ;;  %v4899_v34 = vstv %s3464_s14  ;;  %v2629_v15 = vrot.slane %v1717_v6, 10  ;;  %s3518_s14 = sld [smem:[#allocation3 + $0xc]]  ;;  %v4934_v60 = vstv %s3554_s4 }
 0x37d   :  { %1646 = vrot.lane.b32.xlu1 %v2621_v2, %s5082_s7  ;;  %v1740_v2 = vmul.f32 %v4897_v33, %v3080_v29  ;;  %v1700_v1 = vmul.f32 %v4899_v34, %v3080_v29  ;;  %v1797_v33 = vmul.f32 %v4903_v18, %v3071_v22  ;;  %v4907_v34 = vstv %s3487_s20  ;;  %s3547_s20 = sld [smem:[#allocation3 + $0x45]] }
 0x37e   :  { %v3477_v53 = vpop.permute.xlu2 %860  ;;  %v3479_v58 = vpop.permute.xlu0 %673  ;;  %5121 = sst [smem:[#allocation76_spill]] %s3554_s4  ;;  %v988_v42 = vmul.f32 %v4934_v60, %v3071_v22  ;;  %v4949_v23 = vstv %s3604_s10 }
 0x37f   :  { %v3484_v63 = vpop.permute.xlu1 %637  ;;  %5122 = sst [smem:[#allocation77_spill]] %s3569_s28 }
 0x380   :  { %5128 = sst [smem:[#allocation83_spill]] %s3604_s10  ;;  %v2555_v60 = vrot.slane %v988_v42, 10 }
 0x381   :  { %s3621_s4 = sld [smem:[#allocation3 + $0x4c]] }
 0x382   :  { %5116 = sst [smem:[#allocation71_spill]] %s3518_s14  ;;  %v4916_v62 = vstv %s3518_s14 }
 0x383   :  { %5120 = sst [smem:[#allocation75_spill]] %s3547_s20 }
 0x384   :  { %1726 = vrot.lane.b32.xlu2 %v2629_v15, %s5090_s2  ;;  %1745 = vrot.lane.b32.xlu0 %v1740_v2, %s5078_s3  ;;  %v1757_v15 = vmul.f32 %v4906_v3, %v3071_v22  ;;  %v2637_v2 = vrot.slane %v1797_v33, 10  ;;  %v1886_v33 = vmul.f32 %v4913_v9, %v3071_v22  ;;  %v4923_v9 = vstv %s3526_s21  ;;  %s3573_s14 = sld [smem:[#allocation3 + $0x2]] }
 0x385   :  { %1705 = vrot.lane.b32.xlu1 %v1700_v1, %s5090_s2  ;;  %v1780_v1 = vmul.f32 %v4907_v34, %v3080_v29  ;;  %v1926_v21 = vmul.f32 %v4923_v9, %v3071_v22  ;;  %v4933_v9 = vstv %s3547_s20  ;;  %s3585_s21 = sld [smem:[#allocation3 + $0x4b]] }
 0x386   :  { %v3503_v12 = vpop.permute.xlu2 %919  ;;  %v3505_v6 = vpop.permute.xlu0 %759  ;;  %v2633_v18 = vrot.slane %v1757_v15, 10  ;;  %s3616_s20 = sld [smem:[#allocation3 + $0x52]] }
 0x387   :  { %v3510_v8 = vpop.permute.xlu1 %719  ;;  %5130 = sst [smem:[#allocation85_spill]] %s3621_s4 }
 0x388   :  { %s3669_s10 = sld [smem:[#allocation3 + $0x28]] }
 0x38a   :  { %5123 = sst [smem:[#allocation78_spill]] %s3573_s14  ;;  %v4939_v43 = vstv %s3573_s14 }
 0x38b   :  { %5125 = sst [smem:[#allocation80_spill]] %s3585_s21  ;;  %v4948_v37 = vstv %s3585_s21 }
 0x38c   :  { %1785 = vrot.lane.b32.xlu2 %v1780_v1, %s5076_s11  ;;  %1806 = vrot.lane.b32.xlu0 %v2637_v2, %s5076_s11  ;;  %v2646_v1 = vrot.slane %v1886_v33, 10  ;;  %v2158_v2 = vmul.f32 %v4915_v61, %v3080_v29  ;;  %5129 = sst [smem:[#allocation84_spill]] %s3616_s20  ;;  %v4955_v45 = vstv %s3616_s20 }
 0x38d   :  { %1766 = vrot.lane.b32.xlu1 %v2633_v18, %s5078_s3  ;;  %v1869_v18 = vmul.f32 %v4916_v62, %v3080_v29  ;;  %v2175_v62 = vmul.f32 %v4922_v16, %v3071_v22  ;;  %s3635_s14 = sld [smem:[#allocation3 + $0x22]] }
 0x38e   :  { %v3531_v3 = vpop.permute.xlu2 %1029  ;;  %v3533_v34 = vpop.permute.xlu0 %820  ;;  %s3648_s21 = sld [smem:[#allocation3 + $0x59]] }
 0x38f   :  { %v3538_v15 = vpop.permute.xlu1 %780  ;;  %5133 = sst [smem:[#allocation88_spill]] %s3669_s10 }
 0x390   :  { %s3675_s20 = sld [smem:[#allocation3 + $0x5a]] }
 0x393   :  { %5131 = sst [smem:[#allocation86_spill]] %s3635_s14  ;;  %v4959_v17 = vstv %s3635_s14 }
 0x394   :  { %1895 = vrot.lane.b32.xlu2 %v2646_v1, %s5081_s18  ;;  %2163 = vrot.lane.b32.xlu0 %v2158_v2, %s5081_s18  ;;  %v4926_v1 = vstv %s3542_s5  ;;  %v2675_v2 = vrot.slane %v2175_v62, 10  ;;  %s3598_s5 = sld [smem:[#allocation3 + $0x1b]]  ;;  %v4965_v36 = vstv %s3648_s21 }
 0x395   :  { %1874 = vrot.lane.b32.xlu1 %v1869_v18, %s5081_s18  ;;  %v2650_v18 = vrot.slane %v1926_v21, 10  ;;  %v1909_v16 = vmul.f32 %v4926_v1, %v3080_v29  ;;  %v2215_v1 = vmul.f32 %v4933_v9, %v3071_v22  ;;  %v983_v9 = vmul.f32 %v4939_v43, %v3080_v29  ;;  %5132 = sst [smem:[#allocation87_spill]] %s3648_s21 }
 0x396   :  { %v3559_v33 = vpop.permute.xlu2 %1088  ;;  %v3561_v61 = vpop.permute.xlu0 %879  ;;  %s3695_s14 = sld [smem:[#allocation3 + $0x2f]]  ;;  %v4974_v35 = vstv %s3675_s20 }
 0x397   :  { %v3571_v51 = vpop.permute.xlu1 %839  ;;  %v2679_v10 = vrot.slane %v2215_v1, 10  ;;  %v998_v43 = vadd.f32 %v2555_v60, %v983_v9  ;;  %v1989_v60 = vmul.f32 %v4949_v23, %v3080_v29  ;;  %s3713_s21 = sld [smem:[#allocation3 + $0x60]] }
 0x39a   :  { %5127 = sst [smem:[#allocation82_spill]] %s3598_s5 }
 0x39c   :  { %2184 = vrot.lane.b32.xlu2 %v2675_v2, %s5081_s18  ;;  %1935 = vrot.lane.b32.xlu0 %v2650_v18, %s5082_s7  ;;  %v4941_v18 = vstv %s3569_s28  ;;  %s3703_s28 = sld [smem:[#allocation3 + $0x29]] }
 0x39d   :  { %1914 = vrot.lane.b32.xlu1 %v1909_v16, %s5082_s7  ;;  %v4940_v16 = vstv %s3576_s15  ;;  %v1949_v19 = vmul.f32 %v4941_v18, %v3080_v29  ;;  %v4950_v18 = vstv %s3598_s5  ;;  %s3645_s15 = sld [smem:[#allocation3 + $0x53]] }
 0x39e   :  { %v3588_v62 = vpop.permute.xlu2 %1149  ;;  %v3590_v21 = vpop.permute.xlu0 %940  ;;  %v2198_v32 = vmul.f32 %v4940_v16, %v3080_v29  ;;  %v2238_v25 = vmul.f32 %v4950_v18, %v3080_v29  ;;  %s3699_s5 = sld [smem:[#allocation3 + $0x3]] }
 0x39f   :  { %5126 = vst [vmem:[#allocation81_spill] sm:$0xff] %v3590_v21  ;;  %v3600_v2 = vpop.permute.xlu1 %900 }
 0x3a2   :  { %v4983_v27 = vstv %s3703_s28 }
 0x3a3   :  { %v4963_v38 = vstv %s3645_s15 }
 0x3a4   :  { %1954 = vrot.lane.b32.xlu2 %v1949_v19, %s5086_s19  ;;  %2224 = vrot.lane.b32.xlu0 %v2679_v10, %s5082_s7  ;;  %v1966_v19 = vmul.f32 %v4948_v37, %v3071_v22  ;;  %v4980_v24 = vstv %s3699_s5 }
 0x3a5   :  { %2203 = vrot.lane.b32.xlu1 %v2198_v32, %s5082_s7 }
 0x3a6   :  { %v3624_v1 = vpop.permute.xlu2 %1208  ;;  %v3626_v42 = vpop.permute.xlu0 %1048  ;;  %v2654_v9 = vrot.slane %v1966_v19, 10  ;;  %v2006_v19 = vmul.f32 %v4955_v45, %v3071_v22 }
 0x3a7   :  { %v3628_v16 = vpop.permute.xlu1 %1008 }
 0x3a8   :  { %v1017_v10 = vadd.f32 %v3628_v16, %v998_v43  ;;  %v4964_v43 = vstv %s3621_s4  ;;  %v2658_v39 = vrot.slane %v2006_v19, 10  ;;  %s3679_s4 = sld [smem:[#allocation3 + $0x34]] }
 0x3aa   :  { %v1038_v32 = vadd.f32 %v3531_v3, %v1017_v10 }
 0x3ac   :  { %2243 = vrot.lane.b32.xlu2 %v2238_v25, %s5086_s19  ;;  %1994 = vrot.lane.b32.xlu0 %v1989_v60, %s5090_s2  ;;  %v1057_v23 = vadd.f32 %v3626_v42, %v1038_v32  ;;  %v2255_v25 = vmul.f32 %v4964_v43, %v3071_v22  ;;  %v2278_v32 = vmul.f32 %v4959_v17, %v3080_v29 }
 0x3ad   :  { %1975 = vrot.lane.b32.xlu1 %v2654_v9, %s5086_s19  ;;  %v2046_v17 = vmul.f32 %v4965_v36, %v3071_v22 }
 0x3ae   :  { %v3654_v10 = vpop.permute.xlu2 %1317  ;;  %v3656_v37 = vpop.permute.xlu0 %1109  ;;  %v2683_v45 = vrot.slane %v2255_v25, 10  ;;  %v4975_v26 = vstv %s3679_s4 }
 0x3af   :  { %v3662_v18 = vpop.permute.xlu1 %1069  ;;  %v2662_v43 = vrot.slane %v2046_v17, 10 }
 0x3b0   :  { %v1078_v60 = vadd.f32 %v3662_v18, %v1057_v23 }
 0x3b2   :  { %v1097_v9 = vadd.f32 %v3559_v33, %v1078_v60  ;;  %v2295_v60 = vmul.f32 %v4963_v38, %v3071_v22 }
 0x3b4   :  { %2015 = vrot.lane.b32.xlu2 %v2658_v39, %s5090_s2  ;;  %2283 = vrot.lane.b32.xlu0 %v2278_v32, %s5090_s2  ;;  %v1118_v25 = vadd.f32 %v3656_v37, %v1097_v9  ;;  %v4969_v32 = vstv %s3669_s10  ;;  %v2687_v38 = vrot.slane %v2295_v60, 10  ;;  %s3731_s10 = sld [smem:[#allocation3 + $0x30]] }
 0x3b5   :  { %2264 = vrot.lane.b32.xlu1 %v2683_v45, %s5086_s19  ;;  %v2029_v36 = vmul.f32 %v4969_v32, %v3080_v29  ;;  %v2335_v32 = vmul.f32 %v4974_v35, %v3071_v22 }
 0x3b6   :  { %v3684_v23 = vpop.permute.xlu2 %1376  ;;  %v3686_v19 = vpop.permute.xlu0 %1168 }
 0x3b7   :  { %5134 = vst [vmem:[#allocation89_spill] sm:$0xff] %v3684_v23  ;;  %v3697_v39 = vpop.permute.xlu1 %1128  ;;  %v2691_v35 = vrot.slane %v2335_v32, 10 }
 0x3b8   :  { %v1137_v45 = vadd.f32 %v3697_v39, %v1118_v25 }
 0x3ba   :  { %v1158_v9 = vadd.f32 %v3588_v62, %v1137_v45  ;;  %v4978_v45 = vstv %s3695_s14  ;;  %v4986_v52 = vstv %s3731_s10 }
 0x3bc   :  { %2304 = vrot.lane.b32.xlu2 %v2687_v38, %s5090_s2  ;;  %2055 = vrot.lane.b32.xlu0 %v2662_v43, %s5078_s3  ;;  %v1177_v17 = vadd.f32 %v3686_v19, %v1158_v9  ;;  %v1276_v38 = vmul.f32 %v4975_v26, %v3071_v22  ;;  %v2069_v9 = vmul.f32 %v4978_v45, %v3080_v29  ;;  %v4984_v45 = vstv %s3713_s21 }
 0x3bd   :  { %2034 = vrot.lane.b32.xlu1 %v2029_v36, %s5078_s3  ;;  %v1271_v26 = vmul.f32 %v4980_v24, %v3080_v29 }
 0x3be   :  { %v3716_v25 = vpop.permute.xlu2 %1437  ;;  %v3718_v60 = vpop.permute.xlu0 %1229  ;;  %v2584_v5 = vrot.slane %v1276_v38, 10  ;;  %v5139_v38 = vstv %s3058_s22  ;;  %s3794_s22 = sld [smem:[#allocation3 + $0x35]] }
 0x3bf   :  { %5135 = vst [vmem:[#allocation90_spill] sm:$0xff] %v3716_v25  ;;  %v3728_v43 = vpop.permute.xlu1 %1189  ;;  %v479_v24 = vmul.f32 %v5139_v38, %v3744_v7 }
 0x3c0   :  { %5136 = vst [vmem:[#allocation91_spill] sm:$0xff] %v3718_v60  ;;  %v1198_v36 = vadd.f32 %v3728_v43, %v1177_v17  ;;  %v2318_v17 = vmul.f32 %v4983_v27, %v3080_v29  ;;  %v1286_v57 = vadd.f32 %v2584_v5, %v1271_v26  ;;  %v2086_v27 = vmul.f32 %v4984_v45, %v3071_v22 }
 0x3c1   :  { %v2501_v5 = vrot.slane %v479_v24, 10 }
 0x3c2   :  { %v3739_v11 = vadd.f32 %v3624_v1, %v1198_v36  ;;  %v2666_v26 = vrot.slane %v2086_v27, 10 }
 0x3c4   :  { %5137 = vst [vmem:[#allocation92_spill] sm:$0xff] %v3739_v11  ;;  %2074 = vrot.lane.b32.xlu2 %v2069_v9, %s5076_s11  ;;  %2344 = vrot.lane.b32.xlu0 %v2691_v35, %s5078_s3 }
 0x3c5   :  { %2323 = vrot.lane.b32.xlu1 %v2318_v17, %s5078_s3  ;;  %v2358_v17 = vmul.f32 %v4986_v52, %v3080_v29 }
 0x3c6   :  { %v3753_v36 = vpop.permute.xlu2 %1496  ;;  %v3755_v32 = vpop.permute.xlu0 %1336 }
 0x3c7   :  { %5138 = vst [vmem:[#allocation93_spill] sm:$0xff] %v3753_v36  ;;  %v3760_v4 = vpop.permute.xlu1 %1296 }
 0x3c8   :  { %v1305_v35 = vadd.f32 %v3760_v4, %v1286_v57 }
 0x3ca   :  { %v1326_v9 = vadd.f32 %v3654_v10, %v1305_v35  ;;  %v3779_v35 = vld [vmem:[#allocation2] sm:$0x33] }
 0x3cb   :  { %v500_v55 = vmul.f32 %v5145_v54, %v3779_v35  ;;  %v5149_v54 = vstv %s3068_s26  ;;  %s3889_s26 = sld [smem:[#allocation3 + $0x37]] }
 0x3cc   :  { %2363 = vrot.lane.b32.xlu2 %v2358_v17, %s5076_s11  ;;  %487 = vrot.lane.b32.xlu0 %v2501_v5, %s5081_s18  ;;  %v1345_v57 = vadd.f32 %v3755_v32, %v1326_v9  ;;  %v5143_v17 = vstv %s3075_s27  ;;  %v516_v49 = vmul.f32 %v5149_v54, %v3744_v7  ;;  %v4995_v54 = vstv %s3794_s22  ;;  %s3894_s27 = sld [smem:[#allocation3 + $0x36]] }
 0x3cd   :  { %2095 = vrot.lane.b32.xlu1 %v2666_v26, %s5076_s11  ;;  %v537_v5 = vmul.f32 %v5143_v17, %v3779_v35  ;;  %v5144_v26 = vstv %s3062_s24  ;;  %v5148_v17 = vstv %s3089_s0  ;;  %s5167_s24 = sld [smem:[#allocation27_spill]] }
 0x3ce   :  { %v3774_v38 = vpop.permute.xlu2 %1606  ;;  %v3776_v45 = vpop.permute.xlu0 %1397  ;;  %v461_v52 = vmul.f32 %v5144_v26, %v3779_v35  ;;  %v590_v26 = vmul.f32 %v5148_v17, %v3744_v7  ;;  %v2505_v17 = vrot.slane %v516_v49, 10  ;;  %s3910_s0 = sld [smem:[#allocation3 + $0x6]] }
 0x3cf   :  { %5140 = vst [vmem:[#allocation94_spill] sm:$0xff] %v3774_v38  ;;  %v3781_v59 = vpop.permute.xlu1 %1357 }
 0x3d0   :  { %5141 = vst [vmem:[#allocation95_spill] sm:$0xff] %v3776_v45  ;;  %v1366_v24 = vadd.f32 %v3781_v59, %v1345_v57  ;;  %v2513_v11 = vrot.slane %v590_v26, 10  ;;  %v1565_v26 = vmul.f32 %v4995_v54, %v3071_v22  ;;  %v5157_v54 = vstv %s3102_s29  ;;  %s3917_s29 = sld [smem:[#allocation3 + $0x5]] }
 0x3d1   :  { %5142 = vst [vmem:[#allocation96_spill] sm:$0xff] %v3781_v59 }
 0x3d2   :  { %v1385_v27 = vadd.f32 %v3684_v23, %v1366_v24  ;;  %v2613_v22 = vrot.slane %v1565_v26, 10 }
 0x3d4   :  { %541 = vrot.lane.b32.xlu0 %v537_v5, %s5086_s19  ;;  %465 = vrot.lane.b32.xlu2 %v461_v52, %s5081_s18  ;;  %v1406_v9 = vadd.f32 %v3776_v45, %v1385_v27  ;;  %v5151_v5 = vstv %s3066_s25  ;;  %s5170_s25 = sld [smem:[#allocation26_spill]] }
 0x3d5   :  { %504 = vrot.lane.b32.xlu1 %v500_v55, %s5082_s7  ;;  %v553_v52 = vmul.f32 %v5151_v5, %v3744_v7 }
 0x3d6   :  { %v3800_v57 = vpop.permute.xlu2 %1665  ;;  %v3802_v24 = vpop.permute.xlu0 %1456 }
 0x3d7   :  { %5146 = vst [vmem:[#allocation97_spill] sm:$0xff] %v3800_v57  ;;  %v3810_v48 = vpop.permute.xlu1 %1416  ;;  %v2509_v60 = vrot.slane %v553_v52, 10  ;;  %v4998_v52 = vstv %s3815_s23 }
 0x3d8   :  { %5147 = vst [vmem:[#allocation98_spill] sm:$0xff] %v3802_v24  ;;  %v1425_v55 = vadd.f32 %v3810_v48, %v1406_v9 }
 0x3d9   :  { %5150 = vst [vmem:[#allocation99_spill] sm:$0xff] %v3810_v48  ;;  %v611_v48 = vmul.f32 %v5157_v54, %v3779_v35 }
 0x3da   :  { %v1446_v27 = vadd.f32 %v3716_v25, %v1425_v55  ;;  %v5155_v55 = vstv %s3121_s1  ;;  %v1560_v25 = vmul.f32 %v4998_v52, %v3080_v29  ;;  %v5161_v29 = vstv %s3131_s9  ;;  %s5186_s1 = sld [smem:[#allocation33_spill]] }
 0x3db   :  { %v730_v26 = vmul.f32 %v5161_v29, %v3744_v7  ;;  %s5187_s9 = sld [smem:[#allocation31_spill]] }
 0x3dc   :  { %598 = vrot.lane.b32.xlu0 %v2513_v11, %s5090_s2  ;;  %524 = vrot.lane.b32.xlu2 %v2505_v17, %s5082_s7  ;;  %v1465_v5 = vadd.f32 %v3802_v24, %v1446_v27  ;;  %v648_v17 = vmul.f32 %v5155_v55, %v3779_v35  ;;  %v5156_v27 = vstv %s3104_s30  ;;  %v1575_v55 = vadd.f32 %v2613_v22, %v1560_v25  ;;  %s5179_s30 = sld [smem:[#allocation32_spill]] }
 0x3dd   :  { %561 = vrot.lane.b32.xlu1 %v2509_v60, %s5086_s19  ;;  %v574_v24 = vmul.f32 %v5156_v27, %v3779_v35  ;;  %v5162_v27 = vstv %s3114_s8  ;;  %s5181_s8 = sld [smem:[#allocation28_spill]] }
 0x3de   :  { %v3824_v47 = vpop.permute.xlu2 %1726  ;;  %v3826_v9 = vpop.permute.xlu0 %1517  ;;  %v627_v54 = vmul.f32 %v5162_v27, %v3744_v7 }
 0x3df   :  { %5152 = vst [vmem:[#allocation100_spill] sm:$0xff] %v3824_v47  ;;  %v3831_v49 = vpop.permute.xlu1 %1477 }
 0x3e0   :  { %5153 = vst [vmem:[#allocation101_spill] sm:$0xff] %v3826_v9  ;;  %v1486_v11 = vadd.f32 %v3831_v49, %v1465_v5  ;;  %v2517_v25 = vrot.slane %v627_v54, 10 }
 0x3e1   :  { %5154 = vst [vmem:[#allocation102_spill] sm:$0xff] %v3831_v49 }
 0x3e2   :  { %v1505_v60 = vadd.f32 %v3753_v36, %v1486_v11 }
 0x3e4   :  { %v3849_v45 = vadd.f32 %v3826_v9, %v1505_v60  ;;  %652 = vrot.lane.b32.xlu0 %v648_v17, %s5076_s11  ;;  %578 = vrot.lane.b32.xlu2 %v574_v24, %s5090_s2  ;;  %v5164_v60 = vstv %s3110_s6  ;;  %s5180_s6 = sld [smem:[#allocation29_spill]] }
 0x3e5   :  { %615 = vrot.lane.b32.xlu1 %v611_v48, %s5078_s3  ;;  %v663_v17 = vmul.f32 %v5164_v60, %v3744_v7 }
 0x3e6   :  { %5158 = vst [vmem:[#allocation103_spill] sm:$0xff] %v3849_v45  ;;  %v3854_v5 = vpop.permute.xlu2 %1785  ;;  %v3856_v11 = vpop.permute.xlu0 %1625  ;;  %v2529_v45 = vrot.slane %v730_v26, 10 }
 0x3e7   :  { %5159 = vst [vmem:[#allocation104_spill] sm:$0xff] %v3854_v5  ;;  %v3864_v52 = vpop.permute.xlu1 %1585  ;;  %v2521_v22 = vrot.slane %v663_v17, 10 }
 0x3e8   :  { %5160 = vst [vmem:[#allocation105_spill] sm:$0xff] %v3856_v11  ;;  %v1594_v48 = vadd.f32 %v3864_v52, %v1575_v55 }
 0x3e9   :  { %5163 = vst [vmem:[#allocation106_spill] sm:$0xff] %v3864_v52 }
 0x3ea   :  { %v1615_v24 = vadd.f32 %v3774_v38, %v1594_v48  ;;  %v5171_v48 = vstv %s3146_s13  ;;  %v5011_v38 = vstv %s3894_s27  ;;  %s5196_s13 = sld [smem:[#allocation35_spill]] }
 0x3ec   :  { %738 = vrot.lane.b32.xlu0 %v2529_v45, %s5081_s18  ;;  %635 = vrot.lane.b32.xlu2 %v2517_v25, %s5078_s3  ;;  %v1634_v29 = vadd.f32 %v3856_v11, %v1615_v24  ;;  %v5169_v45 = vstv %s3163_s16  ;;  %v713_v24 = vmul.f32 %v5171_v48, %v3779_v35  ;;  %v5172_v25 = vstv %s3144_s12  ;;  %s5189_s12 = sld [smem:[#allocation30_spill]] }
 0x3ed   :  { %671 = vrot.lane.b32.xlu1 %v2521_v22, %s5076_s11  ;;  %v793_v17 = vmul.f32 %v5169_v45, %v3779_v35  ;;  %v753_v22 = vmul.f32 %v5172_v25, %v3779_v35  ;;  %v5175_v48 = vstv %s3173_s17  ;;  %v5176_v25 = vstv %s5167_s24  ;;  %s5199_s16 = sld [smem:[#allocation38_spill]] }
 0x3ee   :  { %v3875_v27 = vpop.permute.xlu2 %1895  ;;  %v3877_v60 = vpop.permute.xlu0 %1686  ;;  %s5200_s17 = sld [smem:[#allocation34_spill]] }
 0x3ef   :  { %5165 = vst [vmem:[#allocation107_spill] sm:$0xff] %v3875_v27  ;;  %v3879_v55 = vpop.permute.xlu1 %1646  ;;  %s5201_s24 = sld [smem:[#allocation37_spill]] }
 0x3f0   :  { %5166 = vst [vmem:[#allocation108_spill] sm:$0xff] %v3877_v60  ;;  %v1655_v26 = vadd.f32 %v3879_v55, %v1634_v29 }
 0x3f1   :  { %5168 = vst [vmem:[#allocation109_spill] sm:$0xff] %v3879_v55  ;;  %v770_v55 = vmul.f32 %v5176_v25, %v3744_v7  ;;  %v5008_v25 = vstv %s3889_s26 }
 0x3f2   :  { %v1674_v54 = vadd.f32 %v3800_v57, %v1655_v26  ;;  %v850_v57 = vmul.f32 %v5175_v48, %v3744_v7 }
 0x3f3   :  { %v2533_v11 = vrot.slane %v770_v55, 10 }
 0x3f4   :  { %797 = vrot.lane.b32.xlu0 %v793_v17, %s5086_s19  ;;  %717 = vrot.lane.b32.xlu2 %v713_v24, %s5081_s18  ;;  %v1695_v29 = vadd.f32 %v3877_v60, %v1674_v54  ;;  %v5178_v54 = vstv %s5170_s25  ;;  %v2541_v48 = vrot.slane %v850_v57, 10  ;;  %s5202_s25 = sld [smem:[#allocation39_spill]] }
 0x3f5   :  { %757 = vrot.lane.b32.xlu1 %v753_v22, %s5082_s7  ;;  %v810_v24 = vmul.f32 %v5178_v54, %v3744_v7 }
 0x3f6   :  { %v3900_v26 = vpop.permute.xlu2 %2184  ;;  %v3902_v45 = vpop.permute.xlu0 %1745 }
 0x3f7   :  { %5173 = vst [vmem:[#allocation110_spill] sm:$0xff] %v3900_v26  ;;  %v3912_v17 = vpop.permute.xlu1 %1705  ;;  %v2537_v9 = vrot.slane %v810_v24, 10 }
 0x3f8   :  { %5174 = vst [vmem:[#allocation111_spill] sm:$0xff] %v3902_v45  ;;  %v1714_v22 = vadd.f32 %v3912_v17, %v1695_v29  ;;  %v3927_v29 = vld [vmem:[#allocation2 + $0x8] sm:$0xc] }
 0x3f9   :  { %5177 = vst [vmem:[#allocation112_spill] sm:$0xff] %v3912_v17  ;;  %v2143_v57 = vmul.f32 %v3927_v29, %v5008_v25  ;;  %v3947_v17 = vld [vmem:[#allocation2 + $0x8] sm:$0x3] }
 0x3fa   :  { %v1735_v60 = vadd.f32 %v3824_v47, %v1714_v22  ;;  %v5016_v22 = vstv %s3910_s0 }
 0x3fb   :  { %v2138_v25 = vmul.f32 %v3947_v17, %v5016_v22  ;;  %v2671_v36 = vrot.slane %v2143_v57, 10 }
 0x3fc   :  { %858 = vrot.lane.b32.xlu0 %v2541_v48, %s5090_s2  ;;  %778 = vrot.lane.b32.xlu2 %v2533_v11, %s5082_s7  ;;  %v1754_v54 = vadd.f32 %v3902_v45, %v1735_v60  ;;  %v1854_v11 = vmul.f32 %v3927_v29, %v5011_v38  ;;  %v5017_v60 = vstv %s3917_s29  ;;  %v5185_v45 = vstv %s5179_s30  ;;  %s5205_s30 = sld [smem:[#allocation36_spill]] }
 0x3fd   :  { %818 = vrot.lane.b32.xlu1 %v2537_v9, %s5086_s19  ;;  %v913_v47 = vmul.f32 %v5185_v45, %v3779_v35  ;;  %v5188_v38 = vstv %s5180_s6  ;;  %v5190_v45 = vstv %s5181_s8  ;;  %v2153_v57 = vadd.f32 %v2671_v36, %v2138_v25  ;;  %s5214_s6 = sld [smem:[#allocation41_spill]] }
 0x3fe   :  { %v3932_v55 = vpop.permute.xlu2 %1954  ;;  %v3934_v24 = vpop.permute.xlu0 %1806  ;;  %v833_v49 = vmul.f32 %v5188_v38, %v3779_v35  ;;  %v873_v21 = vmul.f32 %v5190_v45, %v3779_v35  ;;  %v5195_v45 = vstv %s5187_s9  ;;  %s5217_s8 = sld [smem:[#allocation44_spill]] }
 0x3ff   :  { %5182 = vst [vmem:[#allocation113_spill] sm:$0xff] %v3932_v55  ;;  %v3940_v48 = vpop.permute.xlu1 %1766  ;;  %s5219_s9 = sld [smem:[#allocation43_spill]] }
 0x400   :  { %5183 = vst [vmem:[#allocation114_spill] sm:$0xff] %v3934_v24  ;;  %v1775_v9 = vadd.f32 %v3940_v48, %v1754_v54  ;;  %v1849_v54 = vmul.f32 %v3947_v17, %v5017_v60 }
 0x401   :  { %5184 = vst [vmem:[#allocation115_spill] sm:$0xff] %v3940_v48  ;;  %v2642_v48 = vrot.slane %v1854_v11, 10  ;;  %v5194_v11 = vstv %s5186_s1  ;;  %s5218_s1 = sld [smem:[#allocation40_spill]] }
 0x402   :  { %v1794_v52 = vadd.f32 %v3854_v5, %v1775_v9  ;;  %v1019_v60 = vmul.f32 %v5194_v11, %v3744_v7  ;;  %v890_v5 = vmul.f32 %v5195_v45, %v3744_v7 }
 0x403   :  { %v1864_v22 = vadd.f32 %v2642_v48, %v1849_v54 }
 0x404   :  { %v3963_v46 = vadd.f32 %v3934_v24, %v1794_v52  ;;  %917 = vrot.lane.b32.xlu0 %v913_v47, %s5076_s11  ;;  %837 = vrot.lane.b32.xlu2 %v833_v49, %s5090_s2  ;;  %v5198_v49 = vstv %s5189_s12  ;;  %v2558_v48 = vrot.slane %v1019_v60, 10  ;;  %v2545_v54 = vrot.slane %v890_v5, 10  ;;  %s5220_s12 = sld [smem:[#allocation45_spill]] }
 0x405   :  { %877 = vrot.lane.b32.xlu1 %v873_v21, %s5078_s3  ;;  %v930_v21 = vmul.f32 %v5198_v49, %v3744_v7  ;;  %v5207_v60 = vstv %s5196_s13  ;;  %s5223_s13 = sld [smem:[#allocation42_spill]] }
 0x406   :  { %5191 = vst [vmem:[#allocation116_spill] sm:$0xff] %v3963_v46  ;;  %v3968_v9 = vpop.permute.xlu2 %2243  ;;  %v3970_v38 = vpop.permute.xlu0 %2163 }
 0x407   :  { %5192 = vst [vmem:[#allocation117_spill] sm:$0xff] %v3968_v9  ;;  %v2172_v52 = vadd.f32 %v3970_v38, %v2153_v57  ;;  %v3979_v47 = vpop.permute.xlu1 %1874  ;;  %v2549_v24 = vrot.slane %v930_v21, 10  ;;  %v5208_v21 = vstv %s5199_s16  ;;  %s5234_s16 = sld [smem:[#allocation47_spill]] }
 0x408   :  { %5193 = vst [vmem:[#allocation118_spill] sm:$0xff] %v3970_v38  ;;  %v1883_v36 = vadd.f32 %v3979_v47, %v1864_v22 }
 0x409   :  { %5197 = vst [vmem:[#allocation119_spill] sm:$0xff] %v3979_v47  ;;  %v2193_v25 = vadd.f32 %v3900_v26, %v2172_v52  ;;  %v1002_v52 = vmul.f32 %v5207_v60, %v3779_v35 }
 0x40a   :  { %v1904_v11 = vadd.f32 %v3875_v27, %v1883_v36  ;;  %v1082_v36 = vmul.f32 %v5208_v21, %v3779_v35  ;;  %v5213_v21 = vstv %s5202_s25  ;;  %s2497_s25 = sld [smem:[#allocation3 + $0x31]] }
 0x40c   :  { %1027 = vrot.lane.b32.xlu0 %v2558_v48, %s5081_s18  ;;  %898 = vrot.lane.b32.xlu2 %v2545_v54, %s5078_s3 }
 0x40d   :  { %938 = vrot.lane.b32.xlu1 %v2549_v24, %s5076_s11  ;;  %v5209_v24 = vstv %s5200_s17  ;;  %s5235_s17 = sld [smem:[#allocation50_spill]] }
 0x40e   :  { %v3990_v57 = vpop.permute.xlu2 %2015  ;;  %v3992_v45 = vpop.permute.xlu0 %1935  ;;  %v1042_v48 = vmul.f32 %v5209_v24, %v3779_v35 }
 0x40f   :  { %5203 = vst [vmem:[#allocation120_spill] sm:$0xff] %v3990_v57  ;;  %v3994_v22 = vpop.permute.xlu1 %1914 }
 0x410   :  { %5204 = vst [vmem:[#allocation121_spill] sm:$0xff] %v3992_v45  ;;  %v1923_v5 = vadd.f32 %v3994_v22, %v1904_v11  ;;  %v5210_v11 = vstv %s5201_s24  ;;  %s5236_s24 = sld [smem:[#allocation46_spill]] }
 0x411   :  { %5206 = vst [vmem:[#allocation122_spill] sm:$0xff] %v3994_v22  ;;  %v1059_v38 = vmul.f32 %v5210_v11, %v3744_v7 }
 0x412   :  { %v1944_v49 = vadd.f32 %v3992_v45, %v1923_v5  ;;  %v1139_v45 = vmul.f32 %v5213_v21, %v3744_v7 }
 0x414   :  { %1086 = vrot.lane.b32.xlu0 %v1082_v36, %s5086_s19  ;;  %1006 = vrot.lane.b32.xlu2 %v1002_v52, %s5081_s18  ;;  %v1963_v54 = vadd.f32 %v3932_v55, %v1944_v49  ;;  %v5216_v36 = vstv %s5205_s30  ;;  %v2570_v55 = vrot.slane %v1139_v45, 10  ;;  %v5225_v45 = vstv %s5214_s6  ;;  %s5237_s30 = sld [smem:[#allocation48_spill]] }
 0x415   :  { %1046 = vrot.lane.b32.xlu1 %v1042_v48, %s5082_s7  ;;  %v1099_v52 = vmul.f32 %v5216_v36, %v3744_v7  ;;  %v2562_v48 = vrot.slane %v1059_v38, 10  ;;  %s5239_s6 = sld [smem:[#allocation49_spill]] }
 0x416   :  { %v4014_v60 = vpop.permute.xlu2 %2304  ;;  %v4016_v5 = vpop.permute.xlu0 %2224 }
 0x417   :  { %5211 = vst [vmem:[#allocation123_spill] sm:$0xff] %v4014_v60  ;;  %v4021_v24 = vpop.permute.xlu1 %2203  ;;  %v2566_v26 = vrot.slane %v1099_v52, 10 }
 0x418   :  { %5212 = vst [vmem:[#allocation124_spill] sm:$0xff] %v4016_v5  ;;  %v2212_v49 = vadd.f32 %v4021_v24, %v2193_v25 }
 0x419   :  { %5215 = vst [vmem:[#allocation125_spill] sm:$0xff] %v4021_v24 }
 0x41a   :  { %v2233_v11 = vadd.f32 %v4016_v5, %v2212_v49  ;;  %v5226_v49 = vstv %s5217_s8  ;;  %s5240_s8 = sld [smem:[#allocation51_spill]] }
 0x41c   :  { %1147 = vrot.lane.b32.xlu0 %v2570_v55, %s5090_s2  ;;  %1067 = vrot.lane.b32.xlu2 %v2562_v48, %s5082_s7  ;;  %v2252_v21 = vadd.f32 %v3968_v9, %v2233_v11  ;;  %v1122_v55 = vmul.f32 %v5225_v45, %v3779_v35  ;;  %v1202_v48 = vmul.f32 %v5226_v49, %v3779_v35  ;;  %v5231_v49 = vstv %s5220_s12  ;;  %s5251_s12 = sld [smem:[#allocation56_spill]] }
 0x41d   :  { %1107 = vrot.lane.b32.xlu1 %v2566_v26, %s5086_s19  ;;  %v5227_v26 = vstv %s5218_s1  ;;  %s442_s1 = sld [smem:[#allocation3]] }
 0x41e   :  { %v4032_v36 = vpop.permute.xlu2 %2074  ;;  %v4034_v22 = vpop.permute.xlu0 %1994  ;;  %v1162_v11 = vmul.f32 %v5227_v26, %v3779_v35 }
 0x41f   :  { %5221 = vst [vmem:[#allocation126_spill] sm:$0xff] %v4032_v36  ;;  %v4036_v38 = vpop.permute.xlu1 %1975 }
 0x420   :  { %5222 = vst [vmem:[#allocation127_spill] sm:$0xff] %v4034_v22  ;;  %v1984_v25 = vadd.f32 %v4036_v38, %v1963_v54  ;;  %v5228_v54 = vstv %s5219_s9  ;;  %s5250_s9 = sld [smem:[#allocation53_spill]] }
 0x421   :  { %5224 = vst [vmem:[#allocation128_spill] sm:$0xff] %v4036_v38  ;;  %v1179_v9 = vmul.f32 %v5228_v54, %v3744_v7 }
 0x422   :  { %v2003_v52 = vadd.f32 %v4034_v22, %v1984_v25  ;;  %v1307_v22 = vmul.f32 %v5231_v49, %v3744_v7 }
 0x424   :  { %1206 = vrot.lane.b32.xlu0 %v1202_v48, %s5076_s11  ;;  %1126 = vrot.lane.b32.xlu2 %v1122_v55, %s5090_s2  ;;  %v2024_v5 = vadd.f32 %v3990_v57, %v2003_v52  ;;  %v5233_v48 = vstv %s5223_s13  ;;  %v2574_v52 = vrot.slane %v1179_v9, 10  ;;  %v2587_v54 = vrot.slane %v1307_v22, 10  ;;  %s5252_s13 = sld [smem:[#allocation52_spill]] }
 0x425   :  { %1166 = vrot.lane.b32.xlu1 %v1162_v11, %s5078_s3  ;;  %v1219_v26 = vmul.f32 %v5233_v48, %v3744_v7  ;;  %v449_v57 = vstv %s2497_s25  ;;  %s4158_s25 = sld [smem:[#allocation3 + $0x32]] }
 0x426   :  { %v4056_v45 = vpop.permute.xlu2 %2363  ;;  %v4058_v25 = vpop.permute.xlu0 %2283 }
 0x427   :  { %5229 = vst [vmem:[#allocation129_spill] sm:$0xff] %v4056_v45  ;;  %v4063_v38 = vpop.permute.xlu1 %2264  ;;  %v2578_v45 = vrot.slane %v1219_v26, 10  ;;  %v5242_v26 = vstv %s5234_s16  ;;  %s5253_s16 = sld [smem:[#allocation55_spill]] }
 0x428   :  { %5230 = vst [vmem:[#allocation130_spill] sm:$0xff] %v4058_v25  ;;  %v2273_v55 = vadd.f32 %v4063_v38, %v2252_v21 }
 0x429   :  { %5232 = vst [vmem:[#allocation131_spill] sm:$0xff] %v4063_v38 }
 0x42a   :  { %v2292_v11 = vadd.f32 %v4058_v25, %v2273_v55  ;;  %v1290_v55 = vmul.f32 %v5242_v26, %v3779_v35  ;;  %v5245_v26 = vstv %s5237_s30  ;;  %s5262_s30 = sld [smem:[#allocation59_spill]] }
 0x42c   :  { %1315 = vrot.lane.b32.xlu0 %v2587_v54, %s5081_s18  ;;  %1187 = vrot.lane.b32.xlu2 %v2574_v52, %s5078_s3  ;;  %v2313_v49 = vadd.f32 %v4014_v60, %v2292_v11  ;;  %v5243_v11 = vstv %s5235_s17  ;;  %v448_v60 = vld [vmem:[#allocation2] sm:$0xcc]  ;;  %s5254_s17 = sld [smem:[#allocation57_spill]] }
 0x42d   :  { %1227 = vrot.lane.b32.xlu1 %v2578_v45, %s5076_s11  ;;  %v1370_v54 = vmul.f32 %v5243_v11, %v3779_v35  ;;  %v5244_v45 = vstv %s5236_s24  ;;  %v5247_v11 = vstv %s5240_s8  ;;  %s5255_s24 = sld [smem:[#allocation54_spill]] }
 0x42e   :  { %v4074_v48 = vpop.permute.xlu0 %2055  ;;  %v466_v9 = vpop.permute.xlu2 %465  ;;  %v1330_v25 = vmul.f32 %v5244_v45, %v3779_v35  ;;  %v1427_v38 = vmul.f32 %v5247_v11, %v3744_v7  ;;  %s4166_s8 = sld [smem:[#allocation3 + $0x1]] }
 0x42f   :  { %5238 = vst [vmem:[#allocation132_spill] sm:$0xff] %v4074_v48  ;;  %v4076_v21 = vpop.permute.xlu1 %2034  ;;  %v469_v27 = vrot.slane %v466_v9, 4 }
 0x430   :  { %5241 = vst [vmem:[#allocation133_spill] sm:$0xff] %v4076_v21  ;;  %v2043_v22 = vadd.f32 %v4076_v21, %v2024_v5  ;;  %v1387_v21 = vmul.f32 %v5245_v26, %v3744_v7  ;;  %v470_v26 = vrot.slane %v3402_v56, 4 }
 0x432   :  { %v2064_v52 = vadd.f32 %v4074_v48, %v2043_v22  ;;  %v5246_v22 = vstv %s5239_s6  ;;  %v2595_v47 = vrot.slane %v1387_v21, 10  ;;  %s5263_s6 = sld [smem:[#allocation62_spill]] }
 0x433   :  { %v1347_v48 = vmul.f32 %v5246_v22, %v3744_v7  ;;  %v2599_v22 = vrot.slane %v1427_v38, 10 }
 0x434   :  { %1374 = vrot.lane.b32.xlu0 %v1370_v54, %s5086_s19  ;;  %1294 = vrot.lane.b32.xlu2 %v1290_v55, %s5081_s18  ;;  %v2083_v5 = vadd.f32 %v4032_v36, %v2064_v52  ;;  %v450_v54 = vmul.f32 %v449_v57, %v448_v60  ;;  %v445_v52 = vstv %s442_s1  ;;  %v444_v36 = vld [vmem:[#allocation2] sm:$0x33]  ;;  %v471_v57 = vsel %vm397_vm8, %v469_v27, %v470_v26  ;;  %s5264_s1 = sld [smem:[#allocation58_spill]] }
 0x435   :  { %1334 = vrot.lane.b32.xlu1 %v1330_v25, %s5082_s7  ;;  %v2591_v46 = vrot.slane %v1347_v48, 10  ;;  %v446_v59 = vmul.f32 %v445_v52, %v444_v36  ;;  %v473_v56 = vsel %vm472_vm14, %v466_v9, %v471_v57  ;;  %v5256_v9 = vstv %s5250_s9  ;;  %s5265_s9 = sld [smem:[#allocation60_spill]] }
 0x436   :  { %v4102_v45 = vpop.permute.xlu0 %2344  ;;  %v4104_v24 = vpop.permute.xlu2 %524  ;;  %v2498_v11 = vrot.slane %v450_v54, 10  ;;  %v1410_v54 = vmul.f32 %v5256_v9, %v3779_v35  ;;  %v5257_v52 = vstv %s5251_s12  ;;  %v5260_v57 = vstv %s5254_s17  ;;  %s5266_s12 = sld [smem:[#allocation61_spill]] }
 0x437   :  { %5248 = vst [vmem:[#allocation134_spill] sm:$0xff] %v4102_v45  ;;  %v4106_v55 = vpop.permute.xlu1 %2323  ;;  %v509_v9 = vrot.slane %v3397_v41, 4  ;;  %s5275_s17 = sld [smem:[#allocation68_spill]] }
 0x438   :  { %v2332_v25 = vadd.f32 %v4106_v55, %v2313_v49  ;;  %v492_v49 = vrot.slane %v3327_v0, 4  ;;  %v455_v36 = vadd.f32 %v2498_v11, %v446_v59  ;;  %v5258_v59 = vstv %s5252_s13  ;;  %s5268_s13 = sld [smem:[#allocation63_spill]] }
 0x439   :  { %v1450_v0 = vmul.f32 %v5258_v59, %v3779_v35 }
 0x43a   :  { %v4111_v23 = vadd.f32 %v4102_v45, %v2332_v25  ;;  %v1490_v25 = vmul.f32 %v5257_v52, %v3779_v35 }
 0x43c   :  { %5249 = vst [vmem:[#allocation135_spill] sm:$0xff] %v4111_v23  ;;  %1435 = vrot.lane.b32.xlu0 %v2599_v22, %s5090_s2  ;;  %1355 = vrot.lane.b32.xlu2 %v2591_v46, %s5082_s7  ;;  %v475_v46 = vadd.f32 %v473_v56, %v455_v36  ;;  %v1596_v56 = vmul.f32 %v5260_v57, %v3744_v7 }
 0x43d   :  { %1395 = vrot.lane.b32.xlu1 %v2595_v47, %s5086_s19 }
 0x43e   :  { %v488_v60 = vpop.permute.xlu0 %487  ;;  %v4118_v38 = vpop.permute.xlu2 %578  ;;  %v2616_v59 = vrot.slane %v1596_v56, 10 }
 0x43f   :  { %v491_v48 = vrot.slane %v488_v60, 4  ;;  %v4121_v21 = vpop.permute.xlu1 %2095 }
 0x440   :  { %v4124_v27 = vadd.f32 %v4121_v21, %v2083_v5  ;;  %v5259_v5 = vstv %s5253_s16  ;;  %s5274_s16 = sld [smem:[#allocation65_spill]] }
 0x441   :  { %v493_v47 = vsel %vm397_vm8, %v491_v48, %v492_v49  ;;  %v1467_v11 = vmul.f32 %v5259_v5, %v3744_v7  ;;  %v528_v49 = vrot.slane %v4104_v24, 4  ;;  %v5261_v48 = vstv %s5255_s24  ;;  %s5276_s24 = sld [smem:[#allocation64_spill]] }
 0x442   :  { %v494_v26 = vsel %vm472_vm14, %v488_v60, %v493_v47  ;;  %v546_v5 = vrot.slane %v3349_v50, 4 }
 0x443   :  { %v496_v22 = vadd.f32 %v494_v26, %v475_v46  ;;  %v1507_v46 = vmul.f32 %v5261_v48, %v3744_v7  ;;  %v2603_v26 = vrot.slane %v1467_v11, 10  ;;  %v582_v11 = vrot.slane %v4118_v38, 4 }
 0x444   :  { %1494 = vrot.lane.b32.xlu0 %v1490_v25, %s5076_s11  ;;  %1414 = vrot.lane.b32.xlu2 %v1410_v54, %s5090_s2  ;;  %v529_v54 = vrot.slane %v3430_v40, 4 }
 0x445   :  { %1454 = vrot.lane.b32.xlu1 %v1450_v0, %s5078_s3  ;;  %v2607_v23 = vrot.slane %v1507_v46, 10 }
 0x446   :  { %v542_v36 = vpop.permute.xlu0 %541  ;;  %v4147_v60 = vpop.permute.xlu2 %635  ;;  %v530_v0 = vsel %vm397_vm8, %v528_v49, %v529_v54  ;;  %v5267_v54 = vstv %s5262_s30  ;;  %s5277_s30 = sld [smem:[#allocation67_spill]] }
 0x447   :  { %v505_v47 = vpop.permute.xlu1 %504  ;;  %v545_v52 = vrot.slane %v542_v36, 4  ;;  %v531_v50 = vsel %vm511_vm15, %v4104_v24, %v530_v0 }
 0x448   :  { %v508_v25 = vrot.slane %v505_v47, 4 }
 0x449   :  { %v547_v41 = vsel %vm397_vm8, %v545_v52, %v546_v5  ;;  %v1579_v52 = vmul.f32 %v5267_v54, %v3779_v35 }
 0x44a   :  { %v510_v57 = vsel %vm397_vm8, %v508_v25, %v509_v9  ;;  %v5269_v25 = vstv %s5263_s6  ;;  %s5278_s6 = sld [smem:[#allocation69_spill]] }
 0x44b   :  { %v512_v45 = vsel %vm511_vm15, %v505_v47, %v510_v57  ;;  %v583_v47 = vrot.slane %v3456_v44, 4  ;;  %v697_v57 = vstv %s4158_s25  ;;  %s5305_s25 = sld [smem:[#allocation80_spill]] }
 0x44c   :  { %v514_v40 = vadd.f32 %v512_v45, %v496_v22  ;;  %1604 = vrot.lane.b32.xlu0 %v2616_v59, %s5081_s18  ;;  %1475 = vrot.lane.b32.xlu2 %v2603_v26, %s5078_s3  ;;  %v566_v45 = vrot.slane %v3425_v14, 4  ;;  %v549_v22 = vsel %vm548_vm0, %v542_v36, %v547_v41  ;;  %v1659_v26 = vmul.f32 %v5269_v25, %v3779_v35 }
 0x44d   :  { %1515 = vrot.lane.b32.xlu1 %v2607_v23, %s5076_s11  ;;  %v603_v59 = vrot.slane %v3373_v28, 4  ;;  %v584_v14 = vsel %vm397_vm8, %v582_v11, %v583_v47  ;;  %v5270_v36 = vstv %s5264_s1  ;;  %v5271_v28 = vstv %s5265_s9  ;;  %s5281_s1 = sld [smem:[#allocation66_spill]] }
 0x44e   :  { %v533_v56 = vadd.f32 %v531_v50, %v514_v40  ;;  %v599_v49 = vpop.permute.xlu0 %598  ;;  %v718_v48 = vpop.permute.xlu2 %717  ;;  %v1619_v5 = vmul.f32 %v5270_v36, %v3779_v35  ;;  %v1676_v50 = vmul.f32 %v5271_v28, %v3744_v7  ;;  %v5272_v11 = vstv %s5266_s12  ;;  %s5286_s9 = sld [smem:[#allocation72_spill]] }
 0x44f   :  { %v562_v46 = vpop.permute.xlu1 %561  ;;  %v602_v9 = vrot.slane %v599_v49, 4  ;;  %v692_v47 = vstv %s4166_s8  ;;  %s5287_s12 = sld [smem:[#allocation71_spill]] }
 0x450   :  { %v551_v24 = vadd.f32 %v549_v22, %v533_v56  ;;  %v565_v23 = vrot.slane %v562_v46, 4  ;;  %v1636_v56 = vmul.f32 %v5272_v11, %v3744_v7  ;;  %v722_v11 = vrot.slane %v3510_v8, 4  ;;  %s5312_s8 = sld [smem:[#allocation83_spill]] }
 0x451   :  { %v604_v41 = vsel %vm397_vm8, %v602_v9, %v603_v59  ;;  %v639_v9 = vrot.slane %v4147_v60, 4  ;;  %v721_v59 = vrot.slane %v718_v48, 4 }
 0x452   :  { %v567_v44 = vsel %vm397_vm8, %v565_v23, %v566_v45  ;;  %v5273_v45 = vstv %s5268_s13  ;;  %v605_v25 = vsel %vm585_vm1, %v599_v49, %v604_v41  ;;  %s5289_s13 = sld [smem:[#allocation70_spill]] }
 0x453   :  { %v568_v0 = vsel %vm548_vm0, %v562_v46, %v567_v44  ;;  %v1716_v22 = vmul.f32 %v5273_v45, %v3744_v7  ;;  %v586_v46 = vsel %vm585_vm1, %v4118_v38, %v584_v14  ;;  %v640_v38 = vrot.slane %v3484_v63, 4 }
 0x454   :  { %v570_v40 = vadd.f32 %v568_v0, %v551_v24  ;;  %1663 = vrot.lane.b32.xlu0 %v1659_v26, %s5086_s19  ;;  %1583 = vrot.lane.b32.xlu2 %v1579_v52, %s5081_s18  ;;  %v620_v52 = vrot.slane %v3451_v31, 4  ;;  %v698_v26 = vmul.f32 %v697_v57, %v3744_v7  ;;  %v2624_v0 = vrot.slane %v1676_v50, 10 }
 0x455   :  { %1623 = vrot.lane.b32.xlu1 %v1619_v5, %s5082_s7  ;;  %v2628_v28 = vrot.slane %v1716_v22, 10  ;;  %v657_v31 = vrot.slane %v3395_v30, 4  ;;  %v641_v49 = vsel %vm397_vm8, %v639_v9, %v640_v38  ;;  %v693_v45 = vmul.f32 %v692_v47, %v3779_v35 }
 0x456   :  { %v588_v24 = vadd.f32 %v586_v46, %v570_v40  ;;  %v653_v23 = vpop.permute.xlu0 %652  ;;  %v4203_v54 = vpop.permute.xlu2 %778  ;;  %v2620_v40 = vrot.slane %v1636_v56, 10  ;;  %v2525_v46 = vrot.slane %v698_v26, 10  ;;  %v723_v63 = vsel %vm397_vm8, %v721_v59, %v722_v11 }
 0x457   :  { %v616_v44 = vpop.permute.xlu1 %615  ;;  %v656_v14 = vrot.slane %v653_v23, 4  ;;  %v642_v30 = vsel %vm622_vm2, %v4147_v60, %v641_v49  ;;  %v724_v22 = vsel %vm472_vm14, %v718_v48, %v723_v63  ;;  %v743_v26 = vrot.slane %v3423_v13, 4 }
 0x458   :  { %v607_v36 = vadd.f32 %v605_v25, %v588_v24  ;;  %v619_v5 = vrot.slane %v616_v44, 4  ;;  %v708_v59 = vadd.f32 %v2525_v46, %v693_v45  ;;  %v676_v60 = vrot.slane %v3479_v58, 4 }
 0x459   :  { %v658_v50 = vsel %vm397_vm8, %v656_v14, %v657_v31  ;;  %v5280_v11 = vstv %s5275_s17  ;;  %s5293_s17 = sld [smem:[#allocation74_spill]] }
 0x45a   :  { %v621_v41 = vsel %vm397_vm8, %v619_v5, %v620_v52  ;;  %v1779_v31 = vmul.f32 %v5280_v11, %v3779_v35 }
 0x45b   :  { %v623_v24 = vsel %vm622_vm2, %v616_v44, %v621_v41  ;;  %v659_v44 = vsel %vm169_vm6, %v653_v23, %v658_v50  ;;  %v5282_v41 = vstv %s5276_s24  ;;  %s5294_s24 = sld [smem:[#allocation77_spill]] }
 0x45c   :  { %v625_v56 = vadd.f32 %v623_v24, %v607_v36  ;;  %1724 = vrot.lane.b32.xlu0 %v2628_v28, %s5090_s2  ;;  %1644 = vrot.lane.b32.xlu2 %v2620_v40, %s5082_s7  ;;  %v5279_v40 = vstv %s5274_s16  ;;  %v1739_v58 = vmul.f32 %v5282_v41, %v3779_v35  ;;  %v5283_v24 = vstv %s5277_s30  ;;  %s5291_s16 = sld [smem:[#allocation73_spill]] }
 0x45d   :  { %1684 = vrot.lane.b32.xlu1 %v2624_v0, %s5086_s19  ;;  %v727_v0 = vadd.f32 %v724_v22, %v708_v59  ;;  %v1699_v28 = vmul.f32 %v5279_v40, %v3779_v35  ;;  %v1756_v50 = vmul.f32 %v5283_v24, %v3744_v7  ;;  %v782_v22 = vrot.slane %v4203_v54, 4  ;;  %s5296_s30 = sld [smem:[#allocation76_spill]] }
 0x45e   :  { %v644_v9 = vadd.f32 %v642_v30, %v625_v56  ;;  %v739_v52 = vpop.permute.xlu0 %738  ;;  %v4227_v25 = vpop.permute.xlu2 %837  ;;  %v5284_v56 = vstv %s5278_s6  ;;  %s5300_s6 = sld [smem:[#allocation79_spill]] }
 0x45f   :  { %v742_v38 = vrot.slane %v739_v52, 4  ;;  %v672_v14 = vpop.permute.xlu1 %671  ;;  %v1885_v30 = vmul.f32 %v5284_v56, %v3744_v7  ;;  %v841_v24 = vrot.slane %v4227_v25, 4 }
 0x460   :  { %v661_v36 = vadd.f32 %v659_v44, %v644_v9  ;;  %v675_v5 = vrot.slane %v672_v14, 4 }
 0x461   :  { %v744_v48 = vsel %vm397_vm8, %v742_v38, %v743_v26  ;;  %v5285_v26 = vstv %s5281_s1  ;;  %v762_v38 = vrot.slane %v3505_v6, 4  ;;  %s5301_s1 = sld [smem:[#allocation82_spill]] }
 0x462   :  { %v745_v23 = vsel %vm472_vm14, %v739_v52, %v744_v48  ;;  %v677_v49 = vsel %vm397_vm8, %v675_v5, %v676_v60  ;;  %v1796_v59 = vmul.f32 %v5285_v26, %v3744_v7  ;;  %v2632_v5 = vrot.slane %v1756_v50, 10 }
 0x463   :  { %v748_v45 = vadd.f32 %v745_v23, %v727_v0  ;;  %v678_v46 = vsel %vm169_vm6, %v672_v14, %v677_v49  ;;  %v783_v14 = vrot.slane %v3538_v15, 4  ;;  %v802_v0 = vrot.slane %v3449_v20, 4 }
 0x464   :  { %v4245_v63 = vadd.f32 %v678_v46, %v661_v36  ;;  %1783 = vrot.lane.b32.xlu0 %v1779_v31, %s5076_s11  ;;  %1703 = vrot.lane.b32.xlu2 %v1699_v28, %s5090_s2  ;;  %v2645_v48 = vrot.slane %v1885_v30, 10  ;;  %v2636_v11 = vrot.slane %v1796_v59, 10  ;;  %v823_v26 = vrot.slane %v3533_v34, 4 }
 0x465   :  { %1743 = vrot.lane.b32.xlu1 %v1739_v58, %s5078_s3  ;;  %v784_v40 = vsel %vm397_vm8, %v782_v22, %v783_v14  ;;  %v5288_v58 = vstv %s5286_s9  ;;  %v842_v59 = vrot.slane %v3571_v51, 4  ;;  %s5302_s9 = sld [smem:[#allocation78_spill]] }
 0x466   :  { %v798_v9 = vpop.permute.xlu0 %797  ;;  %v4257_v52 = vpop.permute.xlu2 %898  ;;  %v785_v41 = vsel %vm511_vm15, %v4203_v54, %v784_v40  ;;  %v2174_v46 = vmul.f32 %v5288_v58, %v3744_v7 }
 0x467   :  { %v758_v44 = vpop.permute.xlu1 %757  ;;  %v801_v60 = vrot.slane %v798_v9, 4 }
 0x468   :  { %v761_v36 = vrot.slane %v758_v44, 4 }
 0x469   :  { %v803_v23 = vsel %vm397_vm8, %v801_v60, %v802_v0  ;;  %v2674_v60 = vrot.slane %v2174_v46, 10 }
 0x46a   :  { %v763_v28 = vsel %vm397_vm8, %v761_v36, %v762_v38  ;;  %v5290_v38 = vstv %s5287_s12  ;;  %v843_v36 = vsel %vm397_vm8, %v841_v24, %v842_v59  ;;  %v5295_v24 = vstv %s5291_s16  ;;  %s5306_s12 = sld [smem:[#allocation84_spill]] }
 0x46b   :  { %v764_v31 = vsel %vm511_vm15, %v758_v44, %v763_v28  ;;  %v1868_v14 = vmul.f32 %v5290_v38, %v3779_v35  ;;  %v863_v28 = vrot.slane %v3477_v53, 4  ;;  %v5297_v59 = vstv %s5293_s17  ;;  %s5320_s16 = sld [smem:[#allocation88_spill]] }
 0x46c   :  { %v767_v49 = vadd.f32 %v764_v31, %v748_v45  ;;  %1893 = vrot.lane.b32.xlu0 %v2645_v48, %s5081_s18  ;;  %1764 = vrot.lane.b32.xlu2 %v2632_v5, %s5078_s3  ;;  %v804_v45 = vsel %vm548_vm0, %v798_v9, %v803_v23  ;;  %v5292_v48 = vstv %s5289_s13  ;;  %v844_v31 = vsel %vm585_vm1, %v4227_v25, %v843_v36  ;;  %s5313_s13 = sld [smem:[#allocation85_spill]] }
 0x46d   :  { %1804 = vrot.lane.b32.xlu1 %v2636_v11, %s5076_s11  ;;  %v2157_v9 = vmul.f32 %v5292_v48, %v3779_v35  ;;  %v902_v23 = vrot.slane %v4257_v52, 4  ;;  %v903_v25 = vrot.slane %v3600_v2, 4  ;;  %v5298_v38 = vstv %s5294_s24  ;;  %s5394_s24 = sld [smem:[#allocation137_spill]] }
 0x46e   :  { %v788_v50 = vadd.f32 %v785_v41, %v767_v49  ;;  %v859_v56 = vpop.permute.xlu0 %858  ;;  %v4278_v30 = vpop.permute.xlu2 %1006 }
 0x46f   :  { %v819_v22 = vpop.permute.xlu1 %818  ;;  %v862_v5 = vrot.slane %v859_v56, 4 }
 0x470   :  { %v807_v54 = vadd.f32 %v804_v45, %v788_v50  ;;  %v822_v44 = vrot.slane %v819_v22, 4  ;;  %v1925_v50 = vmul.f32 %v5295_v24, %v3744_v7 }
 0x471   :  { %v864_v49 = vsel %vm397_vm8, %v862_v5, %v863_v28  ;;  %v5303_v28 = vstv %s5296_s30 }
 0x472   :  { %v824_v0 = vsel %vm397_vm8, %v822_v44, %v823_v26  ;;  %v865_v44 = vsel %vm585_vm1, %v859_v56, %v864_v49  ;;  %v2649_v48 = vrot.slane %v1925_v50, 10 }
 0x473   :  { %v825_v40 = vsel %vm548_vm0, %v819_v22, %v824_v0  ;;  %v882_v22 = vrot.slane %v3561_v61, 4  ;;  %v699_v0 = vmul.f32 %v3927_v29, %v697_v57  ;;  %v1010_v57 = vrot.slane %v4278_v30, 4 }
 0x474   :  { %v828_v11 = vadd.f32 %v825_v40, %v807_v54  ;;  %2182 = vrot.lane.b32.xlu0 %v2674_v60, %s5081_s18  ;;  %1872 = vrot.lane.b32.xlu2 %v1868_v14, %s5081_s18  ;;  %v1908_v54 = vmul.f32 %v5297_v59, %v3779_v35  ;;  %v1948_v14 = vmul.f32 %v5298_v38, %v3779_v35  ;;  %v1032_v38 = vrot.slane %v3531_v3, 4 }
 0x475   :  { %2161 = vrot.lane.b32.xlu1 %v2157_v9, %s5081_s18  ;;  %v904_v60 = vsel %vm397_vm8, %v902_v23, %v903_v25  ;;  %s5299_s18 = sld [smem:[#allocation75_spill]]  ;;  %v2526_v24 = vrot.slane %v699_v0, 10  ;;  %v5311_v3 = vstv %s5306_s12 }
 0x476   :  { %v847_v41 = vadd.f32 %v844_v31, %v828_v11  ;;  %v4300_v58 = vpop.permute.xlu0 %917  ;;  %v4302_v46 = vpop.permute.xlu2 %1067  ;;  %v905_v56 = vsel %vm622_vm2, %v4257_v52, %v904_v60  ;;  %v987_v11 = vmul.f32 %v5303_v28, %v3744_v7 }
 0x477   :  { %v878_v45 = vpop.permute.xlu1 %877 }
 0x478   :  { %v881_v26 = vrot.slane %v878_v45, 4  ;;  %v868_v36 = vadd.f32 %v865_v44, %v847_v41  ;;  %v694_v41 = vmul.f32 %v3947_v17, %v692_v47  ;;  %v5309_v17 = vstv %s5302_s9 }
 0x479   :  { %v982_v47 = vmul.f32 %v5309_v17, %v3779_v35 }
 0x47a   :  { %v883_v5 = vsel %vm397_vm8, %v881_v26, %v882_v22  ;;  %v1011_v22 = vrot.slane %v3628_v16, 4  ;;  %v5307_v26 = vstv %s5300_s6 }
 0x47b   :  { %v884_v9 = vsel %vm622_vm2, %v878_v45, %v883_v5  ;;  %v5304_v50 = vstv %s5299_s18  ;;  %v2197_v59 = vmul.f32 %v5307_v26, %v3779_v35 }
 0x47c   :  { %v887_v40 = vadd.f32 %v884_v9, %v868_v36  ;;  %1952 = vrot.lane.b32.xlu0 %v1948_v14, %s5086_s19  ;;  %1912 = vrot.lane.b32.xlu2 %v1908_v54, %s5082_s7  ;;  %v2214_v52 = vmul.f32 %v5304_v50, %v3744_v7  ;;  %v5308_v54 = vstv %s5301_s1  ;;  %v2554_v14 = vrot.slane %v987_v11, 10 }
 0x47d   :  { %1933 = vrot.lane.b32.xlu1 %v2649_v48, %s5082_s7  ;;  %v2237_v44 = vmul.f32 %v5308_v54, %v3779_v35  ;;  %v1012_v60 = vsel %vm397_vm8, %v1010_v57, %v1011_v22  ;;  %v709_v36 = vadd.f32 %v2526_v24, %v694_v41  ;;  %v5310_v48 = vstv %s5305_s25 }
 0x47e   :  { %v4331_v31 = vadd.f32 %v905_v56, %v887_v40  ;;  %v1028_v23 = vpop.permute.xlu0 %1027  ;;  %v4333_v49 = vpop.permute.xlu2 %1126  ;;  %v2678_v5 = vrot.slane %v2214_v52, 10  ;;  %v1965_v9 = vmul.f32 %v5310_v48, %v3744_v7  ;;  %v2005_v40 = vmul.f32 %v5311_v3, %v3744_v7 }
 0x47f   :  { %v4341_v45 = vpop.permute.xlu1 %938  ;;  %v1031_v25 = vrot.slane %v1028_v23, 4  ;;  %v728_v16 = vadd.f32 %v3510_v8, %v709_v36  ;;  %v1013_v56 = vsel %vm472_vm14, %v4278_v30, %v1012_v60  ;;  %v997_v28 = vadd.f32 %v2554_v14, %v982_v47 }
 0x480   :  { %v1071_v11 = vrot.slane %v4302_v46, 4  ;;  %v1051_v50 = vrot.slane %v3626_v42, 4  ;;  %v1072_v52 = vrot.slane %v3662_v18, 4  ;;  %v2653_v26 = vrot.slane %v1965_v9, 10 }
 0x481   :  { %v1033_v0 = vsel %vm397_vm8, %v1031_v25, %v1032_v38  ;;  %v1016_v22 = vadd.f32 %v1013_v56, %v997_v28  ;;  %v749_v30 = vadd.f32 %v3423_v13, %v728_v16  ;;  %v1091_v18 = vrot.slane %v3559_v33, 4 }
 0x482   :  { %v1034_v8 = vsel %vm472_vm14, %v1028_v23, %v1033_v0  ;;  %v1073_v54 = vsel %vm397_vm8, %v1071_v11, %v1072_v52  ;;  %v5314_v23 = vstv %s5312_s8  ;;  %v5315_v60 = vstv %s5313_s13 }
 0x483   :  { %v1988_v47 = vmul.f32 %v5314_v23, %v3779_v35  ;;  %v768_v13 = vadd.f32 %v3505_v6, %v749_v30  ;;  %v2254_v36 = vmul.f32 %v5315_v60, %v3744_v7  ;;  %v1074_v16 = vsel %vm511_vm15, %v4302_v46, %v1073_v54  ;;  %v4421_v23 = vld [vmem:[#allocation2] sm:$0xcc] }
 0x484   :  { %2241 = vrot.lane.b32.xlu0 %v2237_v44, %s5086_s19  ;;  %2201 = vrot.lane.b32.xlu2 %v2197_v59, %s5082_s7  ;;  %v2657_v59 = vrot.slane %v2005_v40, 10  ;;  %v1037_v44 = vadd.f32 %v1034_v8, %v1016_v22  ;;  %v1130_v33 = vrot.slane %v4333_v49, 4  ;;  %v1112_v28 = vrot.slane %v3656_v37, 4 }
 0x485   :  { %2222 = vrot.lane.b32.xlu1 %v2678_v5, %s5082_s7  ;;  %v5316_v5 = vstv %s3645_s15  ;;  %s5317_s7 = sld [smem:[#allocation86_spill]]  ;;  %v789_v6 = vadd.f32 %v3538_v15, %v768_v13  ;;  %v2682_v8 = vrot.slane %v2254_v36, 10  ;;  %v1152_v52 = vrot.slane %v3588_v62, 4 }
 0x486   :  { %v1087_v57 = vpop.permute.xlu0 %1086  ;;  %v4369_v41 = vpop.permute.xlu2 %1187  ;;  %v2294_v0 = vmul.f32 %v5316_v5, %v3744_v7  ;;  %v1131_v7 = vrot.slane %v3697_v39, 4  ;;  %s5319_s15 = sld [smem:[#allocation87_spill]] }
 0x487   :  { %v1047_v24 = vpop.permute.xlu1 %1046  ;;  %v1090_v38 = vrot.slane %v1087_v57, 4  ;;  %v808_v15 = vadd.f32 %v3449_v20, %v789_v6  ;;  %v1191_v20 = vrot.slane %v4369_v41, 4 }
 0x488   :  { %v1050_v25 = vrot.slane %v1047_v24, 4  ;;  %v1132_v22 = vsel %vm397_vm8, %v1130_v33, %v1131_v7  ;;  %v5323_v33 = vstv %s3695_s14  ;;  %v5324_v7 = vstv %s3679_s4  ;;  %s2767_s14 = smov 5  }
 0x489   :  { %v1092_v48 = vsel %vm397_vm8, %v1090_v38, %v1091_v18  ;;  %v1133_v62 = vsel %vm585_vm1, %v4333_v49, %v1132_v22  ;;  %v829_v38 = vadd.f32 %v3533_v34, %v808_v15  ;;  %v5322_v34 = vstv %s5320_s16 }
 0x48a   :  { %v1052_v17 = vsel %vm397_vm8, %v1050_v25, %v1051_v50  ;;  %v1093_v50 = vsel %vm548_vm0, %v1087_v57, %v1092_v48 }
 0x48b   :  { %v1053_v42 = vsel %vm511_vm15, %v1047_v24, %v1052_v17  ;;  %v2686_v24 = vrot.slane %v2294_v0, 10  ;;  %v1171_v17 = vrot.slane %v3686_v19, 4  ;;  %v848_v5 = vadd.f32 %v3571_v51, %v829_v38  ;;  %v4429_v0 = vld [vmem:[#allocation2] sm:$0x33] }
 0x48c   :  { %v1056_v14 = vadd.f32 %v1053_v42, %v1037_v44  ;;  %2013 = vrot.lane.b32.xlu0 %v2657_v59, %s5090_s2  ;;  %1973 = vrot.lane.b32.xlu2 %v2653_v26, %s5086_s19  ;;  %v5318_v26 = vstv %s5317_s7  ;;  %v2028_v19 = vmul.f32 %v4429_v0, %v5322_v34  ;;  %v2068_v48 = vmul.f32 %v4429_v0, %v5323_v33  ;;  %v5331_v33 = vld [vmem:[#allocation96_spill] sm:$0xff] }
 0x48d   :  { %1992 = vrot.lane.b32.xlu1 %v1988_v47, %s5090_s2  ;;  %v2277_v37 = vmul.f32 %v5318_v26, %v3779_v35  ;;  %v5321_v47 = vstv %s5319_s15  ;;  %v1339_v34 = vrot.slane %v3755_v32, 4 }
 0x48e   :  { %v1077_v9 = vadd.f32 %v1074_v16, %v1056_v14  ;;  %v1148_v3 = vpop.permute.xlu0 %1147  ;;  %v4396_v40 = vpop.permute.xlu2 %1294  ;;  %v2045_v42 = vmul.f32 %v4421_v23, %v5321_v47  ;;  %v1192_v14 = vrot.slane %v3728_v43, 4  ;;  %v1211_v16 = vrot.slane %v3624_v1, 4 }
 0x48f   :  { %v1108_v56 = vpop.permute.xlu1 %1107  ;;  %v1151_v11 = vrot.slane %v1148_v3, 4  ;;  %v869_v1 = vadd.f32 %v3477_v53, %v848_v5 }
 0x490   :  { %v1111_v46 = vrot.slane %v1108_v56, 4  ;;  %v1096_v25 = vadd.f32 %v1093_v50, %v1077_v9  ;;  %v1193_v9 = vsel %vm397_vm8, %v1191_v20, %v1192_v14 }
 0x491   :  { %v1153_v59 = vsel %vm397_vm8, %v1151_v11, %v1152_v52  ;;  %v1275_v11 = vmul.f32 %v4421_v23, %v5324_v7  ;;  %v5325_v52 = vstv %s3675_s20  ;;  %v888_v26 = vadd.f32 %v3561_v61, %v869_v1  ;;  %s2769_s20 = smov 126  }
 0x492   :  { %v1113_v30 = vsel %vm397_vm8, %v1111_v46, %v1112_v28  ;;  %v1154_v49 = vsel %vm585_vm1, %v1148_v3, %v1153_v59  ;;  %v2661_v3 = vrot.slane %v2045_v42, 10  ;;  %v1194_v28 = vsel %vm622_vm2, %v4369_v41, %v1193_v9 }
 0x493   :  { %v1114_v39 = vsel %vm548_vm0, %v1108_v56, %v1113_v30  ;;  %v1298_v46 = vrot.slane %v4396_v40, 4  ;;  %v2334_v53 = vmul.f32 %v4421_v23, %v5325_v52  ;;  %v1299_v41 = vrot.slane %v3760_v4, 4 }
 0x494   :  { %v1117_v54 = vadd.f32 %v1114_v39, %v1096_v25  ;;  %2302 = vrot.lane.b32.xlu0 %v2686_v24, %s5090_s2  ;;  %2262 = vrot.lane.b32.xlu2 %v2682_v8, %s5086_s19  ;;  %v5327_v59 = vstv %s3731_s10  ;;  %v5329_v42 = vstv %s3713_s21  ;;  %v922_v52 = vrot.slane %v3503_v12, 4  ;;  %s2768_s19 = smov 6   ;;  %s2770_s21 = smov 125  }
 0x495   :  { %2281 = vrot.lane.b32.xlu1 %v2277_v37, %s5090_s2  ;;  %s4440_s2 = sld [smem:[#allocation3 + $0x61]]  ;;  %v5326_v37 = vstv %s3703_s28  ;;  %v1300_v4 = vsel %vm397_vm8, %v1298_v46, %v1299_v41  ;;  %v2690_v47 = vrot.slane %v2334_v53, 10  ;;  %v5334_v41 = vld [vmem:[#allocation81_spill] sm:$0xff] }
 0x496   :  { %v1136_v57 = vadd.f32 %v1133_v62, %v1117_v54  ;;  %v1207_v44 = vpop.permute.xlu0 %1206  ;;  %v4417_v35 = vpop.permute.xlu2 %1355  ;;  %v2317_v39 = vmul.f32 %v4429_v0, %v5326_v37  ;;  %v2357_v54 = vmul.f32 %v4429_v0, %v5327_v59  ;;  %v5328_v62 = vstv %s3699_s5  ;;  %s5330_s28 = sld [smem:[#allocation136_spill]] }
 0x497   :  { %v1167_v18 = vpop.permute.xlu1 %1166  ;;  %v1210_v13 = vrot.slane %v1207_v44, 4  ;;  %v1270_v20 = vmul.f32 %v4429_v0, %v5328_v62  ;;  %v942_v59 = vrot.slane %v4341_v45, 4 }
 0x498   :  { %v1157_v60 = vadd.f32 %v1154_v49, %v1136_v57  ;;  %v1170_v36 = vrot.slane %v1167_v18, 4  ;;  %v1320_v57 = vrot.slane %v3654_v10, 4  ;;  %v2085_v49 = vmul.f32 %v4421_v23, %v5329_v42 }
 0x499   :  { %v1212_v6 = vsel %vm397_vm8, %v1210_v13, %v1211_v16 }
 0x49a   :  { %v1172_v43 = vsel %vm397_vm8, %v1170_v36, %v1171_v17  ;;  %v1213_v22 = vsel %vm169_vm6, %v1207_v44, %v1212_v6  ;;  %v2583_v44 = vrot.slane %v1275_v11, 10  ;;  %v909_v17 = vadd.f32 %v3600_v2, %v888_v26 }
 0x49b   :  { %v1173_v51 = vsel %vm622_vm2, %v1167_v18, %v1172_v43  ;;  %v2373_v38 = vstv %s4440_s2  ;;  %v1301_v18 = vsel %vm472_vm14, %v4396_v40, %v1300_v4  ;;  %v1359_v2 = vrot.slane %v4417_v35, 4 }
 0x49c   :  { %v1176_v56 = vadd.f32 %v1173_v51, %v1157_v60  ;;  %2072 = vrot.lane.b32.xlu0 %v2068_v48, %s5076_s11  ;;  %2032 = vrot.lane.b32.xlu2 %v2028_v19, %s5078_s3  ;;  %v2375_v10 = vmul.f32 %v3927_v29, %v2373_v38  ;;  %v1285_v14 = vadd.f32 %v2583_v44, %v1270_v20  ;;  %v2667_v36 = vld [vmem:[%s5330_s28 + $0x5] ss:$8 sm:$0x3]  ;;  %v2696_v29 = vld [vmem:[%s5330_s28 + $0x6] ss:$8 sm:$0x3] }
 0x49d   :  { %2053 = vrot.lane.b32.xlu1 %v2661_v3, %s5078_s3  ;;  %v928_v5 = vadd.f32 %v3503_v12, %v909_v17  ;;  %v2374_v16 = vmul.f32 %v4421_v23, %v2373_v38  ;;  %v1360_v48 = vrot.slane %v5331_v33, 4  ;;  %v5332_v51 = vld [vmem:[#allocation89_spill] sm:$0xff]  ;;  %v2109_v32 = vperm.slane %v2667_v36, 1 }
 0x49e   :  { %v1197_v8 = vadd.f32 %v1194_v28, %v1176_v56  ;;  %v1316_v24 = vpop.permute.xlu0 %1315  ;;  %v4454_v50 = vpop.permute.xlu2 %1414  ;;  %v1304_v9 = vadd.f32 %v1301_v18, %v1285_v14  ;;  %v1379_v6 = vrot.slane %v5332_v51, 4  ;;  %v2665_v56 = vrot.slane %v2085_v49, 10  ;;  %v5336_v49 = vld [vmem:[#allocation99_spill] sm:$0xff]  ;;  %v5338_v51 = vld [vmem:[#allocation7_spill] sm:$0xff] }
 0x49f   :  { %v4460_v25 = vpop.permute.xlu1 %1227  ;;  %v1319_v30 = vrot.slane %v1316_v24, 4  ;;  %v2695_v1 = vrot.slane %v2375_v10, 10  ;;  %v1361_v28 = vsel %vm397_vm8, %v1359_v2, %v1360_v48  ;;  %v2398_v46 = vperm.slane %v2696_v29, 1 }
 0x4a0   :  { %v4463_v15 = vadd.f32 %v1213_v22, %v1197_v8  ;;  %v5333_v8 = vld [vmem:[#allocation6_spill] sm:$0xff]  ;;  %v2694_v22 = vrot.slane %v2374_v16, 10  ;;  %v921_v26 = vrot.slane %v4300_v58, 4  ;;  %v2108_v12 = vperm.slane %v2667_v36, 0 }
 0x4a1   :  { %v1321_v61 = vsel %vm397_vm8, %v1319_v30, %v1320_v57  ;;  %v949_v30 = vadd.f32 %v5334_v41, %v928_v5  ;;  %v2110_v62 = vrot.slane %v2109_v32, 4  ;;  %v1418_v20 = vrot.slane %v4454_v50, 4 }
 0x4a2   :  { %v1322_v40 = vsel %vm472_vm14, %v1316_v24, %v1321_v61  ;;  %v959_v24 = vrot.slane %v5333_v8, 4  ;;  %v2397_v38 = vperm.slane %v2696_v29, 0  ;;  %v2399_v17 = vrot.slane %v2398_v46, 4  ;;  %v5335_v61 = vld [vmem:[#allocation95_spill] sm:$0xff] }
 0x4a3   :  { %v1325_v7 = vadd.f32 %v1322_v40, %v1304_v9  ;;  %v1400_v42 = vrot.slane %v5335_v61, 4  ;;  %v1419_v18 = vrot.slane %v5336_v49, 4  ;;  %v923_v14 = vsel %vm397_vm8, %v921_v26, %v922_v52 }
 0x4a4   :  { %2361 = vrot.lane.b32.xlu0 %v2357_v54, %s5076_s11  ;;  %2321 = vrot.lane.b32.xlu2 %v2317_v39, %s5078_s3  ;;  %v1362_v54 = vsel %vm511_vm15, %v4417_v35, %v1361_v28  ;;  %v2111_v16 = vsel %vm397_vm8, %v2108_v12, %v2110_v62  ;;  %v965_v48 = vmul.f32 %v959_v24, %v949_v30  ;;  %v5342_v30 = vld [vmem:[#allocation98_spill] sm:$0xff]  ;;  %v5345_v61 = vstv %s3815_s23  ;;  %s2772_s23 = smov 123  }
 0x4a5   :  { %2342 = vrot.lane.b32.xlu1 %v2690_v47, %s5078_s3  ;;  %v943_v47 = vrot.slane %v5334_v41, 4  ;;  %v1420_v29 = vsel %vm397_vm8, %v1418_v20, %v1419_v18  ;;  %v961_v9 = vsel %vm960_vm5, %v959_v24, %v5333_v8  ;;  %v5341_v24 = vld [vmem:[#allocation92_spill] sm:$0xff]  ;;  %v1459_v26 = vrot.slane %v5342_v30, 4  ;;  %v5346_v18 = vld [vmem:[#allocation93_spill] sm:$0xff] }
 0x4a6   :  { %v1375_v13 = vpop.permute.xlu0 %1374  ;;  %v4490_v60 = vpop.permute.xlu2 %1475  ;;  %vm2444_vm5 = vcmask 1040384  }
 0x4a7   :  { %v1335_v19 = vpop.permute.xlu1 %1334  ;;  %v1378_v43 = vrot.slane %v1375_v13, 4 }
 0x4a8   :  { %v1338_v3 = vrot.slane %v1335_v19, 4 }
 0x4a9   :  { %v1380_v37 = vsel %vm397_vm8, %v1378_v43, %v1379_v6  ;;  %v924_v43 = vsel %vm169_vm6, %v4300_v58, %v923_v14  ;;  %v1248_v6 = vrot.slane %v5338_v51, 4  ;;  %v1421_v58 = vsel %vm585_vm1, %v4454_v50, %v1420_v29 }
 0x4aa   :  { %v1340_v11 = vsel %vm397_vm8, %v1338_v3, %v1339_v34  ;;  %v1381_v35 = vsel %vm548_vm0, %v1375_v13, %v1380_v37  ;;  %v5337_v34 = vld [vmem:[#allocation90_spill] sm:$0xff]  ;;  %v2400_v13 = vsel %vm397_vm8, %v2397_v38, %v2399_v17  ;;  %v927_v28 = vadd.f32 %v924_v43, %v4331_v31 }
 0x4ab   :  { %v1341_v53 = vsel %vm511_vm15, %v1335_v19, %v1340_v11  ;;  %v1440_v40 = vrot.slane %v5337_v34, 4  ;;  %v944_v19 = vsel %vm397_vm8, %v942_v59, %v943_v47  ;;  %v5339_v11 = vstv %s3794_s22  ;;  %v5344_v38 = vld [vmem:[#allocation106_spill] sm:$0xff]  ;;  %s2771_s22 = smov 124  }
 0x4ac   :  { %v1344_v39 = vadd.f32 %v1341_v53, %v1325_v7  ;;  %2384 = vrot.lane.b32.xlu0 %v2695_v1, %s5076_s11  ;;  %2093 = vrot.lane.b32.xlu2 %v2665_v56, %s5076_s11  ;;  %v945_v56 = vsel %vm169_vm6, %v4341_v45, %v944_v19  ;;  %v1231_v7 = vrot.slane %v4460_v25, 4  ;;  %v1564_v46 = vmul.f32 %v4421_v23, %v5339_v11  ;;  %v5340_v45 = vld [vmem:[#allocation91_spill] sm:$0xff] }
 0x4ad   :  { %2382 = vrot.lane.b32.xlu1 %v2694_v22, %s5076_s11  ;;  %s2766_s11 = smov 127   ;;  %v1232_v8 = vrot.slane %v5340_v45, 4  ;;  %v1238_v52 = vadd.f32 %v5340_v45, %v5341_v24  ;;  %v1479_v53 = vrot.slane %v4490_v60, 4  ;;  %v948_v50 = vadd.f32 %v945_v56, %v927_v28  ;;  %v5348_v28 = vld [vmem:[#allocation8_spill] sm:$0xff] }
 0x4ae   :  { %v1365_v57 = vadd.f32 %v1362_v54, %v1344_v39  ;;  %v1436_v44 = vpop.permute.xlu0 %1435  ;;  %v4519_v4 = vpop.permute.xlu2 %1583  ;;  %v5343_v54 = vld [vmem:[#allocation102_spill] sm:$0xff]  ;;  %v1588_v17 = vrot.slane %v5344_v38, 4  ;;  %v2612_v49 = vrot.slane %v1564_v46, 10 }
 0x4af   :  { %v1396_v10 = vpop.permute.xlu1 %1395  ;;  %v1439_v2 = vrot.slane %v1436_v44, 4  ;;  %v1587_v39 = vrot.slane %v4519_v4, 4  ;;  %v1480_v12 = vrot.slane %v5343_v54, 4  ;;  %v1233_v47 = vsel %vm397_vm8, %v1231_v7, %v1232_v8  ;;  %v5349_v7 = vld [vmem:[#allocation101_spill] sm:$0xff] }
 0x4b0   :  { %v1384_v36 = vadd.f32 %v1381_v35, %v1365_v57  ;;  %v1399_v5 = vrot.slane %v1396_v10, 4  ;;  %v1499_v35 = vrot.slane %v5346_v18, 4  ;;  %v1253_v14 = vmul.f32 %v1248_v6, %v1238_v52  ;;  %v5350_v52 = vld [vmem:[#allocation103_spill] sm:$0xff]  ;;  %v5352_v54 = vld [vmem:[#allocation105_spill] sm:$0xff]  ;;  %v5355_v18 = vld [vmem:[#allocation116_spill] sm:$0xff] }
 0x4b1   :  { %v1441_v1 = vsel %vm397_vm8, %v1439_v2, %v1440_v40  ;;  %v964_v2 = vmul.f32 %v961_v9, %v948_v50  ;;  %v1234_v34 = vsel %vm169_vm6, %v4460_v25, %v1233_v47  ;;  %v5347_v25 = vld [vmem:[#allocation94_spill] sm:$0xff]  ;;  %v1249_v8 = vsel %vm195_vm7, %v1248_v6, %v5338_v51  ;;  %v5351_v6 = vld [vmem:[#allocation9_spill] sm:$0xff]  ;;  %v5354_v47 = vld [vmem:[#allocation97_spill] sm:$0xff] }
 0x4b2   :  { %v1401_v33 = vsel %vm397_vm8, %v1399_v5, %v1400_v42  ;;  %v1442_v37 = vsel %vm585_vm1, %v1436_v44, %v1441_v1  ;;  %v1559_v42 = vmul.f32 %v4429_v0, %v5345_v61  ;;  %v1481_v44 = vsel %vm397_vm8, %v1479_v53, %v1480_v12 }
 0x4b3   :  { %v1402_v3 = vsel %vm548_vm0, %v1396_v10, %v1401_v33  ;;  %v1609_v43 = vrot.slane %v5347_v25, 4  ;;  %v1628_v12 = vrot.slane %v5352_v54, 4  ;;  %v1668_v61 = vrot.slane %v5354_v47, 4 }
 0x4b4   :  { %v1405_v32 = vadd.f32 %v1402_v3, %v1384_v36  ;;  %970 = vrot.lane.b32.xlu0 %v965_v48, %s2766_s11  ;;  %2112 = vrot.lane.b32.xlu2 %v2111_v16, %s2767_s14  ;;  %v1589_v36 = vsel %vm397_vm8, %v1587_v39, %v1588_v17  ;;  %v1482_v16 = vsel %vm622_vm2, %v4490_v60, %v1481_v44  ;;  %v1536_v60 = vrot.slane %v5348_v28, 4 }
 0x4b5   :  { %2401 = vrot.lane.b32.xlu1 %v2400_v13, %s2768_s19  ;;  %v1574_v29 = vadd.f32 %v2612_v49, %v1559_v42  ;;  %v1590_v33 = vsel %vm472_vm14, %v4519_v4, %v1589_v36  ;;  %v1237_v3 = vadd.f32 %v1234_v34, %v4463_v15  ;;  %v1825_v39 = vrot.slane %v5351_v6, 4 }
 0x4b6   :  { %v1424_v22 = vadd.f32 %v1421_v58, %v1405_v32  ;;  %v1495_v31 = vpop.permute.xlu0 %1494  ;;  %v4553_v41 = vpop.permute.xlu2 %1644  ;;  %v1520_v58 = vrot.slane %v5349_v7, 4  ;;  %v1542_v53 = vmul.f32 %v1536_v60, %v5350_v52  ;;  %v1538_v17 = vsel %vm1537_vm9, %v1536_v60, %v5348_v28  ;;  %v5360_v52 = vld [vmem:[#allocation111_spill] sm:$0xff] }
 0x4b7   :  { %v1455_v59 = vpop.permute.xlu1 %1454  ;;  %v1498_v62 = vrot.slane %v1495_v31, 4  ;;  %v1593_v45 = vadd.f32 %v1590_v33, %v1574_v29  ;;  %v1648_v50 = vrot.slane %v4553_v41, 4  ;;  %vm1826_vm7 = vcmask 31744  }
 0x4b8   :  { %v1445_v20 = vadd.f32 %v1442_v37, %v1424_v22  ;;  %v1458_v57 = vrot.slane %v1455_v59, 4  ;;  %v1252_v22 = vmul.f32 %v1249_v8, %v1237_v3 }
 0x4b9   :  { %v1500_v40 = vsel %vm397_vm8, %v1498_v62, %v1499_v35  ;;  %v5353_v62 = vld [vmem:[#allocation109_spill] sm:$0xff]  ;;  %v1831_v35 = vmul.f32 %v1825_v39, %v5355_v18 }
 0x4ba   :  { %v1460_v10 = vsel %vm397_vm8, %v1458_v57, %v1459_v26  ;;  %v1501_v56 = vsel %vm169_vm6, %v1495_v31, %v1500_v40 }
 0x4bb   :  { %v1461_v5 = vsel %vm622_vm2, %v1455_v59, %v1460_v10 }
 0x4bc   :  { %v1464_v19 = vadd.f32 %v1461_v5, %v1445_v20  ;;  %1258 = vrot.lane.b32.xlu0 %v1253_v14, %s2769_s20  ;;  %v1649_v20 = vrot.slane %v5353_v62, 4  ;;  %v5363_v62 = vstv %s3917_s29 }
 0x4bd   :  { %968 = vrot.lane.b32.xlu1 %v964_v2, %s2766_s11 }
 0x4be   :  { %v1485_v48 = vadd.f32 %v1482_v16, %v1464_v19  ;;  %v1605_v13 = vpop.permute.xlu0 %1604  ;;  %v4580_v9 = vpop.permute.xlu2 %1703  ;;  %v1650_v42 = vsel %vm397_vm8, %v1648_v50, %v1649_v20  ;;  %v5356_v16 = vld [vmem:[#allocation108_spill] sm:$0xff]  ;;  %v1848_v20 = vmul.f32 %v4429_v0, %v5363_v62 }
 0x4bf   :  { %v1608_v1 = vrot.slane %v1605_v13, 4  ;;  %v1516_v32 = vpop.permute.xlu1 %1515  ;;  %v1651_v36 = vsel %vm511_vm15, %v4553_v41, %v1650_v42  ;;  %v1707_v5 = vrot.slane %v4580_v9, 4  ;;  %v1689_v29 = vrot.slane %v5356_v16, 4 }
 0x4c0   :  { %v1504_v11 = vadd.f32 %v1501_v56, %v1485_v48  ;;  %v1519_v46 = vrot.slane %v1516_v32, 4 }
 0x4c1   :  { %v1610_v4 = vsel %vm397_vm8, %v1608_v1, %v1609_v43  ;;  %v5358_v1 = vld [vmem:[#allocation100_spill] sm:$0xff] }
 0x4c2   :  { %v1611_v15 = vsel %vm472_vm14, %v1605_v13, %v1610_v4  ;;  %v1521_v24 = vsel %vm397_vm8, %v1519_v46, %v1520_v58  ;;  %v5357_v13 = vld [vmem:[#allocation112_spill] sm:$0xff]  ;;  %v5359_v4 = vstv %s3894_s27 }
 0x4c3   :  { %v1614_v31 = vadd.f32 %v1611_v15, %v1593_v45  ;;  %v1522_v30 = vsel %vm169_vm6, %v1516_v32, %v1521_v24  ;;  %v1708_v25 = vrot.slane %v5357_v13, 4  ;;  %v1729_v32 = vrot.slane %v5358_v1, 4 }
 0x4c4   :  { %v1525_v26 = vadd.f32 %v1522_v30, %v1504_v11  ;;  %1547 = vrot.lane.b32.xlu0 %v1542_v53, %s2770_s21  ;;  %v1853_v8 = vmul.f32 %v4421_v23, %v5359_v4  ;;  %v1748_v53 = vrot.slane %v5360_v52, 4  ;;  %v1827_v4 = vsel %vm1826_vm7, %v1825_v39, %v5351_v6 }
 0x4c5   :  { %1256 = vrot.lane.b32.xlu1 %v1252_v22, %s2769_s20  ;;  %v1709_v41 = vsel %vm397_vm8, %v1707_v5, %v1708_v25 }
 0x4c6   :  { %v1664_v37 = vpop.permute.xlu0 %1663  ;;  %v1765_v51 = vpop.permute.xlu2 %1764  ;;  %v1541_v44 = vmul.f32 %v1538_v17, %v1525_v26  ;;  %v1710_v11 = vsel %vm585_vm1, %v4580_v9, %v1709_v41  ;;  %v5361_v26 = vld [vmem:[#allocation115_spill] sm:$0xff]  ;;  %v2641_v47 = vrot.slane %v1853_v8, 10 }
 0x4c7   :  { %v1624_v59 = vpop.permute.xlu1 %1623  ;;  %v1667_v57 = vrot.slane %v1664_v37, 4  ;;  %v1768_v46 = vrot.slane %v1765_v51, 4  ;;  %v1769_v50 = vrot.slane %v5361_v26, 4 }
 0x4c8   :  { %v1627_v38 = vrot.slane %v1624_v59, 4 }
 0x4c9   :  { %v1669_v14 = vsel %vm397_vm8, %v1667_v57, %v1668_v61  ;;  %v5364_v57 = vld [vmem:[#allocation104_spill] sm:$0xff]  ;;  %v1770_v17 = vsel %vm397_vm8, %v1768_v46, %v1769_v50  ;;  %v5370_v50 = vld [vmem:[#allocation110_spill] sm:$0xff] }
 0x4ca   :  { %v1629_v49 = vsel %vm397_vm8, %v1627_v38, %v1628_v12  ;;  %v1670_v33 = vsel %vm548_vm0, %v1664_v37, %v1669_v14  ;;  %v5362_v12 = vld [vmem:[#allocation119_spill] sm:$0xff]  ;;  %v1788_v38 = vrot.slane %v5364_v57, 4  ;;  %v1863_v14 = vadd.f32 %v2641_v47, %v1848_v20 }
 0x4cb   :  { %v1630_v10 = vsel %vm511_vm15, %v1624_v59, %v1629_v49  ;;  %v1877_v9 = vrot.slane %v5362_v12, 4 }
 0x4cc   :  { %v1633_v2 = vadd.f32 %v1630_v10, %v1614_v31  ;;  %1836 = vrot.lane.b32.xlu0 %v1831_v35, %s2771_s22 }
 0x4cd   :  { %1545 = vrot.lane.b32.xlu1 %v1541_v44, %s2770_s21  ;;  %v1771_v44 = vsel %vm622_vm2, %v1765_v51, %v1770_v17 }
 0x4ce   :  { %v1654_v34 = vadd.f32 %v1651_v36, %v1633_v2  ;;  %v1725_v40 = vpop.permute.xlu0 %1724  ;;  %v1873_v19 = vpop.permute.xlu2 %1872 }
 0x4cf   :  { %v1685_v48 = vpop.permute.xlu1 %1684  ;;  %v1728_v43 = vrot.slane %v1725_v40, 4  ;;  %v1876_v31 = vrot.slane %v1873_v19, 4 }
 0x4d0   :  { %v1673_v3 = vadd.f32 %v1670_v33, %v1654_v34  ;;  %v1688_v56 = vrot.slane %v1685_v48, 4 }
 0x4d1   :  { %v1730_v7 = vsel %vm397_vm8, %v1728_v43, %v1729_v32  ;;  %v1878_v42 = vsel %vm397_vm8, %v1876_v31, %v1877_v9  ;;  %v5367_v43 = vld [vmem:[#allocation114_spill] sm:$0xff]  ;;  %v5372_v9 = vld [vmem:[#allocation125_spill] sm:$0xff] }
 0x4d2   :  { %v1690_v28 = vsel %vm397_vm8, %v1688_v56, %v1689_v29  ;;  %v1731_v22 = vsel %vm585_vm1, %v1725_v40, %v1730_v7  ;;  %v1879_v2 = vsel %vm472_vm14, %v1873_v19, %v1878_v42  ;;  %v5365_v40 = vld [vmem:[#allocation107_spill] sm:$0xff]  ;;  %v5366_v29 = vld [vmem:[#allocation122_spill] sm:$0xff]  ;;  %v2206_v6 = vrot.slane %v5372_v9, 4 }
 0x4d3   :  { %v1691_v60 = vsel %vm548_vm0, %v1685_v48, %v1690_v28  ;;  %v1898_v16 = vrot.slane %v5365_v40, 4  ;;  %v1917_v33 = vrot.slane %v5366_v29, 4  ;;  %v1882_v1 = vadd.f32 %v1879_v2, %v1863_v14  ;;  %v5374_v14 = vld [vmem:[#allocation121_spill] sm:$0xff] }
 0x4d4   :  { %v1694_v58 = vadd.f32 %v1691_v60, %v1673_v3  ;;  %v1809_v3 = vrot.slane %v5367_v43, 4  ;;  %v5368_v60 = vstv %s3889_s26  ;;  %v1938_v2 = vrot.slane %v5374_v14, 4  ;;  %s2773_s26 = smov 122  }
 0x4d5   :  { %v2142_v7 = vmul.f32 %v4421_v23, %v5368_v60  ;;  %v5377_v60 = vld [vmem:[#allocation124_spill] sm:$0xff] }
 0x4d6   :  { %v1713_v45 = vadd.f32 %v1710_v11, %v1694_v58  ;;  %v1784_v15 = vpop.permute.xlu0 %1783  ;;  %v1913_v24 = vpop.permute.xlu2 %1912 }
 0x4d7   :  { %v1744_v30 = vpop.permute.xlu1 %1743  ;;  %v1787_v37 = vrot.slane %v1784_v15, 4  ;;  %v1916_v10 = vrot.slane %v1913_v24, 4  ;;  %v2670_v31 = vrot.slane %v2142_v7, 10  ;;  %v2227_v7 = vrot.slane %v5377_v60, 4 }
 0x4d8   :  { %v1734_v59 = vadd.f32 %v1731_v22, %v1713_v45  ;;  %v1747_v54 = vrot.slane %v1744_v30, 4 }
 0x4d9   :  { %v1789_v18 = vsel %vm397_vm8, %v1787_v37, %v1788_v38  ;;  %v1918_v19 = vsel %vm397_vm8, %v1916_v10, %v1917_v33  ;;  %v2187_v37 = vrot.slane %v5370_v50, 4  ;;  %v5379_v50 = vld [vmem:[#allocation120_spill] sm:$0xff] }
 0x4da   :  { %v1749_v61 = vsel %vm397_vm8, %v1747_v54, %v1748_v53  ;;  %v1790_v48 = vsel %vm169_vm6, %v1784_v15, %v1789_v18  ;;  %v1919_v46 = vsel %vm511_vm15, %v1913_v24, %v1918_v19  ;;  %v5369_v53 = vstv %s3910_s0 }
 0x4db   :  { %v1750_v49 = vsel %vm622_vm2, %v1744_v30, %v1749_v61  ;;  %v2137_v22 = vmul.f32 %v4429_v0, %v5369_v53 }
 0x4dc   :  { %v1753_v35 = vadd.f32 %v1750_v49, %v1734_v59  ;;  %v5371_v59 = vld [vmem:[#allocation118_spill] sm:$0xff]  ;;  %v5373_v49 = vld [vmem:[#allocation113_spill] sm:$0xff] }
 0x4dd   :  { %v2166_v54 = vrot.slane %v5371_v59, 4  ;;  %v2152_v62 = vadd.f32 %v2670_v31, %v2137_v22  ;;  %v1957_v18 = vrot.slane %v5373_v49, 4 }
 0x4de   :  { %v1774_v36 = vadd.f32 %v1771_v44, %v1753_v35  ;;  %v1894_v5 = vpop.permute.xlu0 %1893  ;;  %v2202_v34 = vpop.permute.xlu2 %2201 }
 0x4df   :  { %v1897_v13 = vrot.slane %v1894_v5, 4  ;;  %v1805_v25 = vpop.permute.xlu1 %1804  ;;  %v2205_v24 = vrot.slane %v2202_v34, 4 }
 0x4e0   :  { %v1793_v56 = vadd.f32 %v1790_v48, %v1774_v36  ;;  %v1808_v51 = vrot.slane %v1805_v25, 4 }
 0x4e1   :  { %v1899_v32 = vsel %vm397_vm8, %v1897_v13, %v1898_v16  ;;  %v2207_v57 = vsel %vm397_vm8, %v2205_v24, %v2206_v6  ;;  %v5375_v16 = vld [vmem:[#allocation128_spill] sm:$0xff] }
 0x4e2   :  { %v1900_v41 = vsel %vm472_vm14, %v1894_v5, %v1899_v32  ;;  %v1810_v28 = vsel %vm397_vm8, %v1808_v51, %v1809_v3  ;;  %v2208_v35 = vsel %vm511_vm15, %v2202_v34, %v2207_v57  ;;  %v1978_v29 = vrot.slane %v5375_v16, 4 }
 0x4e3   :  { %v1903_v58 = vadd.f32 %v1900_v41, %v1882_v1  ;;  %v1811_v11 = vsel %vm169_vm6, %v1805_v25, %v1810_v28  ;;  %v5376_v1 = vld [vmem:[#allocation117_spill] sm:$0xff] }
 0x4e4   :  { %v1814_v45 = vadd.f32 %v1811_v11, %v1793_v56  ;;  %v2246_v19 = vrot.slane %v5376_v1, 4 }
 0x4e5   :  { %v1922_v8 = vadd.f32 %v1919_v46, %v1903_v58 }
 0x4e6   :  { %v1830_v15 = vmul.f32 %v1827_v4, %v1814_v45  ;;  %v2183_v52 = vpop.permute.xlu0 %2182  ;;  %v1974_v30 = vpop.permute.xlu2 %1973  ;;  %v5378_v45 = vld [vmem:[#allocation131_spill] sm:$0xff] }
 0x4e7   :  { %v2186_v26 = vrot.slane %v2183_v52, 4  ;;  %v2162_v23 = vpop.permute.xlu1 %2161  ;;  %v1977_v36 = vrot.slane %v1974_v30, 4  ;;  %v2267_v4 = vrot.slane %v5378_v45, 4 }
 0x4e8   :  { %v2165_v12 = vrot.slane %v2162_v23, 4  ;;  %1834 = vrot.lane.b32.xlu1 %v1830_v15, %s2771_s22 }
 0x4e9   :  { %v2188_v39 = vsel %vm397_vm8, %v2186_v26, %v2187_v37  ;;  %v1979_v25 = vsel %vm397_vm8, %v1977_v36, %v1978_v29  ;;  %v2018_v37 = vrot.slane %v5379_v50, 4 }
 0x4ea   :  { %v2167_v20 = vsel %vm397_vm8, %v2165_v12, %v2166_v54  ;;  %v2189_v17 = vsel %vm472_vm14, %v2183_v52, %v2188_v39  ;;  %v1980_v32 = vsel %vm548_vm0, %v1974_v30, %v1979_v25  ;;  %v5380_v12 = vld [vmem:[#allocation127_spill] sm:$0xff] }
 0x4eb   :  { %v2168_v0 = vsel %vm472_vm14, %v2162_v23, %v2167_v20  ;;  %v1997_v9 = vrot.slane %v5380_v12, 4  ;;  %v5381_v20 = vld [vmem:[#allocation133_spill] sm:$0xff]  ;;  %vm2130_vm14 = vcmask 1006592  }
 0x4ec   :  { %v2171_v38 = vadd.f32 %v2168_v0, %v2152_v62  ;;  %v2037_v0 = vrot.slane %v5381_v20, 4 }
 0x4ee   :  { %v2192_v47 = vadd.f32 %v2189_v17, %v2171_v38  ;;  %v1953_v61 = vpop.permute.xlu0 %1952  ;;  %v2263_v42 = vpop.permute.xlu2 %2262 }
 0x4ef   :  { %v1956_v44 = vrot.slane %v1953_v61, 4  ;;  %v1934_v10 = vpop.permute.xlu1 %1933  ;;  %v2266_v58 = vrot.slane %v2263_v42, 4 }
 0x4f0   :  { %v1937_v5 = vrot.slane %v1934_v10, 4  ;;  %v2211_v40 = vadd.f32 %v2208_v35, %v2192_v47 }
 0x4f1   :  { %v1958_v33 = vsel %vm397_vm8, %v1956_v44, %v1957_v18  ;;  %v2268_v53 = vsel %vm397_vm8, %v2266_v58, %v2267_v4  ;;  %v5382_v44 = vld [vmem:[#allocation123_spill] sm:$0xff]  ;;  %v5385_v58 = vld [vmem:[#allocation132_spill] sm:$0xff] }
 0x4f2   :  { %v1939_v48 = vsel %vm397_vm8, %v1937_v5, %v1938_v2  ;;  %v1959_v34 = vsel %vm548_vm0, %v1953_v61, %v1958_v33  ;;  %v2269_v59 = vsel %vm548_vm0, %v2263_v42, %v2268_v53  ;;  %v5383_v5 = vld [vmem:[#allocation130_spill] sm:$0xff] }
 0x4f3   :  { %v1940_v13 = vsel %vm511_vm15, %v1934_v10, %v1939_v48  ;;  %v2307_v10 = vrot.slane %v5382_v44, 4  ;;  %v2326_v48 = vrot.slane %v4106_v55, 4 }
 0x4f4   :  { %v1943_v43 = vadd.f32 %v1940_v13, %v1922_v8 }
 0x4f6   :  { %v1962_v3 = vadd.f32 %v1959_v34, %v1943_v43  ;;  %v2242_v56 = vpop.permute.xlu0 %2241  ;;  %v2033_v51 = vpop.permute.xlu2 %2032 }
 0x4f7   :  { %v2245_v41 = vrot.slane %v2242_v56, 4  ;;  %v2223_v28 = vpop.permute.xlu1 %2222  ;;  %v2036_v6 = vrot.slane %v2033_v51, 4 }
 0x4f8   :  { %v2226_v11 = vrot.slane %v2223_v28, 4  ;;  %v1983_v46 = vadd.f32 %v1980_v32, %v1962_v3  ;;  %v5384_v32 = vld [vmem:[#allocation126_spill] sm:$0xff] }
 0x4f9   :  { %v2247_v8 = vsel %vm397_vm8, %v2245_v41, %v2246_v19  ;;  %v2038_v47 = vsel %vm397_vm8, %v2036_v6, %v2037_v0  ;;  %v2077_v41 = vrot.slane %v5384_v32, 4 }
 0x4fa   :  { %v2228_v15 = vsel %vm397_vm8, %v2226_v11, %v2227_v7  ;;  %v2248_v31 = vsel %vm548_vm0, %v2242_v56, %v2247_v8  ;;  %v2039_v14 = vsel %vm622_vm2, %v2033_v51, %v2038_v47  ;;  %v2058_v11 = vrot.slane %v5385_v58, 4  ;;  %v5387_v47 = vld [vmem:[#allocation129_spill] sm:$0xff] }
 0x4fb   :  { %v2229_v52 = vsel %vm511_vm15, %v2223_v28, %v2228_v15  ;;  %v2098_v15 = vrot.slane %v4121_v21, 4  ;;  %vm2419_vm15 = vcmask 998400  }
 0x4fc   :  { %v2232_v22 = vadd.f32 %v2229_v52, %v2211_v40  ;;  %v2286_v40 = vrot.slane %v5383_v5, 4 }
 0x4fe   :  { %v2251_v30 = vadd.f32 %v2248_v31, %v2232_v22  ;;  %v2014_v26 = vpop.permute.xlu0 %2013  ;;  %v2322_v23 = vpop.permute.xlu2 %2321 }
 0x4ff   :  { %v2017_v54 = vrot.slane %v2014_v26, 4  ;;  %v1993_v24 = vpop.permute.xlu1 %1992  ;;  %v2325_v16 = vrot.slane %v2322_v23, 4 }
 0x500   :  { %v1996_v39 = vrot.slane %v1993_v24, 4  ;;  %v2272_v62 = vadd.f32 %v2269_v59, %v2251_v30  ;;  %v5386_v59 = vld [vmem:[#allocation134_spill] sm:$0xff] }
 0x501   :  { %v2019_v57 = vsel %vm397_vm8, %v2017_v54, %v2018_v37  ;;  %v2327_v34 = vsel %vm397_vm8, %v2325_v16, %v2326_v48  ;;  %v2347_v54 = vrot.slane %v5386_v59, 4 }
 0x502   :  { %v1998_v38 = vsel %vm397_vm8, %v1996_v39, %v1997_v9  ;;  %v2020_v42 = vsel %vm585_vm1, %v2014_v26, %v2019_v57  ;;  %v2328_v28 = vsel %vm622_vm2, %v2322_v23, %v2327_v34 }
 0x503   :  { %v1999_v17 = vsel %vm585_vm1, %v1993_v24, %v1998_v38 }
 0x504   :  { %v2002_v61 = vadd.f32 %v1999_v17, %v1983_v46 }
 0x506   :  { %v2023_v49 = vadd.f32 %v2020_v42, %v2002_v61  ;;  %v2303_v18 = vpop.permute.xlu0 %2302  ;;  %v2094_v35 = vpop.permute.xlu2 %2093  ;;  %v2366_v61 = vrot.slane %v5387_v47, 4 }
 0x507   :  { %v2306_v2 = vrot.slane %v2303_v18, 4  ;;  %v2282_v36 = vpop.permute.xlu1 %2281  ;;  %v2097_v46 = vrot.slane %v2094_v35, 4 }
 0x508   :  { %v2285_v29 = vrot.slane %v2282_v36, 4  ;;  %v2042_v33 = vadd.f32 %v2039_v14, %v2023_v49 }
 0x509   :  { %v2308_v13 = vsel %vm397_vm8, %v2306_v2, %v2307_v10  ;;  %v2099_v31 = vsel %vm397_vm8, %v2097_v46, %v2098_v15 }
 0x50a   :  { %v2287_v25 = vsel %vm397_vm8, %v2285_v29, %v2286_v40  ;;  %v2309_v56 = vsel %vm585_vm1, %v2303_v18, %v2308_v13 }
 0x50b   :  { %v2288_v43 = vsel %vm585_vm1, %v2282_v36, %v2287_v25 }
 0x50c   :  { %v2291_v3 = vadd.f32 %v2288_v43, %v2272_v62 }
 0x50e   :  { %v2312_v51 = vadd.f32 %v2309_v56, %v2291_v3  ;;  %v2073_v1 = vpop.permute.xlu0 %2072  ;;  %v2113_v19 = vpop.permute.xlu2 %2112  ;;  %v681_v3 = vld [vmem:[%s5330_s28] ss:$8 sm:$0x3] }
 0x50f   :  { %v2076_v60 = vrot.slane %v2073_v1, 4  ;;  %v2054_v55 = vpop.permute.xlu1 %2053  ;;  %v2114_v7 = vrot.slane %v2113_v19, 4  ;;  %v684_v56 = vperm.slane %v681_v3, 1 }
 0x510   :  { %v2057_v45 = vrot.slane %v2054_v55, 4  ;;  %v2331_v4 = vadd.f32 %v2328_v28, %v2312_v51 }
 0x511   :  { %v2120_v8 = vmul.f32 %v2114_v7, %v4124_v27  ;;  %v2078_v52 = vsel %vm397_vm8, %v2076_v60, %v2077_v41  ;;  %v2100_v27 = vsel %vm169_vm6, %v2094_v35, %v2099_v31  ;;  %v2116_v37 = vsel %vm2115_vm10, %v2114_v7, %v2113_v19  ;;  %v5388_v35 = vld [vmem:[#allocation135_spill] sm:$0xff] }
 0x512   :  { %v2059_v53 = vsel %vm397_vm8, %v2057_v45, %v2058_v11  ;;  %v2079_v26 = vsel %vm169_vm6, %v2073_v1, %v2078_v52  ;;  %v2372_v44 = vadd.f32 %v5387_v47, %v5388_v35  ;;  %v683_v19 = vperm.slane %v681_v3, 0  ;;  %v5390_v3 = vld [vmem:[#allocation11_spill] sm:$0xff] }
 0x513   :  { %v2060_v22 = vsel %vm622_vm2, %v2054_v55, %v2059_v53  ;;  %2125 = vrot.lane.b32.xlu2 %v2120_v8, %s2772_s23  ;;  %v685_v32 = vrot.slane %v684_v56, 4 }
 0x514   :  { %v2063_v30 = vadd.f32 %v2060_v22, %v2042_v33 }
 0x515   :  { %v686_v55 = vsel %vm397_vm8, %v683_v19, %v685_v32  ;;  %v5392_v19 = vld [vmem:[#allocation10_spill] sm:$0xff] }
 0x516   :  { %v2082_v23 = vadd.f32 %v2079_v26, %v2063_v30  ;;  %v2362_v50 = vpop.permute.xlu0 %2361  ;;  %v688_v52 = vmul.f32 %v686_v55, %v4245_v63 }
 0x517   :  { %v2343_v21 = vpop.permute.xlu1 %2342  ;;  %v2365_v0 = vrot.slane %v2362_v50, 4 }
 0x518   :  { %v2103_v24 = vadd.f32 %v2100_v27, %v2082_v23  ;;  %v2346_v12 = vrot.slane %v2343_v21, 4 }
 0x519   :  { %v2367_v42 = vsel %vm397_vm8, %v2365_v0, %v2366_v61 }
 0x51a   :  { %v2119_v9 = vmul.f32 %v2116_v37, %v2103_v24  ;;  %v2348_v6 = vsel %vm397_vm8, %v2346_v12, %v2347_v54  ;;  %v2368_v18 = vsel %vm169_vm6, %v2362_v50, %v2367_v42 }
 0x51b   :  { %v2349_v39 = vsel %vm622_vm2, %v2343_v21, %v2348_v6 }
 0x51c   :  { %v2352_v62 = vadd.f32 %v2349_v39, %v2331_v4  ;;  %2123 = vrot.lane.b32.xlu0 %v2119_v9, %s2772_s23 }
 0x51e   :  { %v2385_v20 = vpop.permute.xlu0 %2384  ;;  %v2371_v14 = vadd.f32 %v2368_v18, %v2352_v62 }
 0x51f   :  { %v2387_v57 = vrot.slane %v2385_v20, 4  ;;  %v2383_v38 = vpop.permute.xlu1 %2382  ;;  %v2393_v36 = vadd.f32 %v2385_v20, %v2372_v44 }
 0x520   :  { %v2386_v17 = vrot.slane %v2383_v38, 4 }
 0x522   :  { %v2388_v49 = vsel %vm397_vm8, %v2386_v17, %v2387_v57 }
 0x523   :  { %v2389_v10 = vsel %vm169_vm6, %v2383_v38, %v2388_v49  ;;  %vm975_vm6 = vcmask 1039360  }
 0x524   :  { %v2392_v40 = vadd.f32 %v2389_v10, %v2371_v14 }
 0x526   :  { %v971_v48 = vpop.permute.xlu0 %970 }
 0x527   :  { %v2402_v2 = vpop.permute.xlu1 %2401  ;;  %v973_v28 = vrot.slane %v971_v48, 4 }
 0x528   :  { %v2403_v5 = vrot.slane %v2402_v2, 4 }
 0x52a   :  { %v2405_v16 = vsel %vm2404_vm11, %v2403_v5, %v2402_v2  ;;  %v2409_v29 = vmul.f32 %v2403_v5, %v2393_v36 }
 0x52b   :  { %v2408_v33 = vmul.f32 %v2405_v16, %v2392_v40 }
 0x52c   :  { %2414 = vrot.lane.b32.xlu0 %v2409_v29, %s2773_s26 }
 0x52d   :  { %2412 = vrot.lane.b32.xlu1 %v2408_v33, %s2773_s26 }
 0x52e   :  { %v1259_v25 = vpop.permute.xlu0 %1258 }
 0x52f   :  { %v969_v13 = vpop.permute.xlu1 %968  ;;  %v1261_v58 = vrot.slane %v1259_v25, 4 }
 0x530   :  { %v972_v41 = vrot.slane %v969_v13, 4 }
 0x532   :  { %v974_v11 = vsel %vm397_vm8, %v972_v41, %v973_v28  ;;  %v5393_v28 = vld [vmem:[#allocation16_spill] sm:$0xff] }
 0x533   :  { %v976_v53 = vsel %vm975_vm6, %v969_v13, %v974_v11  ;;  %v5396_v11 = vld [vmem:[#allocation17_spill] sm:$0xff] }
 0x534   :  { %v978_v50 = vadd.f32 %v976_v53, %v688_v52  ;;  %v5399_v52 = vld [vmem:[#allocation21_spill] sm:$0xff] }
 0x536   :  { %v1548_v34 = vpop.permute.xlu0 %1547 }
 0x537   :  { %v1257_v43 = vpop.permute.xlu1 %1256  ;;  %v1550_v4 = vrot.slane %v1548_v34, 4 }
 0x538   :  { %v1260_v60 = vrot.slane %v1257_v43, 4 }
 0x53a   :  { %v1262_v8 = vsel %vm397_vm8, %v1260_v60, %v1261_v58 }
 0x53b   :  { %v1264_v23 = vsel %vm1263_vm4, %v1257_v43, %v1262_v8  ;;  %v5389_v43 = vld [vmem:[#allocation12_spill] sm:$0xff] }
 0x53c   :  { %v1266_v59 = vadd.f32 %v1264_v23, %v978_v50  ;;  %v5398_v8 = vld [vmem:[#allocation20_spill] sm:$0xff]  ;;  %v5402_v23 = vld [vmem:[#allocation22_spill] sm:$0xff] }
 0x53e   :  { %v1837_v1 = vpop.permute.xlu0 %1836 }
 0x53f   :  { %v1546_v51 = vpop.permute.xlu1 %1545  ;;  %v1839_v31 = vrot.slane %v1837_v1, 4 }
 0x540   :  { %v1549_v46 = vrot.slane %v1546_v51, 4 }
 0x542   :  { %v1551_v30 = vsel %vm397_vm8, %v1549_v46, %v1550_v4 }
 0x543   :  { %v1553_v21 = vsel %vm1552_vm12, %v1546_v51, %v1551_v30  ;;  %v5391_v51 = vld [vmem:[#allocation14_spill] sm:$0xff]  ;;  %v5401_v30 = vld [vmem:[#allocation19_spill] sm:$0xff] }
 0x544   :  { %v1555_v63 = vadd.f32 %v1553_v21, %v1266_v59  ;;  %v5404_v21 = vld [vmem:[#allocation24_spill] sm:$0xff] }
 0x55a   :  { %v1835_v7 = vpop.permute.xlu1 %1834 }
 0x55b   :  { %v1838_v15 = vrot.slane %v1835_v7, 4 }
 0x55d   :  { %v1840_v27 = vsel %vm397_vm8, %v1838_v15, %v1839_v31 }
 0x55e   :  { %v1842_v24 = vsel %vm1841_vm13, %v1835_v7, %v1840_v27  ;;  %v5395_v7 = vld [vmem:[#allocation13_spill] sm:$0xff]  ;;  %v5403_v27 = vld [vmem:[#allocation23_spill] sm:$0xff] }
 0x55f   :  { %v1844_v62 = vadd.f32 %v1842_v24, %v1555_v63 }
 0x56d   :  { %v2126_v22 = vpop.permute.xlu2 %2125 }
 0x56e   :  { %v2128_v37 = vrot.slane %v2126_v22, 4  ;;  %v5400_v22 = vld [vmem:[#allocation18_spill] sm:$0xff] }
 0x58e   :  { %v2124_v45 = vpop.permute.xlu0 %2123 }
 0x58f   :  { %v2127_v26 = vrot.slane %v2124_v45, 4 }
 0x591   :  { %v2129_v54 = vsel %vm397_vm8, %v2127_v26, %v2128_v37 }
 0x592   :  { %v2131_v9 = vsel %vm2130_vm14, %v2124_v45, %v2129_v54  ;;  %v5397_v45 = vld [vmem:[#allocation15_spill] sm:$0xff]  ;;  %v5405_v54 = vld [vmem:[#allocation25_spill] sm:$0xff] }
 0x593   :  { %v2133_v0 = vadd.f32 %v2131_v9, %v1844_v62 }
 0x59e   :  { %v2415_v12 = vpop.permute.xlu0 %2414 }
 0x59f   :  { %v2417_v6 = vrot.slane %v2415_v12, 4  ;;  %v2413_v39 = vpop.permute.xlu1 %2412 }
 0x5a0   :  { %v2416_v20 = vrot.slane %v2413_v39, 4 }
 0x5a2   :  { %v2418_v57 = vsel %vm397_vm8, %v2416_v20, %v2417_v6 }
 0x5a3   :  { %v2420_v38 = vsel %vm2419_vm15, %v2413_v39, %v2418_v57 }
 0x5a4   :  { %v2422_v17 = vadd.f32 %v2420_v38, %v2133_v0 }
 0x5a6   :  { %v2697_v47 = vmul.f32 -1.442695, %v2422_v17 }
 0x5a8   :  { %2731 = vpow2.f32 %v2697_v47 }
 0x5ae   :  { %v2732_v61 = vpop.eup %2731 }
 0x5af   :  { %v2426_v42 = vadd.f32 1.0, %v2732_v61 }
 0x5b1   :  { %2733 = vrcp.f32 %v2426_v42  ;;  %v2438_v44 = vand.u32 2147483648, %v2426_v42  ;;  %v2436_v14 = vand.u32 2147483647, %v2426_v42  ;;  %vm2432_vm1 = vweird.f32 %v2426_v42 }
 0x5b3   :  { %v2439_v36 = vor.u32 1.1754944e-38, %v2438_v44  ;;  %vm2437_vm8 = vcmp.eq.f32.partialorder %v2436_v14, 8.507059e+37 }
 0x5b7   :  { %v2734_v49 = vpop.eup %2733 }
 0x5b8   :  { %v2428_v18 = vmul.f32 %v2734_v49, %v2426_v42  ;;  %vm2433_vm0 = vweird.f32 %v2734_v49 }
 0x5b9   :  { %vm2434_vm2 = vmor %vm2432_vm1, %vm2433_vm0 }
 0x5ba   :  { %v2429_v35 = vsub.f32 1.0, %v2428_v18 }
 0x5bc   :  { %v2430_v10 = vmul.f32 %v2734_v49, %v2429_v35 }
 0x5be   :  { %v2431_v2 = vadd.f32 %v2734_v49, %v2430_v10 }
 0x5c0   :  { %v2435_v5 = vsel %vm2434_vm2, %v2734_v49, %v2431_v2 }
 0x5c1   :  { %v2440_v40 = vsel %vm2437_vm8, %v2439_v36, %v2435_v5 }
 0x5c2   :  { %v2443_v16 = vrot.slane %v2440_v40, 3 }
 0x5c4   :  { %v2445_v29 = vsel %vm2444_vm5, %v2440_v40, %v2443_v16  ;;  %v2446_v33 = vsel %vm135_vm3, %v2440_v40, %v2443_v16 }
 0x5c5   :  { %v2447_v48 = vrot.slane %v2446_v33, 1  ;;  %v2448_v13 = vperm.slane %v2445_v29, 0  ;;  %v2449_v25 = vperm.slane %v2445_v29, 1 }
 0x5c7   :  { %v2456_v34 = vmul.f32 %v2448_v13, %v5389_v43  ;;  %v2457_v56 = vmul.f32 %v2449_v25, %v5390_v3  ;;  %v2458_v1 = vmul.f32 %v2448_v13, %v5391_v51  ;;  %v2459_v32 = vmul.f32 %v2449_v25, %v5392_v19 }
 0x5c8   :  { %v2450_v41 = vperm.slane %v2447_v48, 0  ;;  %v2460_v60 = vmul.f32 %v2448_v13, %v5393_v28  ;;  %v2451_v55 = vperm.slane %v2447_v48, 1  ;;  %v2461_v58 = vmul.f32 %v2449_v25, %v5395_v7 }
 0x5c9   :  { %2472 = vst [vmem:[%s5394_s24] sm:$0xff] %v2456_v34  ;;  %v2462_v46 = vmul.f32 %v2448_v13, %v5396_v11  ;;  %v2463_v4 = vmul.f32 %v2449_v25, %v5397_v45 }
 0x5ca   :  { %2473 = vst [vmem:[%s5394_s24 + $0x8] sm:$0xff] %v2457_v56  ;;  %v2464_v15 = vmul.f32 %v2450_v41, %v5398_v8  ;;  %v2465_v53 = vmul.f32 %v2451_v55, %v5399_v52  ;;  %v2466_v31 = vmul.f32 %v2450_v41, %v5400_v22  ;;  %v2467_v26 = vmul.f32 %v2451_v55, %v5401_v30 }
 0x5cb   :  { %2474 = vst [vmem:[%s5394_s24 + $0x10] sm:$0xff] %v2458_v1  ;;  %v2468_v50 = vmul.f32 %v2450_v41, %v5402_v23  ;;  %v2469_v37 = vmul.f32 %v2451_v55, %v5403_v27  ;;  %v2470_v59 = vmul.f32 %v2450_v41, %v5404_v21  ;;  %v2471_v24 = vmul.f32 %v2451_v55, %v5405_v54 }
 0x5cc   :  { %2475 = vst [vmem:[%s5394_s24 + $0x18] sm:$0xff] %v2459_v32 }
 0x5cd   :  { %2476 = vst [vmem:[%s5394_s24 + $0x20] sm:$0xff] %v2460_v60 }
 0x5ce   :  { %2477 = vst [vmem:[%s5394_s24 + $0x28] sm:$0xff] %v2461_v58 }
 0x5cf   :  { %2478 = vst [vmem:[%s5394_s24 + $0x30] sm:$0xff] %v2462_v46 }
 0x5d0   :  { %2479 = vst [vmem:[%s5394_s24 + $0x38] sm:$0xff] %v2463_v4 }
 0x5d1   :  { %2480 = vst [vmem:[%s5394_s24 + $0x40] sm:$0xff] %v2464_v15 }
 0x5d2   :  { %2481 = vst [vmem:[%s5394_s24 + $0x48] sm:$0xff] %v2465_v53 }
 0x5d3   :  { %2482 = vst [vmem:[%s5394_s24 + $0x50] sm:$0xff] %v2466_v31 }
 0x5d4   :  { %2483 = vst [vmem:[%s5394_s24 + $0x58] sm:$0xff] %v2467_v26 }
 0x5d5   :  { %2484 = vst [vmem:[%s5394_s24 + $0x60] sm:$0xff] %v2468_v50 }
 0x5d6   :  { %2485 = vst [vmem:[%s5394_s24 + $0x68] sm:$0xff] %v2469_v37 }
 0x5d7   :  { %2486 = vst [vmem:[%s5394_s24 + $0x70] sm:$0xff] %v2470_v59 }
 0x5d8   :  { %2487 = vst [vmem:[%s5394_s24 + $0x78] sm:$0xff] %v2471_v24 }
 0x5d9   :  { %2492 = vsyncpa [#allocation4], 1 }

</bundles_post_ra>
